<compile_context>
chip_gen: v6e
topology: v6e:2x2x1
jax: 0.10.0
libtpu: 0.0.40
codegen_flags: <defaults>
</compile_context>

<pallas_src>
import functools

import jax
import jax.numpy as jnp
from jax.experimental import pallas as pl
from jax.experimental.pallas import tpu as pltpu

SEQ_LEN = 64       # x.view(B, 64, 64) -> 64 timesteps
INPUT_SIZE = 64    # 64 features per timestep
HIDDEN = 100       # nn.RNN(hidden_size=100)
NUM_CLASSES = 40   # nn.Linear(hidden_size, 40)
HP = 128           # hidden padded to lane width (zero-padded cols/rows)
CP = 128           # classes padded to lane width (zero-padded cols)


def _round_up(n, m):
    return ((n + m - 1) // m) * m


def rnn_classifier_kernel(x_ref, wih_ref, whh_ref, b_ref, wfc_ref, bfc_ref,
                          out_ref, p_scratch):
    """One batch block: hoisted input projection + 64-step tanh recurrence + FC."""
    blk = out_ref.shape[0]  # padded rows in this batch block (multiple of 8)

    # Input projection for ALL timesteps of this block in one MXU call:
    #   P = x @ W_ih^T + (b_ih + b_hh)   -> (T*blk, HP) f32 in VMEM scratch.
    # x_ref is time-major (T, blk, D); merging the two leading dims is a
    # layout-preserving reshape (blk is a multiple of 8 sublanes).
    x2d = x_ref[...].reshape(SEQ_LEN * blk, INPUT_SIZE)        # bf16
    p_scratch[...] = (
        jnp.dot(x2d, wih_ref[...], preferred_element_type=jnp.float32)
        + b_ref[...])
    # TODO(synk): on v7x, a bf16 p_scratch would halve the dominant VMEM consumer
    # and allow ~2x larger batch blocks.

    w_hh = whh_ref[...]  # (HP, HP) bf16, loop-invariant
    # TODO(synk): if the bundle dump shows the loop-invariant RHS re-pushed per
    # step, pin W_hh with pltpu.matmul_push_rhs / matmul_acc_lhs / matmul_pop.

    def body(start, h):
        p_t = p_scratch[pl.ds(start, blk), :]                  # f32
        return jnp.tanh(p_t + jnp.dot(h.astype(jnp.bfloat16), w_hh,
                                      preferred_element_type=jnp.float32))

    def step_dynamic(t, h):
        return body(pl.multiple_of(t * blk, blk), h)

    # t = 0: h_{-1} == 0, so skip the (0 @ W_hh) matmul entirely.
    h = jnp.tanh(p_scratch[pl.ds(0, blk), :])
    if blk <= 64:
        # Small block: full static unroll (small live state, max scheduler view).
        for t in range(1, SEQ_LEN):
            h = body(t * blk, h)
    else:
        # Large block: moderate unroll bounds live ranges and avoids vreg spills.
        h = jax.lax.fori_loop(1, SEQ_LEN, step_dynamic, h, unroll=8)

    # out = tanh(outputs[:, -1, :]); dropout(p=0.2) is identity in eval mode.
    out = jnp.tanh(h)
    out_ref[...] = (jnp.dot(out.astype(jnp.bfloat16), wfc_ref[...],
                            preferred_element_type=jnp.float32)
                    + bfc_ref[...]).astype(out_ref.dtype)


@functools.partial(jax.jit, static_argnames=("block_rows",))
def rnn_classifier_forward(x_nchw, params, *, block_rows=128):
    """x_nchw: (B, 1, 64, 64) float32  ->  logits (B, 40) float32.

    block_rows: padded batch rows per grid step.  128 fits every generation's
    default scoped VMEM (~6 MiB/block); use 256-512 on v6e/v5e (raise
    vmem_limit_bytes), keep 128-256 on v7x (64 MiB physical VMEM).
    """
    B = x_nchw.shape[0]
    blk = min(block_rows, _round_up(B, 8))
    bp = _round_up(B, blk)
    n_blocks = bp // blk

    # x.view(B, 64, 64); cast to bf16 (halves HBM traffic), lay out time-major so
    # per-step P slices in the kernel are dense sublane-aligned blocks.
    # TODO(synk): for very large B, move this relayout in-kernel
    # ((BLK,T,D)->(T,BLK,D) per block) to avoid the extra HBM pass over x.
    x_seq = x_nchw.reshape(B, SEQ_LEN, INPUT_SIZE).astype(jnp.bfloat16)
    x_tbd = jnp.transpose(x_seq, (1, 0, 2))                    # (T, B, D)
    if bp != B:
        x_tbd = jnp.pad(x_tbd, ((0, 0), (0, bp - B), (0, 0)))  # (T, BP, D)

    # Zero-padded, pre-transposed weights in bf16 (x @ W layout, 128 lane-dense
    # cols).  Padded hidden lanes stay exactly 0 through the recurrence
    # (tanh(0)=0) because their W columns/rows and bias entries are zero.
    w_ih_t = jnp.zeros((INPUT_SIZE, HP), jnp.float32).at[:, :HIDDEN].set(
        params["w_ih"].T).astype(jnp.bfloat16)
    w_hh_t = jnp.zeros((HP, HP), jnp.float32).at[:HIDDEN, :HIDDEN].set(
        params["w_hh"].T).astype(jnp.bfloat16)
    b = jnp.zeros((1, HP), jnp.float32).at[0, :HIDDEN].set(
        params["b_ih"] + params["b_hh"])
    w_fc_t = jnp.zeros((HP, CP), jnp.float32).at[:HIDDEN, :NUM_CLASSES].set(
        params["w_fc"].T).astype(jnp.bfloat16)
    b_fc = jnp.zeros((1, CP), jnp.float32).at[0, :NUM_CLASSES].set(
        params["b_fc"])

    grid_spec = pltpu.PrefetchScalarGridSpec(
        num_scalar_prefetch=0,
        grid=(n_blocks,),
        in_specs=[
            pl.BlockSpec((SEQ_LEN, blk, INPUT_SIZE), lambda i: (0, i, 0)),  # x
            pl.BlockSpec((INPUT_SIZE, HP), lambda i: (0, 0)),               # W_ih^T
            pl.BlockSpec((HP, HP), lambda i: (0, 0)),                       # W_hh^T
            pl.BlockSpec((1, HP), lambda i: (0, 0)),                        # b_ih+b_hh
            pl.BlockSpec((HP, CP), lambda i: (0, 0)),                       # W_fc^T
            pl.BlockSpec((1, CP), lambda i: (0, 0)),                        # b_fc
        ],
        out_specs=pl.BlockSpec((blk, CP), lambda i: (i, 0)),
        scratch_shapes=[pltpu.VMEM((SEQ_LEN * blk, HP), jnp.float32)],
    )

    out = pl.pallas_call(
        rnn_classifier_kernel,
        out_shape=jax.ShapeDtypeStruct((bp, CP), jnp.float32),
        grid_spec=grid_spec,
        compiler_params=pltpu.CompilerParams(
            dimension_semantics=("parallel",),
            vmem_limit_bytes=64 << 20),
    )(x_tbd, w_ih_t, w_hh_t, b, w_fc_t, b_fc)

    return out[:B, :NUM_CLASSES]


def init_params(key):
    """Deterministic init mirroring PyTorch shapes: RNN(64->100), Linear(100->40)."""
    k = jax.random.split(key, 6)
    s = 1.0 / jnp.sqrt(HIDDEN)
    u = lambda kk, shape: jax.random.uniform(kk, shape, jnp.float32, -s, s)
    return {
        "w_ih": u(k[0], (HIDDEN, INPUT_SIZE)),
        "w_hh": u(k[1], (HIDDEN, HIDDEN)),
        "b_ih": u(k[2], (HIDDEN,)),
        "b_hh": u(k[3], (HIDDEN,)),
        "w_fc": u(k[4], (NUM_CLASSES, HIDDEN)),
        "b_fc": u(k[5], (NUM_CLASSES,)),
    }


def reference_forward(x_nchw, params):
    """Pure-JAX f32 reference of the PyTorch forward (eval mode)."""
    B = x_nchw.shape[0]
    x = x_nchw.reshape(B, SEQ_LEN, INPUT_SIZE)

    def step(h, x_t):
        h_new = jnp.tanh(x_t @ params["w_ih"].T + params["b_ih"]
                         + h @ params["w_hh"].T + params["b_hh"])
        return h_new, None

    h0 = jnp.zeros((B, HIDDEN), jnp.float32)
    h_last, _ = jax.lax.scan(step, h0, jnp.transpose(x, (1, 0, 2)))
    return jnp.tanh(h_last) @ params["w_fc"].T + params["b_fc"]


def reference_forward_bf16(x_nchw, params):
    """Reference with the kernel's exact mixed precision (bf16 MXU in, f32 acc/carry)."""
    bf = jnp.bfloat16
    B = x_nchw.shape[0]
    x = x_nchw.reshape(B, SEQ_LEN, INPUT_SIZE).astype(bf)
    w_ih = params["w_ih"].astype(bf)
    w_hh = params["w_hh"].astype(bf)
    w_fc = params["w_fc"].astype(bf)
    b = params["b_ih"] + params["b_hh"]

    def step(h, x_t):
        p = jnp.dot(x_t, w_ih.T, preferred_element_type=jnp.float32) + b
        h_new = jnp.tanh(p + jnp.dot(h.astype(bf), w_hh.T,
                                     preferred_element_type=jnp.float32))
        return h_new, None

    h0 = jnp.zeros((B, HIDDEN), jnp.float32)
    h_last, _ = jax.lax.scan(step, h0, jnp.transpose(x, (1, 0, 2)))
    out = jnp.tanh(h_last)
    return (jnp.dot(out.astype(bf), w_fc.T, preferred_element_type=jnp.float32)
            + params["b_fc"])


if __name__ == "__main__":
    key = jax.random.PRNGKey(0)
    kx, kp = jax.random.split(key)
    B = 2
    x = jax.random.normal(kx, (B, 1, 64, 64), jnp.float32)  # NCHW face images
    params = init_params(kp)

    logits = rnn_classifier_forward(x, params)
    logits = jax.block_until_ready(logits)
    assert logits.shape == (B, NUM_CLASSES)

    # Tight check vs. a reference using the same bf16-in/f32-accumulate precision.
    ref_mixed = reference_forward_bf16(x, params)
    assert jnp.allclose(logits, ref_mixed, rtol=5e-3, atol=5e-3), (
        float(jnp.max(jnp.abs(logits - ref_mixed))))
    # Semantic check vs. the full-f32 module forward (bf16-appropriate tolerance).
    ref_f32 = reference_forward(x, params)
    assert jnp.allclose(logits, ref_f32, rtol=5e-2, atol=5e-2), (
        float(jnp.max(jnp.abs(logits - ref_f32))))

    print("KERNEL_OK")
</pallas_src>

<mosaic_0001>
module attributes {stable_mosaic.version = 11 : i64} {
  func.func @rnn_classifier_kernel(%arg0: i32, %arg1: memref<64x8x64xbf16, #tpu.memory_space<vmem>>, %arg2: memref<64x128xbf16, #tpu.memory_space<vmem>>, %arg3: memref<128x128xbf16, #tpu.memory_space<vmem>>, %arg4: memref<1x128xf32, #tpu.memory_space<vmem>>, %arg5: memref<128x128xbf16, #tpu.memory_space<vmem>>, %arg6: memref<1x128xf32, #tpu.memory_space<vmem>>, %arg7: memref<8x128xf32, #tpu.memory_space<vmem>>, %arg8: memref<512x128xf32, #tpu.memory_space<vmem>>) attributes {dimension_semantics = [#tpu.dimension_semantics<parallel>], iteration_bounds = array<i64: 1>, scalar_prefetch = 0 : i64, scratch_operands = 1 : i64, tpu.core_type = #tpu.core_type<tc>, window_params = [{transform_indices = @transform_0, window_bounds = array<i64: 64, 8, 64>}, {pipeline_mode = #tpu.pipeline_mode<synchronous>, transform_indices = @transform_1, window_bounds = array<i64: 64, 128>}, {pipeline_mode = #tpu.pipeline_mode<synchronous>, transform_indices = @transform_2, window_bounds = array<i64: 128, 128>}, {pipeline_mode = #tpu.pipeline_mode<synchronous>, transform_indices = @transform_3, window_bounds = array<i64: 1, 128>}, {pipeline_mode = #tpu.pipeline_mode<synchronous>, transform_indices = @transform_4, window_bounds = array<i64: 128, 128>}, {pipeline_mode = #tpu.pipeline_mode<synchronous>, transform_indices = @transform_5, window_bounds = array<i64: 1, 128>}, {transform_indices = @transform_6, window_bounds = array<i64: 8, 128>}]} {
    %c0 = arith.constant 0 : index
    %c0_0 = arith.constant 0 : index
    %c0_1 = arith.constant 0 : index
    %0 = vector.load %arg1[%c0, %c0_0, %c0_1] : memref<64x8x64xbf16, #tpu.memory_space<vmem>>, vector<64x8x64xbf16>
    %1 = vector.shape_cast %0 : vector<64x8x64xbf16> to vector<512x64xbf16>
    %c0_2 = arith.constant 0 : index
    %c0_3 = arith.constant 0 : index
    %2 = vector.load %arg2[%c0_2, %c0_3] : memref<64x128xbf16, #tpu.memory_space<vmem>>, vector<64x128xbf16>
    %cst = arith.constant dense<0.000000e+00> : vector<512x128xf32>
    %3 = tpu.matmul %1, %2, %cst {dimension_numbers = #tpu.dot_dimension_numbers<[1], [0], [0], [1], [0, 0, 1, 1], [], []>} : vector<512x64xbf16>, vector<64x128xbf16>, vector<512x128xf32> -> vector<512x128xf32>
    %c0_4 = arith.constant 0 : index
    %c0_5 = arith.constant 0 : index
    %4 = vector.load %arg4[%c0_4, %c0_5] : memref<1x128xf32, #tpu.memory_space<vmem>>, vector<1x128xf32>
    %5 = vector.broadcast %4 : vector<1x128xf32> to vector<512x128xf32>
    %6 = arith.addf %3, %5 : vector<512x128xf32>
    %c0_6 = arith.constant 0 : index
    %c0_7 = arith.constant 0 : index
    %7 = vector.load %arg8[%c0_6, %c0_7] : memref<512x128xf32, #tpu.memory_space<vmem>>, vector<512x128xf32>
    tpu.vector_store %arg8[%c0_6, %c0_7], %6 {strides = array<i32>} : memref<512x128xf32, #tpu.memory_space<vmem>>, vector<512x128xf32>,
    %c0_8 = arith.constant 0 : index
    %c0_9 = arith.constant 0 : index
    %8 = vector.load %arg3[%c0_8, %c0_9] : memref<128x128xbf16, #tpu.memory_space<vmem>>, vector<128x128xbf16>
    %c0_10 = arith.constant 0 : index
    %c0_11 = arith.constant 0 : index
    %9 = vector.load %arg8[%c0_10, %c0_11] : memref<512x128xf32, #tpu.memory_space<vmem>>, vector<8x128xf32>
    %10 = math.tanh %9 : vector<8x128xf32>
    %c8 = arith.constant 8 : index
    %c0_12 = arith.constant 0 : index
    %11 = vector.load %arg8[%c8, %c0_12] : memref<512x128xf32, #tpu.memory_space<vmem>>, vector<8x128xf32>
    %12 = arith.truncf %10 : vector<8x128xf32> to vector<8x128xbf16>
    %cst_13 = arith.constant dense<0.000000e+00> : vector<8x128xf32>
    %13 = tpu.matmul %12, %8, %cst_13 {dimension_numbers = #tpu.dot_dimension_numbers<[1], [0], [0], [1], [0, 0, 1, 1], [], []>} : vector<8x128xbf16>, vector<128x128xbf16>, vector<8x128xf32> -> vector<8x128xf32>
    %14 = arith.addf %11, %13 : vector<8x128xf32>
    %15 = math.tanh %14 : vector<8x128xf32>
    %c16 = arith.constant 16 : index
    %c0_14 = arith.constant 0 : index
    %16 = vector.load %arg8[%c16, %c0_14] : memref<512x128xf32, #tpu.memory_space<vmem>>, vector<8x128xf32>
    %17 = arith.truncf %15 : vector<8x128xf32> to vector<8x128xbf16>
    %cst_15 = arith.constant dense<0.000000e+00> : vector<8x128xf32>
    %18 = tpu.matmul %17, %8, %cst_15 {dimension_numbers = #tpu.dot_dimension_numbers<[1], [0], [0], [1], [0, 0, 1, 1], [], []>} : vector<8x128xbf16>, vector<128x128xbf16>, vector<8x128xf32> -> vector<8x128xf32>
    %19 = arith.addf %16, %18 : vector<8x128xf32>
    %20 = math.tanh %19 : vector<8x128xf32>
    %c24 = arith.constant 24 : index
    %c0_16 = arith.constant 0 : index
    %21 = vector.load %arg8[%c24, %c0_16] : memref<512x128xf32, #tpu.memory_space<vmem>>, vector<8x128xf32>
    %22 = arith.truncf %20 : vector<8x128xf32> to vector<8x128xbf16>
    %cst_17 = arith.constant dense<0.000000e+00> : vector<8x128xf32>
    %23 = tpu.matmul %22, %8, %cst_17 {dimension_numbers = #tpu.dot_dimension_numbers<[1], [0], [0], [1], [0, 0, 1, 1], [], []>} : vector<8x128xbf16>, vector<128x128xbf16>, vector<8x128xf32> -> vector<8x128xf32>
    %24 = arith.addf %21, %23 : vector<8x128xf32>
    %25 = math.tanh %24 : vector<8x128xf32>
    %c32 = arith.constant 32 : index
    %c0_18 = arith.constant 0 : index
    %26 = vector.load %arg8[%c32, %c0_18] : memref<512x128xf32, #tpu.memory_space<vmem>>, vector<8x128xf32>
    %27 = arith.truncf %25 : vector<8x128xf32> to vector<8x128xbf16>
    %cst_19 = arith.constant dense<0.000000e+00> : vector<8x128xf32>
    %28 = tpu.matmul %27, %8, %cst_19 {dimension_numbers = #tpu.dot_dimension_numbers<[1], [0], [0], [1], [0, 0, 1, 1], [], []>} : vector<8x128xbf16>, vector<128x128xbf16>, vector<8x128xf32> -> vector<8x128xf32>
    %29 = arith.addf %26, %28 : vector<8x128xf32>
    %30 = math.tanh %29 : vector<8x128xf32>
    %c40 = arith.constant 40 : index
    %c0_20 = arith.constant 0 : index
    %31 = vector.load %arg8[%c40, %c0_20] : memref<512x128xf32, #tpu.memory_space<vmem>>, vector<8x128xf32>
    %32 = arith.truncf %30 : vector<8x128xf32> to vector<8x128xbf16>
    %cst_21 = arith.constant dense<0.000000e+00> : vector<8x128xf32>
    %33 = tpu.matmul %32, %8, %cst_21 {dimension_numbers = #tpu.dot_dimension_numbers<[1], [0], [0], [1], [0, 0, 1, 1], [], []>} : vector<8x128xbf16>, vector<128x128xbf16>, vector<8x128xf32> -> vector<8x128xf32>
    %34 = arith.addf %31, %33 : vector<8x128xf32>
    %35 = math.tanh %34 : vector<8x128xf32>
    %c48 = arith.constant 48 : index
    %c0_22 = arith.constant 0 : index
    %36 = vector.load %arg8[%c48, %c0_22] : memref<512x128xf32, #tpu.memory_space<vmem>>, vector<8x128xf32>
    %37 = arith.truncf %35 : vector<8x128xf32> to vector<8x128xbf16>
    %cst_23 = arith.constant dense<0.000000e+00> : vector<8x128xf32>
    %38 = tpu.matmul %37, %8, %cst_23 {dimension_numbers = #tpu.dot_dimension_numbers<[1], [0], [0], [1], [0, 0, 1, 1], [], []>} : vector<8x128xbf16>, vector<128x128xbf16>, vector<8x128xf32> -> vector<8x128xf32>
    %39 = arith.addf %36, %38 : vector<8x128xf32>
    %40 = math.tanh %39 : vector<8x128xf32>
    %c56 = arith.constant 56 : index
    %c0_24 = arith.constant 0 : index
    %41 = vector.load %arg8[%c56, %c0_24] : memref<512x128xf32, #tpu.memory_space<vmem>>, vector<8x128xf32>
    %42 = arith.truncf %40 : vector<8x128xf32> to vector<8x128xbf16>
    %cst_25 = arith.constant dense<0.000000e+00> : vector<8x128xf32>
    %43 = tpu.matmul %42, %8, %cst_25 {dimension_numbers = #tpu.dot_dimension_numbers<[1], [0], [0], [1], [0, 0, 1, 1], [], []>} : vector<8x128xbf16>, vector<128x128xbf16>, vector<8x128xf32> -> vector<8x128xf32>
    %44 = arith.addf %41, %43 : vector<8x128xf32>
    %45 = math.tanh %44 : vector<8x128xf32>
    %c64 = arith.constant 64 : index
    %c0_26 = arith.constant 0 : index
    %46 = vector.load %arg8[%c64, %c0_26] : memref<512x128xf32, #tpu.memory_space<vmem>>, vector<8x128xf32>
    %47 = arith.truncf %45 : vector<8x128xf32> to vector<8x128xbf16>
    %cst_27 = arith.constant dense<0.000000e+00> : vector<8x128xf32>
    %48 = tpu.matmul %47, %8, %cst_27 {dimension_numbers = #tpu.dot_dimension_numbers<[1], [0], [0], [1], [0, 0, 1, 1], [], []>} : vector<8x128xbf16>, vector<128x128xbf16>, vector<8x128xf32> -> vector<8x128xf32>
    %49 = arith.addf %46, %48 : vector<8x128xf32>
    %50 = math.tanh %49 : vector<8x128xf32>
    %c72 = arith.constant 72 : index
    %c0_28 = arith.constant 0 : index
    %51 = vector.load %arg8[%c72, %c0_28] : memref<512x128xf32, #tpu.memory_space<vmem>>, vector<8x128xf32>
    %52 = arith.truncf %50 : vector<8x128xf32> to vector<8x128xbf16>
    %cst_29 = arith.constant dense<0.000000e+00> : vector<8x128xf32>
    %53 = tpu.matmul %52, %8, %cst_29 {dimension_numbers = #tpu.dot_dimension_numbers<[1], [0], [0], [1], [0, 0, 1, 1], [], []>} : vector<8x128xbf16>, vector<128x128xbf16>, vector<8x128xf32> -> vector<8x128xf32>
    %54 = arith.addf %51, %53 : vector<8x128xf32>
    %55 = math.tanh %54 : vector<8x128xf32>
    %c80 = arith.constant 80 : index
    %c0_30 = arith.constant 0 : index
    %56 = vector.load %arg8[%c80, %c0_30] : memref<512x128xf32, #tpu.memory_space<vmem>>, vector<8x128xf32>
    %57 = arith.truncf %55 : vector<8x128xf32> to vector<8x128xbf16>
    %cst_31 = arith.constant dense<0.000000e+00> : vector<8x128xf32>
    %58 = tpu.matmul %57, %8, %cst_31 {dimension_numbers = #tpu.dot_dimension_numbers<[1], [0], [0], [1], [0, 0, 1, 1], [], []>} : vector<8x128xbf16>, vector<128x128xbf16>, vector<8x128xf32> -> vector<8x128xf32>
    %59 = arith.addf %56, %58 : vector<8x128xf32>
    %60 = math.tanh %59 : vector<8x128xf32>
    %c88 = arith.constant 88 : index
    %c0_32 = arith.constant 0 : index
    %61 = vector.load %arg8[%c88, %c0_32] : memref<512x128xf32, #tpu.memory_space<vmem>>, vector<8x128xf32>
    %62 = arith.truncf %60 : vector<8x128xf32> to vector<8x128xbf16>
    %cst_33 = arith.constant dense<0.000000e+00> : vector<8x128xf32>
    %63 = tpu.matmul %62, %8, %cst_33 {dimension_numbers = #tpu.dot_dimension_numbers<[1], [0], [0], [1], [0, 0, 1, 1], [], []>} : vector<8x128xbf16>, vector<128x128xbf16>, vector<8x128xf32> -> vector<8x128xf32>
    %64 = arith.addf %61, %63 : vector<8x128xf32>
    %65 = math.tanh %64 : vector<8x128xf32>
    %c96 = arith.constant 96 : index
    %c0_34 = arith.constant 0 : index
    %66 = vector.load %arg8[%c96, %c0_34] : memref<512x128xf32, #tpu.memory_space<vmem>>, vector<8x128xf32>
    %67 = arith.truncf %65 : vector<8x128xf32> to vector<8x128xbf16>
    %cst_35 = arith.constant dense<0.000000e+00> : vector<8x128xf32>
    %68 = tpu.matmul %67, %8, %cst_35 {dimension_numbers = #tpu.dot_dimension_numbers<[1], [0], [0], [1], [0, 0, 1, 1], [], []>} : vector<8x128xbf16>, vector<128x128xbf16>, vector<8x128xf32> -> vector<8x128xf32>
    %69 = arith.addf %66, %68 : vector<8x128xf32>
    %70 = math.tanh %69 : vector<8x128xf32>
    %c104 = arith.constant 104 : index
    %c0_36 = arith.constant 0 : index
    %71 = vector.load %arg8[%c104, %c0_36] : memref<512x128xf32, #tpu.memory_space<vmem>>, vector<8x128xf32>
    %72 = arith.truncf %70 : vector<8x128xf32> to vector<8x128xbf16>
    %cst_37 = arith.constant dense<0.000000e+00> : vector<8x128xf32>
    %73 = tpu.matmul %72, %8, %cst_37 {dimension_numbers = #tpu.dot_dimension_numbers<[1], [0], [0], [1], [0, 0, 1, 1], [], []>} : vector<8x128xbf16>, vector<128x128xbf16>, vector<8x128xf32> -> vector<8x128xf32>
    %74 = arith.addf %71, %73 : vector<8x128xf32>
    %75 = math.tanh %74 : vector<8x128xf32>
    %c112 = arith.constant 112 : index
    %c0_38 = arith.constant 0 : index
    %76 = vector.load %arg8[%c112, %c0_38] : memref<512x128xf32, #tpu.memory_space<vmem>>, vector<8x128xf32>
    %77 = arith.truncf %75 : vector<8x128xf32> to vector<8x128xbf16>
    %cst_39 = arith.constant dense<0.000000e+00> : vector<8x128xf32>
    %78 = tpu.matmul %77, %8, %cst_39 {dimension_numbers = #tpu.dot_dimension_numbers<[1], [0], [0], [1], [0, 0, 1, 1], [], []>} : vector<8x128xbf16>, vector<128x128xbf16>, vector<8x128xf32> -> vector<8x128xf32>
    %79 = arith.addf %76, %78 : vector<8x128xf32>
    %80 = math.tanh %79 : vector<8x128xf32>
    %c120 = arith.constant 120 : index
    %c0_40 = arith.constant 0 : index
    %81 = vector.load %arg8[%c120, %c0_40] : memref<512x128xf32, #tpu.memory_space<vmem>>, vector<8x128xf32>
    %82 = arith.truncf %80 : vector<8x128xf32> to vector<8x128xbf16>
    %cst_41 = arith.constant dense<0.000000e+00> : vector<8x128xf32>
    %83 = tpu.matmul %82, %8, %cst_41 {dimension_numbers = #tpu.dot_dimension_numbers<[1], [0], [0], [1], [0, 0, 1, 1], [], []>} : vector<8x128xbf16>, vector<128x128xbf16>, vector<8x128xf32> -> vector<8x128xf32>
    %84 = arith.addf %81, %83 : vector<8x128xf32>
    %85 = math.tanh %84 : vector<8x128xf32>
    %c128 = arith.constant 128 : index
    %c0_42 = arith.constant 0 : index
    %86 = vector.load %arg8[%c128, %c0_42] : memref<512x128xf32, #tpu.memory_space<vmem>>, vector<8x128xf32>
    %87 = arith.truncf %85 : vector<8x128xf32> to vector<8x128xbf16>
    %cst_43 = arith.constant dense<0.000000e+00> : vector<8x128xf32>
    %88 = tpu.matmul %87, %8, %cst_43 {dimension_numbers = #tpu.dot_dimension_numbers<[1], [0], [0], [1], [0, 0, 1, 1], [], []>} : vector<8x128xbf16>, vector<128x128xbf16>, vector<8x128xf32> -> vector<8x128xf32>
    %89 = arith.addf %86, %88 : vector<8x128xf32>
    %90 = math.tanh %89 : vector<8x128xf32>
    %c136 = arith.constant 136 : index
    %c0_44 = arith.constant 0 : index
    %91 = vector.load %arg8[%c136, %c0_44] : memref<512x128xf32, #tpu.memory_space<vmem>>, vector<8x128xf32>
    %92 = arith.truncf %90 : vector<8x128xf32> to vector<8x128xbf16>
    %cst_45 = arith.constant dense<0.000000e+00> : vector<8x128xf32>
    %93 = tpu.matmul %92, %8, %cst_45 {dimension_numbers = #tpu.dot_dimension_numbers<[1], [0], [0], [1], [0, 0, 1, 1], [], []>} : vector<8x128xbf16>, vector<128x128xbf16>, vector<8x128xf32> -> vector<8x128xf32>
    %94 = arith.addf %91, %93 : vector<8x128xf32>
    %95 = math.tanh %94 : vector<8x128xf32>
    %c144 = arith.constant 144 : index
    %c0_46 = arith.constant 0 : index
    %96 = vector.load %arg8[%c144, %c0_46] : memref<512x128xf32, #tpu.memory_space<vmem>>, vector<8x128xf32>
    %97 = arith.truncf %95 : vector<8x128xf32> to vector<8x128xbf16>
    %cst_47 = arith.constant dense<0.000000e+00> : vector<8x128xf32>
    %98 = tpu.matmul %97, %8, %cst_47 {dimension_numbers = #tpu.dot_dimension_numbers<[1], [0], [0], [1], [0, 0, 1, 1], [], []>} : vector<8x128xbf16>, vector<128x128xbf16>, vector<8x128xf32> -> vector<8x128xf32>
    %99 = arith.addf %96, %98 : vector<8x128xf32>
    %100 = math.tanh %99 : vector<8x128xf32>
    %c152 = arith.constant 152 : index
    %c0_48 = arith.constant 0 : index
    %101 = vector.load %arg8[%c152, %c0_48] : memref<512x128xf32, #tpu.memory_space<vmem>>, vector<8x128xf32>
    %102 = arith.truncf %100 : vector<8x128xf32> to vector<8x128xbf16>
    %cst_49 = arith.constant dense<0.000000e+00> : vector<8x128xf32>
    %103 = tpu.matmul %102, %8, %cst_49 {dimension_numbers = #tpu.dot_dimension_numbers<[1], [0], [0], [1], [0, 0, 1, 1], [], []>} : vector<8x128xbf16>, vector<128x128xbf16>, vector<8x128xf32> -> vector<8x128xf32>
    %104 = arith.addf %101, %103 : vector<8x128xf32>
    %105 = math.tanh %104 : vector<8x128xf32>
    %c160 = arith.constant 160 : index
    %c0_50 = arith.constant 0 : index
    %106 = vector.load %arg8[%c160, %c0_50] : memref<512x128xf32, #tpu.memory_space<vmem>>, vector<8x128xf32>
    %107 = arith.truncf %105 : vector<8x128xf32> to vector<8x128xbf16>
    %cst_51 = arith.constant dense<0.000000e+00> : vector<8x128xf32>
    %108 = tpu.matmul %107, %8, %cst_51 {dimension_numbers = #tpu.dot_dimension_numbers<[1], [0], [0], [1], [0, 0, 1, 1], [], []>} : vector<8x128xbf16>, vector<128x128xbf16>, vector<8x128xf32> -> vector<8x128xf32>
    %109 = arith.addf %106, %108 : vector<8x128xf32>
    %110 = math.tanh %109 : vector<8x128xf32>
    %c168 = arith.constant 168 : index
    %c0_52 = arith.constant 0 : index
    %111 = vector.load %arg8[%c168, %c0_52] : memref<512x128xf32, #tpu.memory_space<vmem>>, vector<8x128xf32>
    %112 = arith.truncf %110 : vector<8x128xf32> to vector<8x128xbf16>
    %cst_53 = arith.constant dense<0.000000e+00> : vector<8x128xf32>
    %113 = tpu.matmul %112, %8, %cst_53 {dimension_numbers = #tpu.dot_dimension_numbers<[1], [0], [0], [1], [0, 0, 1, 1], [], []>} : vector<8x128xbf16>, vector<128x128xbf16>, vector<8x128xf32> -> vector<8x128xf32>
    %114 = arith.addf %111, %113 : vector<8x128xf32>
    %115 = math.tanh %114 : vector<8x128xf32>
    %c176 = arith.constant 176 : index
    %c0_54 = arith.constant 0 : index
    %116 = vector.load %arg8[%c176, %c0_54] : memref<512x128xf32, #tpu.memory_space<vmem>>, vector<8x128xf32>
    %117 = arith.truncf %115 : vector<8x128xf32> to vector<8x128xbf16>
    %cst_55 = arith.constant dense<0.000000e+00> : vector<8x128xf32>
    %118 = tpu.matmul %117, %8, %cst_55 {dimension_numbers = #tpu.dot_dimension_numbers<[1], [0], [0], [1], [0, 0, 1, 1], [], []>} : vector<8x128xbf16>, vector<128x128xbf16>, vector<8x128xf32> -> vector<8x128xf32>
    %119 = arith.addf %116, %118 : vector<8x128xf32>
    %120 = math.tanh %119 : vector<8x128xf32>
    %c184 = arith.constant 184 : index
    %c0_56 = arith.constant 0 : index
    %121 = vector.load %arg8[%c184, %c0_56] : memref<512x128xf32, #tpu.memory_space<vmem>>, vector<8x128xf32>
    %122 = arith.truncf %120 : vector<8x128xf32> to vector<8x128xbf16>
    %cst_57 = arith.constant dense<0.000000e+00> : vector<8x128xf32>
    %123 = tpu.matmul %122, %8, %cst_57 {dimension_numbers = #tpu.dot_dimension_numbers<[1], [0], [0], [1], [0, 0, 1, 1], [], []>} : vector<8x128xbf16>, vector<128x128xbf16>, vector<8x128xf32> -> vector<8x128xf32>
    %124 = arith.addf %121, %123 : vector<8x128xf32>
    %125 = math.tanh %124 : vector<8x128xf32>
    %c192 = arith.constant 192 : index
    %c0_58 = arith.constant 0 : index
    %126 = vector.load %arg8[%c192, %c0_58] : memref<512x128xf32, #tpu.memory_space<vmem>>, vector<8x128xf32>
    %127 = arith.truncf %125 : vector<8x128xf32> to vector<8x128xbf16>
    %cst_59 = arith.constant dense<0.000000e+00> : vector<8x128xf32>
    %128 = tpu.matmul %127, %8, %cst_59 {dimension_numbers = #tpu.dot_dimension_numbers<[1], [0], [0], [1], [0, 0, 1, 1], [], []>} : vector<8x128xbf16>, vector<128x128xbf16>, vector<8x128xf32> -> vector<8x128xf32>
    %129 = arith.addf %126, %128 : vector<8x128xf32>
    %130 = math.tanh %129 : vector<8x128xf32>
    %c200 = arith.constant 200 : index
    %c0_60 = arith.constant 0 : index
    %131 = vector.load %arg8[%c200, %c0_60] : memref<512x128xf32, #tpu.memory_space<vmem>>, vector<8x128xf32>
    %132 = arith.truncf %130 : vector<8x128xf32> to vector<8x128xbf16>
    %cst_61 = arith.constant dense<0.000000e+00> : vector<8x128xf32>
    %133 = tpu.matmul %132, %8, %cst_61 {dimension_numbers = #tpu.dot_dimension_numbers<[1], [0], [0], [1], [0, 0, 1, 1], [], []>} : vector<8x128xbf16>, vector<128x128xbf16>, vector<8x128xf32> -> vector<8x128xf32>
    %134 = arith.addf %131, %133 : vector<8x128xf32>
    %135 = math.tanh %134 : vector<8x128xf32>
    %c208 = arith.constant 208 : index
    %c0_62 = arith.constant 0 : index
    %136 = vector.load %arg8[%c208, %c0_62] : memref<512x128xf32, #tpu.memory_space<vmem>>, vector<8x128xf32>
    %137 = arith.truncf %135 : vector<8x128xf32> to vector<8x128xbf16>
    %cst_63 = arith.constant dense<0.000000e+00> : vector<8x128xf32>
    %138 = tpu.matmul %137, %8, %cst_63 {dimension_numbers = #tpu.dot_dimension_numbers<[1], [0], [0], [1], [0, 0, 1, 1], [], []>} : vector<8x128xbf16>, vector<128x128xbf16>, vector<8x128xf32> -> vector<8x128xf32>
    %139 = arith.addf %136, %138 : vector<8x128xf32>
    %140 = math.tanh %139 : vector<8x128xf32>
    %c216 = arith.constant 216 : index
    %c0_64 = arith.constant 0 : index
    %141 = vector.load %arg8[%c216, %c0_64] : memref<512x128xf32, #tpu.memory_space<vmem>>, vector<8x128xf32>
    %142 = arith.truncf %140 : vector<8x128xf32> to vector<8x128xbf16>
    %cst_65 = arith.constant dense<0.000000e+00> : vector<8x128xf32>
    %143 = tpu.matmul %142, %8, %cst_65 {dimension_numbers = #tpu.dot_dimension_numbers<[1], [0], [0], [1], [0, 0, 1, 1], [], []>} : vector<8x128xbf16>, vector<128x128xbf16>, vector<8x128xf32> -> vector<8x128xf32>
    %144 = arith.addf %141, %143 : vector<8x128xf32>
    %145 = math.tanh %144 : vector<8x128xf32>
    %c224 = arith.constant 224 : index
    %c0_66 = arith.constant 0 : index
    %146 = vector.load %arg8[%c224, %c0_66] : memref<512x128xf32, #tpu.memory_space<vmem>>, vector<8x128xf32>
    %147 = arith.truncf %145 : vector<8x128xf32> to vector<8x128xbf16>
    %cst_67 = arith.constant dense<0.000000e+00> : vector<8x128xf32>
    %148 = tpu.matmul %147, %8, %cst_67 {dimension_numbers = #tpu.dot_dimension_numbers<[1], [0], [0], [1], [0, 0, 1, 1], [], []>} : vector<8x128xbf16>, vector<128x128xbf16>, vector<8x128xf32> -> vector<8x128xf32>
    %149 = arith.addf %146, %148 : vector<8x128xf32>
    %150 = math.tanh %149 : vector<8x128xf32>
    %c232 = arith.constant 232 : index
    %c0_68 = arith.constant 0 : index
    %151 = vector.load %arg8[%c232, %c0_68] : memref<512x128xf32, #tpu.memory_space<vmem>>, vector<8x128xf32>
    %152 = arith.truncf %150 : vector<8x128xf32> to vector<8x128xbf16>
    %cst_69 = arith.constant dense<0.000000e+00> : vector<8x128xf32>
    %153 = tpu.matmul %152, %8, %cst_69 {dimension_numbers = #tpu.dot_dimension_numbers<[1], [0], [0], [1], [0, 0, 1, 1], [], []>} : vector<8x128xbf16>, vector<128x128xbf16>, vector<8x128xf32> -> vector<8x128xf32>
    %154 = arith.addf %151, %153 : vector<8x128xf32>
    %155 = math.tanh %154 : vector<8x128xf32>
    %c240 = arith.constant 240 : index
    %c0_70 = arith.constant 0 : index
    %156 = vector.load %arg8[%c240, %c0_70] : memref<512x128xf32, #tpu.memory_space<vmem>>, vector<8x128xf32>
    %157 = arith.truncf %155 : vector<8x128xf32> to vector<8x128xbf16>
    %cst_71 = arith.constant dense<0.000000e+00> : vector<8x128xf32>
    %158 = tpu.matmul %157, %8, %cst_71 {dimension_numbers = #tpu.dot_dimension_numbers<[1], [0], [0], [1], [0, 0, 1, 1], [], []>} : vector<8x128xbf16>, vector<128x128xbf16>, vector<8x128xf32> -> vector<8x128xf32>
    %159 = arith.addf %156, %158 : vector<8x128xf32>
    %160 = math.tanh %159 : vector<8x128xf32>
    %c248 = arith.constant 248 : index
    %c0_72 = arith.constant 0 : index
    %161 = vector.load %arg8[%c248, %c0_72] : memref<512x128xf32, #tpu.memory_space<vmem>>, vector<8x128xf32>
    %162 = arith.truncf %160 : vector<8x128xf32> to vector<8x128xbf16>
    %cst_73 = arith.constant dense<0.000000e+00> : vector<8x128xf32>
    %163 = tpu.matmul %162, %8, %cst_73 {dimension_numbers = #tpu.dot_dimension_numbers<[1], [0], [0], [1], [0, 0, 1, 1], [], []>} : vector<8x128xbf16>, vector<128x128xbf16>, vector<8x128xf32> -> vector<8x128xf32>
    %164 = arith.addf %161, %163 : vector<8x128xf32>
    %165 = math.tanh %164 : vector<8x128xf32>
    %c256 = arith.constant 256 : index
    %c0_74 = arith.constant 0 : index
    %166 = vector.load %arg8[%c256, %c0_74] : memref<512x128xf32, #tpu.memory_space<vmem>>, vector<8x128xf32>
    %167 = arith.truncf %165 : vector<8x128xf32> to vector<8x128xbf16>
    %cst_75 = arith.constant dense<0.000000e+00> : vector<8x128xf32>
    %168 = tpu.matmul %167, %8, %cst_75 {dimension_numbers = #tpu.dot_dimension_numbers<[1], [0], [0], [1], [0, 0, 1, 1], [], []>} : vector<8x128xbf16>, vector<128x128xbf16>, vector<8x128xf32> -> vector<8x128xf32>
    %169 = arith.addf %166, %168 : vector<8x128xf32>
    %170 = math.tanh %169 : vector<8x128xf32>
    %c264 = arith.constant 264 : index
    %c0_76 = arith.constant 0 : index
    %171 = vector.load %arg8[%c264, %c0_76] : memref<512x128xf32, #tpu.memory_space<vmem>>, vector<8x128xf32>
    %172 = arith.truncf %170 : vector<8x128xf32> to vector<8x128xbf16>
    %cst_77 = arith.constant dense<0.000000e+00> : vector<8x128xf32>
    %173 = tpu.matmul %172, %8, %cst_77 {dimension_numbers = #tpu.dot_dimension_numbers<[1], [0], [0], [1], [0, 0, 1, 1], [], []>} : vector<8x128xbf16>, vector<128x128xbf16>, vector<8x128xf32> -> vector<8x128xf32>
    %174 = arith.addf %171, %173 : vector<8x128xf32>
    %175 = math.tanh %174 : vector<8x128xf32>
    %c272 = arith.constant 272 : index
    %c0_78 = arith.constant 0 : index
    %176 = vector.load %arg8[%c272, %c0_78] : memref<512x128xf32, #tpu.memory_space<vmem>>, vector<8x128xf32>
    %177 = arith.truncf %175 : vector<8x128xf32> to vector<8x128xbf16>
    %cst_79 = arith.constant dense<0.000000e+00> : vector<8x128xf32>
    %178 = tpu.matmul %177, %8, %cst_79 {dimension_numbers = #tpu.dot_dimension_numbers<[1], [0], [0], [1], [0, 0, 1, 1], [], []>} : vector<8x128xbf16>, vector<128x128xbf16>, vector<8x128xf32> -> vector<8x128xf32>
    %179 = arith.addf %176, %178 : vector<8x128xf32>
    %180 = math.tanh %179 : vector<8x128xf32>
    %c280 = arith.constant 280 : index
    %c0_80 = arith.constant 0 : index
    %181 = vector.load %arg8[%c280, %c0_80] : memref<512x128xf32, #tpu.memory_space<vmem>>, vector<8x128xf32>
    %182 = arith.truncf %180 : vector<8x128xf32> to vector<8x128xbf16>
    %cst_81 = arith.constant dense<0.000000e+00> : vector<8x128xf32>
    %183 = tpu.matmul %182, %8, %cst_81 {dimension_numbers = #tpu.dot_dimension_numbers<[1], [0], [0], [1], [0, 0, 1, 1], [], []>} : vector<8x128xbf16>, vector<128x128xbf16>, vector<8x128xf32> -> vector<8x128xf32>
    %184 = arith.addf %181, %183 : vector<8x128xf32>
    %185 = math.tanh %184 : vector<8x128xf32>
    %c288 = arith.constant 288 : index
    %c0_82 = arith.constant 0 : index
    %186 = vector.load %arg8[%c288, %c0_82] : memref<512x128xf32, #tpu.memory_space<vmem>>, vector<8x128xf32>
    %187 = arith.truncf %185 : vector<8x128xf32> to vector<8x128xbf16>
    %cst_83 = arith.constant dense<0.000000e+00> : vector<8x128xf32>
    %188 = tpu.matmul %187, %8, %cst_83 {dimension_numbers = #tpu.dot_dimension_numbers<[1], [0], [0], [1], [0, 0, 1, 1], [], []>} : vector<8x128xbf16>, vector<128x128xbf16>, vector<8x128xf32> -> vector<8x128xf32>
    %189 = arith.addf %186, %188 : vector<8x128xf32>
    %190 = math.tanh %189 : vector<8x128xf32>
    %c296 = arith.constant 296 : index
    %c0_84 = arith.constant 0 : index
    %191 = vector.load %arg8[%c296, %c0_84] : memref<512x128xf32, #tpu.memory_space<vmem>>, vector<8x128xf32>
    %192 = arith.truncf %190 : vector<8x128xf32> to vector<8x128xbf16>
    %cst_85 = arith.constant dense<0.000000e+00> : vector<8x128xf32>
    %193 = tpu.matmul %192, %8, %cst_85 {dimension_numbers = #tpu.dot_dimension_numbers<[1], [0], [0], [1], [0, 0, 1, 1], [], []>} : vector<8x128xbf16>, vector<128x128xbf16>, vector<8x128xf32> -> vector<8x128xf32>
    %194 = arith.addf %191, %193 : vector<8x128xf32>
    %195 = math.tanh %194 : vector<8x128xf32>
    %c304 = arith.constant 304 : index
    %c0_86 = arith.constant 0 : index
    %196 = vector.load %arg8[%c304, %c0_86] : memref<512x128xf32, #tpu.memory_space<vmem>>, vector<8x128xf32>
    %197 = arith.truncf %195 : vector<8x128xf32> to vector<8x128xbf16>
    %cst_87 = arith.constant dense<0.000000e+00> : vector<8x128xf32>
    %198 = tpu.matmul %197, %8, %cst_87 {dimension_numbers = #tpu.dot_dimension_numbers<[1], [0], [0], [1], [0, 0, 1, 1], [], []>} : vector<8x128xbf16>, vector<128x128xbf16>, vector<8x128xf32> -> vector<8x128xf32>
    %199 = arith.addf %196, %198 : vector<8x128xf32>
    %200 = math.tanh %199 : vector<8x128xf32>
    %c312 = arith.constant 312 : index
    %c0_88 = arith.constant 0 : index
    %201 = vector.load %arg8[%c312, %c0_88] : memref<512x128xf32, #tpu.memory_space<vmem>>, vector<8x128xf32>
    %202 = arith.truncf %200 : vector<8x128xf32> to vector<8x128xbf16>
    %cst_89 = arith.constant dense<0.000000e+00> : vector<8x128xf32>
    %203 = tpu.matmul %202, %8, %cst_89 {dimension_numbers = #tpu.dot_dimension_numbers<[1], [0], [0], [1], [0, 0, 1, 1], [], []>} : vector<8x128xbf16>, vector<128x128xbf16>, vector<8x128xf32> -> vector<8x128xf32>
    %204 = arith.addf %201, %203 : vector<8x128xf32>
    %205 = math.tanh %204 : vector<8x128xf32>
    %c320 = arith.constant 320 : index
    %c0_90 = arith.constant 0 : index
    %206 = vector.load %arg8[%c320, %c0_90] : memref<512x128xf32, #tpu.memory_space<vmem>>, vector<8x128xf32>
    %207 = arith.truncf %205 : vector<8x128xf32> to vector<8x128xbf16>
    %cst_91 = arith.constant dense<0.000000e+00> : vector<8x128xf32>
    %208 = tpu.matmul %207, %8, %cst_91 {dimension_numbers = #tpu.dot_dimension_numbers<[1], [0], [0], [1], [0, 0, 1, 1], [], []>} : vector<8x128xbf16>, vector<128x128xbf16>, vector<8x128xf32> -> vector<8x128xf32>
    %209 = arith.addf %206, %208 : vector<8x128xf32>
    %210 = math.tanh %209 : vector<8x128xf32>
    %c328 = arith.constant 328 : index
    %c0_92 = arith.constant 0 : index
    %211 = vector.load %arg8[%c328, %c0_92] : memref<512x128xf32, #tpu.memory_space<vmem>>, vector<8x128xf32>
    %212 = arith.truncf %210 : vector<8x128xf32> to vector<8x128xbf16>
    %cst_93 = arith.constant dense<0.000000e+00> : vector<8x128xf32>
    %213 = tpu.matmul %212, %8, %cst_93 {dimension_numbers = #tpu.dot_dimension_numbers<[1], [0], [0], [1], [0, 0, 1, 1], [], []>} : vector<8x128xbf16>, vector<128x128xbf16>, vector<8x128xf32> -> vector<8x128xf32>
    %214 = arith.addf %211, %213 : vector<8x128xf32>
    %215 = math.tanh %214 : vector<8x128xf32>
    %c336 = arith.constant 336 : index
    %c0_94 = arith.constant 0 : index
    %216 = vector.load %arg8[%c336, %c0_94] : memref<512x128xf32, #tpu.memory_space<vmem>>, vector<8x128xf32>
    %217 = arith.truncf %215 : vector<8x128xf32> to vector<8x128xbf16>
    %cst_95 = arith.constant dense<0.000000e+00> : vector<8x128xf32>
    %218 = tpu.matmul %217, %8, %cst_95 {dimension_numbers = #tpu.dot_dimension_numbers<[1], [0], [0], [1], [0, 0, 1, 1], [], []>} : vector<8x128xbf16>, vector<128x128xbf16>, vector<8x128xf32> -> vector<8x128xf32>
    %219 = arith.addf %216, %218 : vector<8x128xf32>
    %220 = math.tanh %219 : vector<8x128xf32>
    %c344 = arith.constant 344 : index
    %c0_96 = arith.constant 0 : index
    %221 = vector.load %arg8[%c344, %c0_96] : memref<512x128xf32, #tpu.memory_space<vmem>>, vector<8x128xf32>
    %222 = arith.truncf %220 : vector<8x128xf32> to vector<8x128xbf16>
    %cst_97 = arith.constant dense<0.000000e+00> : vector<8x128xf32>
    %223 = tpu.matmul %222, %8, %cst_97 {dimension_numbers = #tpu.dot_dimension_numbers<[1], [0], [0], [1], [0, 0, 1, 1], [], []>} : vector<8x128xbf16>, vector<128x128xbf16>, vector<8x128xf32> -> vector<8x128xf32>
    %224 = arith.addf %221, %223 : vector<8x128xf32>
    %225 = math.tanh %224 : vector<8x128xf32>
    %c352 = arith.constant 352 : index
    %c0_98 = arith.constant 0 : index
    %226 = vector.load %arg8[%c352, %c0_98] : memref<512x128xf32, #tpu.memory_space<vmem>>, vector<8x128xf32>
    %227 = arith.truncf %225 : vector<8x128xf32> to vector<8x128xbf16>
    %cst_99 = arith.constant dense<0.000000e+00> : vector<8x128xf32>
    %228 = tpu.matmul %227, %8, %cst_99 {dimension_numbers = #tpu.dot_dimension_numbers<[1], [0], [0], [1], [0, 0, 1, 1], [], []>} : vector<8x128xbf16>, vector<128x128xbf16>, vector<8x128xf32> -> vector<8x128xf32>
    %229 = arith.addf %226, %228 : vector<8x128xf32>
    %230 = math.tanh %229 : vector<8x128xf32>
    %c360 = arith.constant 360 : index
    %c0_100 = arith.constant 0 : index
    %231 = vector.load %arg8[%c360, %c0_100] : memref<512x128xf32, #tpu.memory_space<vmem>>, vector<8x128xf32>
    %232 = arith.truncf %230 : vector<8x128xf32> to vector<8x128xbf16>
    %cst_101 = arith.constant dense<0.000000e+00> : vector<8x128xf32>
    %233 = tpu.matmul %232, %8, %cst_101 {dimension_numbers = #tpu.dot_dimension_numbers<[1], [0], [0], [1], [0, 0, 1, 1], [], []>} : vector<8x128xbf16>, vector<128x128xbf16>, vector<8x128xf32> -> vector<8x128xf32>
    %234 = arith.addf %231, %233 : vector<8x128xf32>
    %235 = math.tanh %234 : vector<8x128xf32>
    %c368 = arith.constant 368 : index
    %c0_102 = arith.constant 0 : index
    %236 = vector.load %arg8[%c368, %c0_102] : memref<512x128xf32, #tpu.memory_space<vmem>>, vector<8x128xf32>
    %237 = arith.truncf %235 : vector<8x128xf32> to vector<8x128xbf16>
    %cst_103 = arith.constant dense<0.000000e+00> : vector<8x128xf32>
    %238 = tpu.matmul %237, %8, %cst_103 {dimension_numbers = #tpu.dot_dimension_numbers<[1], [0], [0], [1], [0, 0, 1, 1], [], []>} : vector<8x128xbf16>, vector<128x128xbf16>, vector<8x128xf32> -> vector<8x128xf32>
    %239 = arith.addf %236, %238 : vector<8x128xf32>
    %240 = math.tanh %239 : vector<8x128xf32>
    %c376 = arith.constant 376 : index
    %c0_104 = arith.constant 0 : index
    %241 = vector.load %arg8[%c376, %c0_104] : memref<512x128xf32, #tpu.memory_space<vmem>>, vector<8x128xf32>
    %242 = arith.truncf %240 : vector<8x128xf32> to vector<8x128xbf16>
    %cst_105 = arith.constant dense<0.000000e+00> : vector<8x128xf32>
    %243 = tpu.matmul %242, %8, %cst_105 {dimension_numbers = #tpu.dot_dimension_numbers<[1], [0], [0], [1], [0, 0, 1, 1], [], []>} : vector<8x128xbf16>, vector<128x128xbf16>, vector<8x128xf32> -> vector<8x128xf32>
    %244 = arith.addf %241, %243 : vector<8x128xf32>
    %245 = math.tanh %244 : vector<8x128xf32>
    %c384 = arith.constant 384 : index
    %c0_106 = arith.constant 0 : index
    %246 = vector.load %arg8[%c384, %c0_106] : memref<512x128xf32, #tpu.memory_space<vmem>>, vector<8x128xf32>
    %247 = arith.truncf %245 : vector<8x128xf32> to vector<8x128xbf16>
    %cst_107 = arith.constant dense<0.000000e+00> : vector<8x128xf32>
    %248 = tpu.matmul %247, %8, %cst_107 {dimension_numbers = #tpu.dot_dimension_numbers<[1], [0], [0], [1], [0, 0, 1, 1], [], []>} : vector<8x128xbf16>, vector<128x128xbf16>, vector<8x128xf32> -> vector<8x128xf32>
    %249 = arith.addf %246, %248 : vector<8x128xf32>
    %250 = math.tanh %249 : vector<8x128xf32>
    %c392 = arith.constant 392 : index
    %c0_108 = arith.constant 0 : index
    %251 = vector.load %arg8[%c392, %c0_108] : memref<512x128xf32, #tpu.memory_space<vmem>>, vector<8x128xf32>
    %252 = arith.truncf %250 : vector<8x128xf32> to vector<8x128xbf16>
    %cst_109 = arith.constant dense<0.000000e+00> : vector<8x128xf32>
    %253 = tpu.matmul %252, %8, %cst_109 {dimension_numbers = #tpu.dot_dimension_numbers<[1], [0], [0], [1], [0, 0, 1, 1], [], []>} : vector<8x128xbf16>, vector<128x128xbf16>, vector<8x128xf32> -> vector<8x128xf32>
    %254 = arith.addf %251, %253 : vector<8x128xf32>
    %255 = math.tanh %254 : vector<8x128xf32>
    %c400 = arith.constant 400 : index
    %c0_110 = arith.constant 0 : index
    %256 = vector.load %arg8[%c400, %c0_110] : memref<512x128xf32, #tpu.memory_space<vmem>>, vector<8x128xf32>
    %257 = arith.truncf %255 : vector<8x128xf32> to vector<8x128xbf16>
    %cst_111 = arith.constant dense<0.000000e+00> : vector<8x128xf32>
    %258 = tpu.matmul %257, %8, %cst_111 {dimension_numbers = #tpu.dot_dimension_numbers<[1], [0], [0], [1], [0, 0, 1, 1], [], []>} : vector<8x128xbf16>, vector<128x128xbf16>, vector<8x128xf32> -> vector<8x128xf32>
    %259 = arith.addf %256, %258 : vector<8x128xf32>
    %260 = math.tanh %259 : vector<8x128xf32>
    %c408 = arith.constant 408 : index
    %c0_112 = arith.constant 0 : index
    %261 = vector.load %arg8[%c408, %c0_112] : memref<512x128xf32, #tpu.memory_space<vmem>>, vector<8x128xf32>
    %262 = arith.truncf %260 : vector<8x128xf32> to vector<8x128xbf16>
    %cst_113 = arith.constant dense<0.000000e+00> : vector<8x128xf32>
    %263 = tpu.matmul %262, %8, %cst_113 {dimension_numbers = #tpu.dot_dimension_numbers<[1], [0], [0], [1], [0, 0, 1, 1], [], []>} : vector<8x128xbf16>, vector<128x128xbf16>, vector<8x128xf32> -> vector<8x128xf32>
    %264 = arith.addf %261, %263 : vector<8x128xf32>
    %265 = math.tanh %264 : vector<8x128xf32>
    %c416 = arith.constant 416 : index
    %c0_114 = arith.constant 0 : index
    %266 = vector.load %arg8[%c416, %c0_114] : memref<512x128xf32, #tpu.memory_space<vmem>>, vector<8x128xf32>
    %267 = arith.truncf %265 : vector<8x128xf32> to vector<8x128xbf16>
    %cst_115 = arith.constant dense<0.000000e+00> : vector<8x128xf32>
    %268 = tpu.matmul %267, %8, %cst_115 {dimension_numbers = #tpu.dot_dimension_numbers<[1], [0], [0], [1], [0, 0, 1, 1], [], []>} : vector<8x128xbf16>, vector<128x128xbf16>, vector<8x128xf32> -> vector<8x128xf32>
    %269 = arith.addf %266, %268 : vector<8x128xf32>
    %270 = math.tanh %269 : vector<8x128xf32>
    %c424 = arith.constant 424 : index
    %c0_116 = arith.constant 0 : index
    %271 = vector.load %arg8[%c424, %c0_116] : memref<512x128xf32, #tpu.memory_space<vmem>>, vector<8x128xf32>
    %272 = arith.truncf %270 : vector<8x128xf32> to vector<8x128xbf16>
    %cst_117 = arith.constant dense<0.000000e+00> : vector<8x128xf32>
    %273 = tpu.matmul %272, %8, %cst_117 {dimension_numbers = #tpu.dot_dimension_numbers<[1], [0], [0], [1], [0, 0, 1, 1], [], []>} : vector<8x128xbf16>, vector<128x128xbf16>, vector<8x128xf32> -> vector<8x128xf32>
    %274 = arith.addf %271, %273 : vector<8x128xf32>
    %275 = math.tanh %274 : vector<8x128xf32>
    %c432 = arith.constant 432 : index
    %c0_118 = arith.constant 0 : index
    %276 = vector.load %arg8[%c432, %c0_118] : memref<512x128xf32, #tpu.memory_space<vmem>>, vector<8x128xf32>
    %277 = arith.truncf %275 : vector<8x128xf32> to vector<8x128xbf16>
    %cst_119 = arith.constant dense<0.000000e+00> : vector<8x128xf32>
    %278 = tpu.matmul %277, %8, %cst_119 {dimension_numbers = #tpu.dot_dimension_numbers<[1], [0], [0], [1], [0, 0, 1, 1], [], []>} : vector<8x128xbf16>, vector<128x128xbf16>, vector<8x128xf32> -> vector<8x128xf32>
    %279 = arith.addf %276, %278 : vector<8x128xf32>
    %280 = math.tanh %279 : vector<8x128xf32>
    %c440 = arith.constant 440 : index
    %c0_120 = arith.constant 0 : index
    %281 = vector.load %arg8[%c440, %c0_120] : memref<512x128xf32, #tpu.memory_space<vmem>>, vector<8x128xf32>
    %282 = arith.truncf %280 : vector<8x128xf32> to vector<8x128xbf16>
    %cst_121 = arith.constant dense<0.000000e+00> : vector<8x128xf32>
    %283 = tpu.matmul %282, %8, %cst_121 {dimension_numbers = #tpu.dot_dimension_numbers<[1], [0], [0], [1], [0, 0, 1, 1], [], []>} : vector<8x128xbf16>, vector<128x128xbf16>, vector<8x128xf32> -> vector<8x128xf32>
    %284 = arith.addf %281, %283 : vector<8x128xf32>
    %285 = math.tanh %284 : vector<8x128xf32>
    %c448 = arith.constant 448 : index
    %c0_122 = arith.constant 0 : index
    %286 = vector.load %arg8[%c448, %c0_122] : memref<512x128xf32, #tpu.memory_space<vmem>>, vector<8x128xf32>
    %287 = arith.truncf %285 : vector<8x128xf32> to vector<8x128xbf16>
    %cst_123 = arith.constant dense<0.000000e+00> : vector<8x128xf32>
    %288 = tpu.matmul %287, %8, %cst_123 {dimension_numbers = #tpu.dot_dimension_numbers<[1], [0], [0], [1], [0, 0, 1, 1], [], []>} : vector<8x128xbf16>, vector<128x128xbf16>, vector<8x128xf32> -> vector<8x128xf32>
    %289 = arith.addf %286, %288 : vector<8x128xf32>
    %290 = math.tanh %289 : vector<8x128xf32>
    %c456 = arith.constant 456 : index
    %c0_124 = arith.constant 0 : index
    %291 = vector.load %arg8[%c456, %c0_124] : memref<512x128xf32, #tpu.memory_space<vmem>>, vector<8x128xf32>
    %292 = arith.truncf %290 : vector<8x128xf32> to vector<8x128xbf16>
    %cst_125 = arith.constant dense<0.000000e+00> : vector<8x128xf32>
    %293 = tpu.matmul %292, %8, %cst_125 {dimension_numbers = #tpu.dot_dimension_numbers<[1], [0], [0], [1], [0, 0, 1, 1], [], []>} : vector<8x128xbf16>, vector<128x128xbf16>, vector<8x128xf32> -> vector<8x128xf32>
    %294 = arith.addf %291, %293 : vector<8x128xf32>
    %295 = math.tanh %294 : vector<8x128xf32>
    %c464 = arith.constant 464 : index
    %c0_126 = arith.constant 0 : index
    %296 = vector.load %arg8[%c464, %c0_126] : memref<512x128xf32, #tpu.memory_space<vmem>>, vector<8x128xf32>
    %297 = arith.truncf %295 : vector<8x128xf32> to vector<8x128xbf16>
    %cst_127 = arith.constant dense<0.000000e+00> : vector<8x128xf32>
    %298 = tpu.matmul %297, %8, %cst_127 {dimension_numbers = #tpu.dot_dimension_numbers<[1], [0], [0], [1], [0, 0, 1, 1], [], []>} : vector<8x128xbf16>, vector<128x128xbf16>, vector<8x128xf32> -> vector<8x128xf32>
    %299 = arith.addf %296, %298 : vector<8x128xf32>
    %300 = math.tanh %299 : vector<8x128xf32>
    %c472 = arith.constant 472 : index
    %c0_128 = arith.constant 0 : index
    %301 = vector.load %arg8[%c472, %c0_128] : memref<512x128xf32, #tpu.memory_space<vmem>>, vector<8x128xf32>
    %302 = arith.truncf %300 : vector<8x128xf32> to vector<8x128xbf16>
    %cst_129 = arith.constant dense<0.000000e+00> : vector<8x128xf32>
    %303 = tpu.matmul %302, %8, %cst_129 {dimension_numbers = #tpu.dot_dimension_numbers<[1], [0], [0], [1], [0, 0, 1, 1], [], []>} : vector<8x128xbf16>, vector<128x128xbf16>, vector<8x128xf32> -> vector<8x128xf32>
    %304 = arith.addf %301, %303 : vector<8x128xf32>
    %305 = math.tanh %304 : vector<8x128xf32>
    %c480 = arith.constant 480 : index
    %c0_130 = arith.constant 0 : index
    %306 = vector.load %arg8[%c480, %c0_130] : memref<512x128xf32, #tpu.memory_space<vmem>>, vector<8x128xf32>
    %307 = arith.truncf %305 : vector<8x128xf32> to vector<8x128xbf16>
    %cst_131 = arith.constant dense<0.000000e+00> : vector<8x128xf32>
    %308 = tpu.matmul %307, %8, %cst_131 {dimension_numbers = #tpu.dot_dimension_numbers<[1], [0], [0], [1], [0, 0, 1, 1], [], []>} : vector<8x128xbf16>, vector<128x128xbf16>, vector<8x128xf32> -> vector<8x128xf32>
    %309 = arith.addf %306, %308 : vector<8x128xf32>
    %310 = math.tanh %309 : vector<8x128xf32>
    %c488 = arith.constant 488 : index
    %c0_132 = arith.constant 0 : index
    %311 = vector.load %arg8[%c488, %c0_132] : memref<512x128xf32, #tpu.memory_space<vmem>>, vector<8x128xf32>
    %312 = arith.truncf %310 : vector<8x128xf32> to vector<8x128xbf16>
    %cst_133 = arith.constant dense<0.000000e+00> : vector<8x128xf32>
    %313 = tpu.matmul %312, %8, %cst_133 {dimension_numbers = #tpu.dot_dimension_numbers<[1], [0], [0], [1], [0, 0, 1, 1], [], []>} : vector<8x128xbf16>, vector<128x128xbf16>, vector<8x128xf32> -> vector<8x128xf32>
    %314 = arith.addf %311, %313 : vector<8x128xf32>
    %315 = math.tanh %314 : vector<8x128xf32>
    %c496 = arith.constant 496 : index
    %c0_134 = arith.constant 0 : index
    %316 = vector.load %arg8[%c496, %c0_134] : memref<512x128xf32, #tpu.memory_space<vmem>>, vector<8x128xf32>
    %317 = arith.truncf %315 : vector<8x128xf32> to vector<8x128xbf16>
    %cst_135 = arith.constant dense<0.000000e+00> : vector<8x128xf32>
    %318 = tpu.matmul %317, %8, %cst_135 {dimension_numbers = #tpu.dot_dimension_numbers<[1], [0], [0], [1], [0, 0, 1, 1], [], []>} : vector<8x128xbf16>, vector<128x128xbf16>, vector<8x128xf32> -> vector<8x128xf32>
    %319 = arith.addf %316, %318 : vector<8x128xf32>
    %320 = math.tanh %319 : vector<8x128xf32>
    %c504 = arith.constant 504 : index
    %c0_136 = arith.constant 0 : index
    %321 = vector.load %arg8[%c504, %c0_136] : memref<512x128xf32, #tpu.memory_space<vmem>>, vector<8x128xf32>
    %322 = arith.truncf %320 : vector<8x128xf32> to vector<8x128xbf16>
    %cst_137 = arith.constant dense<0.000000e+00> : vector<8x128xf32>
    %323 = tpu.matmul %322, %8, %cst_137 {dimension_numbers = #tpu.dot_dimension_numbers<[1], [0], [0], [1], [0, 0, 1, 1], [], []>} : vector<8x128xbf16>, vector<128x128xbf16>, vector<8x128xf32> -> vector<8x128xf32>
    %324 = arith.addf %321, %323 : vector<8x128xf32>
    %325 = math.tanh %324 : vector<8x128xf32>
    %326 = math.tanh %325 : vector<8x128xf32>
    %327 = arith.truncf %326 : vector<8x128xf32> to vector<8x128xbf16>
    %c0_138 = arith.constant 0 : index
    %c0_139 = arith.constant 0 : index
    %328 = vector.load %arg5[%c0_138, %c0_139] : memref<128x128xbf16, #tpu.memory_space<vmem>>, vector<128x128xbf16>
    %cst_140 = arith.constant dense<0.000000e+00> : vector<8x128xf32>
    %329 = tpu.matmul %327, %328, %cst_140 {dimension_numbers = #tpu.dot_dimension_numbers<[1], [0], [0], [1], [0, 0, 1, 1], [], []>} : vector<8x128xbf16>, vector<128x128xbf16>, vector<8x128xf32> -> vector<8x128xf32>
    %c0_141 = arith.constant 0 : index
    %c0_142 = arith.constant 0 : index
    %330 = vector.load %arg6[%c0_141, %c0_142] : memref<1x128xf32, #tpu.memory_space<vmem>>, vector<1x128xf32>
    %331 = vector.broadcast %330 : vector<1x128xf32> to vector<8x128xf32>
    %332 = arith.addf %329, %331 : vector<8x128xf32>
    %c0_143 = arith.constant 0 : index
    %c0_144 = arith.constant 0 : index
    %333 = vector.load %arg7[%c0_143, %c0_144] : memref<8x128xf32, #tpu.memory_space<vmem>>, vector<8x128xf32>
    tpu.vector_store %arg7[%c0_143, %c0_144], %332 {strides = array<i32>} : memref<8x128xf32, #tpu.memory_space<vmem>>, vector<8x128xf32>,
    return
  }
  func.func @transform_0(%arg0: i32) -> (i32, i32, i32) {
    %c0_i32 = arith.constant 0 : i32
    %c0_i32_0 = arith.constant 0 : i32
    %c0_i32_1 = arith.constant 0 : i32
    return %c0_i32, %arg0, %c0_i32_0 : i32, i32, i32
  }
  func.func @transform_1(%arg0: i32) -> (i32, i32) {
    %c0_i32 = arith.constant 0 : i32
    %c0_i32_0 = arith.constant 0 : i32
    %c0_i32_1 = arith.constant 0 : i32
    return %c0_i32, %c0_i32_0 : i32, i32
  }
  func.func @transform_2(%arg0: i32) -> (i32, i32) {
    %c0_i32 = arith.constant 0 : i32
    %c0_i32_0 = arith.constant 0 : i32
    %c0_i32_1 = arith.constant 0 : i32
    return %c0_i32, %c0_i32_0 : i32, i32
  }
  func.func @transform_3(%arg0: i32) -> (i32, i32) {
    %c0_i32 = arith.constant 0 : i32
    %c0_i32_0 = arith.constant 0 : i32
    %c0_i32_1 = arith.constant 0 : i32
    return %c0_i32, %c0_i32_0 : i32, i32
  }
  func.func @transform_4(%arg0: i32) -> (i32, i32) {
    %c0_i32 = arith.constant 0 : i32
    %c0_i32_0 = arith.constant 0 : i32
    %c0_i32_1 = arith.constant 0 : i32
    return %c0_i32, %c0_i32_0 : i32, i32
  }
  func.func @transform_5(%arg0: i32) -> (i32, i32) {
    %c0_i32 = arith.constant 0 : i32
    %c0_i32_0 = arith.constant 0 : i32
    %c0_i32_1 = arith.constant 0 : i32
    return %c0_i32, %c0_i32_0 : i32, i32
  }
  func.func @transform_6(%arg0: i32) -> (i32, i32) {
    %c0_i32 = arith.constant 0 : i32
    %c0_i32_0 = arith.constant 0 : i32
    return %arg0, %c0_i32 : i32, i32
  }
}

</mosaic_0001>

<bundles_post_ra>
// kernel: rnn_classifier_forward.1
= control target key start
LH: loop header
LB: loop body
LE: loop exit
PB: predicated region body
PF: predicated region fallthrough
CT: control target
= control target key end

     0   :  { %v7736_v1 = vmov 0.0   ;;  %vm287_vm0 = vcmask 523264   ;;  %vm5955_vm1 = vmmov 0   ;;  %s7729_s1 = inlined_call_operand.vmem [shape: bf16[64,128], index: 1, kind: input, shape index: {}]   ;;  %s7730_s0 = inlined_call_operand.vmem [shape: bf16[64,8,64], index: 0, kind: input, shape index: {}]   ;;  %s7731_s2 = inlined_call_operand.vmem [shape: bf16[128,128], index: 2, kind: input, shape index: {}]   ;;  %s7732_s3 = inlined_call_operand.vmem [shape: f32[1,128], index: 3, kind: input, shape index: {}]   ;;  %s7733_s4 = inlined_call_operand.vmem [shape: bf16[128,128], index: 4, kind: input, shape index: {}]   ;;  %s7734_s5 = inlined_call_operand.vmem [shape: f32[1,128], index: 5, kind: input, shape index: {}]   ;;  %s7735_s6 = inlined_call_operand.vmem [shape: f32[8,128], index: 6, kind: output, shape index: {}]  }
   0x1   :  { %v5745_v0 = vld [vmem:[%s7729_s1 + $0x18] sm:$0xff]   ;;  %4463 = vmatprep.subr.bf16.mxu1 %v7736_v1  ;;  %v5746_v2 = vld [vmem:[%s7729_s1 + $0x10] sm:$0xff]   ;;  %v5747_v3 = vld [vmem:[%s7729_s1 + $0x8] sm:$0xff]   ;;  %4479 = vmatprep.mubr.msk.bf16.mxu1 %vm5955_vm1, %v7736_v1 }
   0x2   :  { %4391 = vmatprep.subr.bf16.mxu0 %v5745_v0  ;;  %v5749_v4 = vld [vmem:[%s7730_s0] sm:$0xff]   ;;  %v6008_v5 = vld [vmem:[%s7731_s2 + $0x38] sm:$0xff]   ;;  %v6017_v7 = vld [vmem:[%s7731_s2 + $0x30] sm:$0xff]  }
   0x3   :  { %4392 = vmatpush3.bf16.msra.mxu0 %v5745_v0  ;;  %4399 = vmatprep.mubr.msk.bf16.mxu0 %vm287_vm0, %v5749_v4  ;;  %v5748_v6 = vld [vmem:[%s7729_s1] sm:$0xff]   ;;  %v6023_v8 = vld [vmem:[%s7731_s2 + $0x28] sm:$0xff]   ;;  %v6052_v11 = vld [vmem:[%s7731_s2 + $0x18] sm:$0xff]  }
   0x4   :  { %4393 = vmatprep.subr.bf16.mxu0 %v5746_v2  ;;  %4464 = vmatpush3.bf16.msra.mxu1 %v6008_v5  ;;  %v5750_v9 = vld [vmem:[%s7730_s0 + $0x8] sm:$0xff]   ;;  %v6043_v10 = vld [vmem:[%s7731_s2 + $0x20] sm:$0xff]   ;;  %v6060_v12 = vld [vmem:[%s7731_s2 + $0x10] sm:$0xff]  }
   0x5   :  { %4465 = vmatprep.subr.bf16.mxu1 %v7736_v1  ;;  %v6069_v13 = vld [vmem:[%s7731_s2 + $0x8] sm:$0xff]   ;;  %v6078_v14 = vld [vmem:[%s7731_s2] sm:$0xff]   ;;  %v5759_v39 = vld [vmem:[%s7730_s0 + $0x10] sm:$0xff]  }
   0x6   :  { %v6090_v16 = vld [vmem:[%s7732_s3] ss:$0 sm:$0xff]  ;;  %v5760_v40 = vld [vmem:[%s7730_s0 + $0x18] sm:$0xff]   ;;  %v5762_v42 = vld [vmem:[%s7730_s0 + $0x28] sm:$0xff]  }
   0x7   :  { %4394 = vmatpush3.bf16.msra.mxu0 %v5746_v2  ;;  %v5761_v41 = vld [vmem:[%s7730_s0 + $0x20] sm:$0xff]   ;;  %v5763_v43 = vld [vmem:[%s7730_s0 + $0x30] sm:$0xff]   ;;  %v5764_v44 = vld [vmem:[%s7730_s0 + $0x38] sm:$0xff]  }
   0x8   :  { %4395 = vmatprep.subr.bf16.mxu0 %v5747_v3  ;;  %4466 = vmatpush3.bf16.msra.mxu1 %v6017_v7  ;;  %v5765_v45 = vld [vmem:[%s7730_s0 + $0x40] sm:$0xff]   ;;  %v5766_v46 = vld [vmem:[%s7730_s0 + $0x48] sm:$0xff]   ;;  %v5767_v47 = vld [vmem:[%s7730_s0 + $0x50] sm:$0xff]  }
   0x9   :  { %4467 = vmatprep.subr.bf16.mxu1 %v7736_v1  ;;  %v5768_v48 = vld [vmem:[%s7730_s0 + $0x58] sm:$0xff]   ;;  %v5769_v49 = vld [vmem:[%s7730_s0 + $0x60] sm:$0xff]   ;;  %v5770_v50 = vld [vmem:[%s7730_s0 + $0x68] sm:$0xff]  }
   0xa   :  { %v5771_v51 = vld [vmem:[%s7730_s0 + $0x70] sm:$0xff]   ;;  %v5772_v52 = vld [vmem:[%s7730_s0 + $0x78] sm:$0xff]   ;;  %v5773_v53 = vld [vmem:[%s7730_s0 + $0x80] sm:$0xff]  }
   0xb   :  { %4396 = vmatpush3.bf16.msra.mxu0 %v5747_v3  ;;  %v5774_v54 = vld [vmem:[%s7730_s0 + $0x88] sm:$0xff]   ;;  %v5775_v55 = vld [vmem:[%s7730_s0 + $0x90] sm:$0xff]   ;;  %v5776_v56 = vld [vmem:[%s7730_s0 + $0x98] sm:$0xff]  }
   0xc   :  { %4397 = vmatprep.subr.bf16.mxu0 %v5748_v6  ;;  %4468 = vmatpush3.bf16.msra.mxu1 %v6023_v8  ;;  %v5777_v57 = vld [vmem:[%s7730_s0 + $0xa0] sm:$0xff]   ;;  %v5778_v58 = vld [vmem:[%s7730_s0 + $0xa8] sm:$0xff]   ;;  %v5779_v59 = vld [vmem:[%s7730_s0 + $0xb0] sm:$0xff]  }
   0xd   :  { %4469 = vmatprep.subr.bf16.mxu1 %v7736_v1  ;;  %v5780_v60 = vld [vmem:[%s7730_s0 + $0xb8] sm:$0xff]   ;;  %v5781_v61 = vld [vmem:[%s7730_s0 + $0xc0] sm:$0xff]   ;;  %v5782_v62 = vld [vmem:[%s7730_s0 + $0xc8] sm:$0xff]  }
   0xe   :  { %v5783_v63 = vld [vmem:[%s7730_s0 + $0xd0] sm:$0xff]   ;;  %v5784_v0 = vld [vmem:[%s7730_s0 + $0xd8] sm:$0xff]   ;;  %v5785_v2 = vld [vmem:[%s7730_s0 + $0xe0] sm:$0xff]  }
   0xf   :  { %4398 = vmatpush3.bf16.msra.mxu0 %v5748_v6  ;;  %v5786_v3 = vld [vmem:[%s7730_s0 + $0xe8] sm:$0xff]  }
  0x10   :  { %4543 = vmatprep.subr.bf16.mxu0 %v7736_v1  ;;  %4470 = vmatpush3.bf16.msra.mxu1 %v6043_v10 }
  0x11   :  { %4471 = vmatprep.subr.bf16.mxu1 %v7736_v1 }
  0x12   :  { %4400 = vmatmul.mubr.msk.bf16.vlgmr.msra.gmra.mxu0 %vm287_vm0, %v5750_v9 }
  0x13   :  { %4544 = vmatpush3.bf16.msra.mxu0 %v6008_v5  ;;  %4403 = vmatprep.mubr.msk.bf16.mxu0 %vm287_vm0, %v5759_v39 }
  0x14   :  { %4545 = vmatprep.subr.bf16.mxu0 %v7736_v1  ;;  %4472 = vmatpush3.bf16.msra.mxu1 %v6052_v11 }
  0x15   :  { %4473 = vmatprep.subr.bf16.mxu1 %v7736_v1 }
  0x17   :  { %4546 = vmatpush3.bf16.msra.mxu0 %v6017_v7 }
  0x18   :  { %4547 = vmatprep.subr.bf16.mxu0 %v7736_v1  ;;  %4474 = vmatpush3.bf16.msra.mxu1 %v6060_v12 }
  0x19   :  { %4475 = vmatprep.subr.bf16.mxu1 %v7736_v1 }
  0x1a   :  { %4404 = vmatmul.mubr.msk.bf16.gmra.mxu0 %vm287_vm0, %v5760_v40 }
  0x1b   :  { %4548 = vmatpush3.bf16.msra.mxu0 %v6023_v8  ;;  %4407 = vmatprep.mubr.msk.bf16.mxu0 %vm287_vm0, %v5761_v41 }
  0x1c   :  { %4549 = vmatprep.subr.bf16.mxu0 %v7736_v1  ;;  %4476 = vmatpush3.bf16.msra.mxu1 %v6069_v13 }
  0x1d   :  { %4477 = vmatprep.subr.bf16.mxu1 %v7736_v1 }
  0x1f   :  { %4550 = vmatpush3.bf16.msra.mxu0 %v6043_v10 }
  0x20   :  { %4551 = vmatprep.subr.bf16.mxu0 %v7736_v1  ;;  %4478 = vmatpush3.bf16.msra.mxu1 %v6078_v14 }
  0x21   :  { %4483 = vmatprep.subr.bf16.mxu1 %v7736_v1 }
  0x22   :  { %4408 = vmatmul.mubr.msk.bf16.gmra.mxu0 %vm287_vm0, %v5762_v42 }
  0x23   :  { %4552 = vmatpush3.bf16.msra.mxu0 %v6052_v11  ;;  %4411 = vmatprep.mubr.msk.bf16.mxu0 %vm287_vm0, %v5763_v43 }
  0x24   :  { %4553 = vmatprep.subr.bf16.mxu0 %v7736_v1 }
  0x27   :  { %4554 = vmatpush3.bf16.msra.mxu0 %v6060_v12 }
  0x28   :  { %4555 = vmatprep.subr.bf16.mxu0 %v7736_v1 }
  0x2a   :  { %4412 = vmatmul.mubr.msk.bf16.gmra.mxu0 %vm287_vm0, %v5764_v44 }
  0x2b   :  { %4556 = vmatpush3.bf16.msra.mxu0 %v6069_v13  ;;  %4415 = vmatprep.mubr.msk.bf16.mxu0 %vm287_vm0, %v5765_v45 }
  0x2c   :  { %4557 = vmatprep.subr.bf16.mxu0 %v7736_v1 }
  0x2f   :  { %4558 = vmatpush3.bf16.msra.mxu0 %v6078_v14 }
  0x30   :  { %4583 = vmatprep.subr.bf16.mxu0 %v7736_v1 }
  0x32   :  { %4416 = vmatmul.mubr.msk.bf16.gmra.mxu0 %vm287_vm0, %v5766_v46 }
  0x33   :  { %4419 = vmatprep.mubr.msk.bf16.mxu0 %vm287_vm0, %v5767_v47 }
  0x3a   :  { %4420 = vmatmul.mubr.msk.bf16.gmra.mxu0 %vm287_vm0, %v5768_v48 }
  0x3b   :  { %4423 = vmatprep.mubr.msk.bf16.mxu0 %vm287_vm0, %v5769_v49 }
  0x42   :  { %4424 = vmatmul.mubr.msk.bf16.gmra.mxu0 %vm287_vm0, %v5770_v50 }
  0x43   :  { %4427 = vmatprep.mubr.msk.bf16.mxu0 %vm287_vm0, %v5771_v51 }
  0x4a   :  { %4428 = vmatmul.mubr.msk.bf16.gmra.mxu0 %vm287_vm0, %v5772_v52 }
  0x4b   :  { %4431 = vmatprep.mubr.msk.bf16.mxu0 %vm287_vm0, %v5773_v53 }
  0x52   :  { %4432 = vmatmul.mubr.msk.bf16.gmra.mxu0 %vm287_vm0, %v5774_v54 }
  0x53   :  { %4435 = vmatprep.mubr.msk.bf16.mxu0 %vm287_vm0, %v5775_v55 }
  0x5a   :  { %4436 = vmatmul.mubr.msk.bf16.gmra.mxu0 %vm287_vm0, %v5776_v56 }
  0x5b   :  { %4439 = vmatprep.mubr.msk.bf16.mxu0 %vm287_vm0, %v5777_v57 }
  0x62   :  { %4440 = vmatmul.mubr.msk.bf16.gmra.mxu0 %vm287_vm0, %v5778_v58 }
  0x63   :  { %4443 = vmatprep.mubr.msk.bf16.mxu0 %vm287_vm0, %v5779_v59 }
  0x6a   :  { %4444 = vmatmul.mubr.msk.bf16.gmra.mxu0 %vm287_vm0, %v5780_v60 }
  0x6b   :  { %4447 = vmatprep.mubr.msk.bf16.mxu0 %vm287_vm0, %v5781_v61 }
  0x72   :  { %4448 = vmatmul.mubr.msk.bf16.gmra.mxu0 %vm287_vm0, %v5782_v62 }
  0x73   :  { %4451 = vmatprep.mubr.msk.bf16.mxu0 %vm287_vm0, %v5783_v63 }
  0x7a   :  { %4452 = vmatmul.mubr.msk.bf16.gmra.mxu0 %vm287_vm0, %v5784_v0 }
  0x7b   :  { %4455 = vmatprep.mubr.msk.bf16.mxu0 %vm287_vm0, %v5785_v2 }
  0x82   :  { %4456 = vmatmul.mubr.msk.bf16.gmra.mxu0 %vm287_vm0, %v5786_v3 }
  0xd2   :  { %v4401_v15 = vpop.f32.mrf.mxu0 }
  0xd3   :  { %v427_v31 = vadd.f32 %v4401_v15, %v6090_v16 }
  0xd4   :  { %v418_v17 = vpop.f32.mrf.mxu0 }
  0xd5   :  { %v419_v18 = vadd.f32 %v6090_v16, %v418_v17 }
  0xd6   :  { %v6111_v21 = vpop.f32.mrf.mxu0 }
  0xd7   :  { %5797 = vtanh.f32 %v419_v18  ;;  %v430_v4 = vadd.f32 %v6111_v21, %v6090_v16  ;;  %v5787_v21 = vld [vmem:[%s7730_s0 + $0xf0] sm:$0xff]  }
  0xd8   :  { %v421_v22 = vpop.f32.mrf.mxu0  ;;  %4459 = vmatprep.mubr.msk.bf16.mxu0 %vm287_vm0, %v5787_v21 }
  0xd9   :  { %v422_v23 = vadd.f32 %v6090_v16, %v421_v22  ;;  %v5788_v22 = vld [vmem:[%s7730_s0 + $0xf8] sm:$0xff]  }
  0xda   :  { %4460 = vmatmul.mubr.msk.bf16.gmra.mxu0 %vm287_vm0, %v5788_v22 }
  0xdb   :  { %4559 = vmatprep.mubr.msk.bf16.mxu0 %vm5955_vm1, %v7736_v1 }
  0xe4   :  { %v5798_v19 = vpop.eup %5797 }
  0xe5   :  { %v756_v20 = vpack.c.bf16 %v5798_v19, %v5798_v19 }
  0xe7   :  { %4480 = vmatmul.mubr.bf16.vlgmr.msra.gmra.mxu1 %v756_v20 }
  0xe8   :  { %4484 = vmatpush3.bf16.msra.mxu1 %v6008_v5  ;;  %4499 = vmatprep.mubr.msk.bf16.mxu1 %vm5955_vm1, %v7736_v1 }
  0xe9   :  { %4485 = vmatprep.subr.bf16.mxu1 %v7736_v1 }
  0xec   :  { %4486 = vmatpush3.bf16.msra.mxu1 %v6017_v7 }
  0xed   :  { %4487 = vmatprep.subr.bf16.mxu1 %v7736_v1 }
  0xf0   :  { %4488 = vmatpush3.bf16.msra.mxu1 %v6023_v8 }
  0xf1   :  { %4489 = vmatprep.subr.bf16.mxu1 %v7736_v1 }
  0xf4   :  { %4490 = vmatpush3.bf16.msra.mxu1 %v6043_v10 }
  0xf5   :  { %4491 = vmatprep.subr.bf16.mxu1 %v7736_v1 }
  0xf8   :  { %4492 = vmatpush3.bf16.msra.mxu1 %v6052_v11 }
  0xf9   :  { %4493 = vmatprep.subr.bf16.mxu1 %v7736_v1 }
  0xfc   :  { %4494 = vmatpush3.bf16.msra.mxu1 %v6060_v12 }
  0xfd   :  { %4495 = vmatprep.subr.bf16.mxu1 %v7736_v1 }
 0x100   :  { %4496 = vmatpush3.bf16.msra.mxu1 %v6069_v13 }
 0x101   :  { %4497 = vmatprep.subr.bf16.mxu1 %v7736_v1 }
 0x104   :  { %4498 = vmatpush3.bf16.msra.mxu1 %v6078_v14 }
 0x105   :  { %4503 = vmatprep.subr.bf16.mxu1 %v7736_v1 }
 0x1a7   :  { %v839_v24 = vpop.f32.mrf.mxu1 }
 0x1a8   :  { %v845_v25 = vadd.f32 %v839_v24, %v422_v23  ;;  %v6293_v23 = vpop.f32.mrf.mxu0 }
 0x1a9   :  { %v4481_v26 = vpop.f32.mrf.mxu1 }
 0x1aa   :  { %5799 = vtanh.f32 %v845_v25  ;;  %v434_v24 = vpop.f32.mrf.mxu0 }
 0x1ab   :  { %v842_v27 = vpop.f32.mrf.mxu1 }
 0x1ac   :  { %v6295_v25 = vpop.f32.mrf.mxu0 }
 0x1ad   :  { %v4482_v28 = vpop.f32.mrf.mxu1 }
 0x1ae   :  { %v6297_v26 = vpop.f32.mrf.mxu0 }
 0x1b0   :  { %v6299_v27 = vpop.f32.mrf.mxu0 }
 0x1b2   :  { %v6301_v28 = vpop.f32.mrf.mxu0 }
 0x1b7   :  { %v5800_v29 = vpop.eup %5799 }
 0x1b8   :  { %v848_v30 = vpack.c.bf16 %v5800_v29, %v5800_v29  ;;  %v6303_v29 = vpop.f32.mrf.mxu0 }
 0x1ba   :  { %4500 = vmatmul.mubr.bf16.vlgmr.msra.gmra.mxu1 %v848_v30  ;;  %v435_v30 = vadd.f32 %v6090_v16, %v434_v24 }
 0x1bb   :  { %4504 = vmatpush3.bf16.msra.mxu1 %v6008_v5  ;;  %4519 = vmatprep.mubr.msk.bf16.mxu1 %vm5955_vm1, %v7736_v1 }
 0x1bc   :  { %4505 = vmatprep.subr.bf16.mxu1 %v7736_v1 }
 0x1bf   :  { %4506 = vmatpush3.bf16.msra.mxu1 %v6017_v7 }
 0x1c0   :  { %4507 = vmatprep.subr.bf16.mxu1 %v7736_v1 }
 0x1c3   :  { %4508 = vmatpush3.bf16.msra.mxu1 %v6023_v8 }
 0x1c4   :  { %4509 = vmatprep.subr.bf16.mxu1 %v7736_v1 }
 0x1c7   :  { %4510 = vmatpush3.bf16.msra.mxu1 %v6043_v10 }
 0x1c8   :  { %4511 = vmatprep.subr.bf16.mxu1 %v7736_v1 }
 0x1cb   :  { %4512 = vmatpush3.bf16.msra.mxu1 %v6052_v11 }
 0x1cc   :  { %4513 = vmatprep.subr.bf16.mxu1 %v7736_v1 }
 0x1cf   :  { %4514 = vmatpush3.bf16.msra.mxu1 %v6060_v12 }
 0x1d0   :  { %4515 = vmatprep.subr.bf16.mxu1 %v7736_v1 }
 0x1d3   :  { %4516 = vmatpush3.bf16.msra.mxu1 %v6069_v13 }
 0x1d4   :  { %4517 = vmatprep.subr.bf16.mxu1 %v7736_v1 }
 0x1d7   :  { %4518 = vmatpush3.bf16.msra.mxu1 %v6078_v14 }
 0x1d8   :  { %4523 = vmatprep.subr.bf16.mxu1 %v7736_v1 }
 0x27a   :  { %v883_v32 = vpop.f32.mrf.mxu1 }
 0x27b   :  { %v889_v33 = vadd.f32 %v883_v32, %v427_v31 }
 0x27c   :  { %v4501_v34 = vpop.f32.mrf.mxu1 }
 0x27d   :  { %5801 = vtanh.f32 %v889_v33  ;;  %v6306_v33 = vpop.f32.mrf.mxu0 }
 0x27e   :  { %v886_v35 = vpop.f32.mrf.mxu1 }
 0x280   :  { %v4502_v36 = vpop.f32.mrf.mxu1 }
 0x281   :  { %v6308_v36 = vpop.f32.mrf.mxu0 }
 0x28a   :  { %v5802_v37 = vpop.eup %5801 }
 0x28b   :  { %v892_v38 = vpack.c.bf16 %v5802_v37, %v5802_v37 }
 0x28d   :  { %4520 = vmatmul.mubr.bf16.vlgmr.msra.gmra.mxu1 %v892_v38  ;;  %v6310_v38 = vpop.f32.mrf.mxu0 }
 0x28e   :  { %4524 = vmatpush3.bf16.msra.mxu1 %v6008_v5  ;;  %4539 = vmatprep.mubr.msk.bf16.mxu1 %vm5955_vm1, %v7736_v1 }
 0x28f   :  { %4525 = vmatprep.subr.bf16.mxu1 %v7736_v1  ;;  %v6312_v39 = vpop.f32.mrf.mxu0 }
 0x291   :  { %v6314_v42 = vpop.f32.mrf.mxu0 }
 0x292   :  { %4526 = vmatpush3.bf16.msra.mxu1 %v6017_v7 }
 0x293   :  { %4527 = vmatprep.subr.bf16.mxu1 %v7736_v1  ;;  %v6319_v43 = vpop.f32.mrf.mxu0 }
 0x295   :  { %v6323_v44 = vpop.f32.mrf.mxu0 }
 0x296   :  { %4528 = vmatpush3.bf16.msra.mxu1 %v6023_v8 }
 0x297   :  { %4529 = vmatprep.subr.bf16.mxu1 %v7736_v1  ;;  %v6327_v45 = vpop.f32.mrf.mxu0 }
 0x299   :  { %v6331_v46 = vpop.f32.mrf.mxu0 }
 0x29a   :  { %4530 = vmatpush3.bf16.msra.mxu1 %v6043_v10 }
 0x29b   :  { %4531 = vmatprep.subr.bf16.mxu1 %v7736_v1  ;;  %v6335_v47 = vpop.f32.mrf.mxu0 }
 0x29d   :  { %v6339_v48 = vpop.f32.mrf.mxu0 }
 0x29e   :  { %4532 = vmatpush3.bf16.msra.mxu1 %v6052_v11 }
 0x29f   :  { %4533 = vmatprep.subr.bf16.mxu1 %v7736_v1  ;;  %v6343_v49 = vpop.f32.mrf.mxu0 }
 0x2a1   :  { %v6347_v50 = vpop.f32.mrf.mxu0 }
 0x2a2   :  { %4534 = vmatpush3.bf16.msra.mxu1 %v6060_v12 }
 0x2a3   :  { %4535 = vmatprep.subr.bf16.mxu1 %v7736_v1  ;;  %v6350_v51 = vpop.f32.mrf.mxu0 }
 0x2a5   :  { %v6352_v52 = vpop.f32.mrf.mxu0 }
 0x2a6   :  { %4536 = vmatpush3.bf16.msra.mxu1 %v6069_v13 }
 0x2a7   :  { %4537 = vmatprep.subr.bf16.mxu1 %v7736_v1  ;;  %v6354_v53 = vpop.f32.mrf.mxu0 }
 0x2a9   :  { %v6356_v54 = vpop.f32.mrf.mxu0 }
 0x2aa   :  { %4538 = vmatpush3.bf16.msra.mxu1 %v6078_v14 }
 0x2ab   :  { %4563 = vmatprep.subr.bf16.mxu1 %v7736_v1  ;;  %v6358_v55 = vpop.f32.mrf.mxu0 }
 0x2ad   :  { %v6360_v56 = vpop.f32.mrf.mxu0 }
 0x2af   :  { %v6362_v57 = vpop.f32.mrf.mxu0 }
 0x2b1   :  { %v6364_v58 = vpop.f32.mrf.mxu0 }
 0x2b3   :  { %v6366_v59 = vpop.f32.mrf.mxu0 }
 0x2b5   :  { %v6368_v60 = vpop.f32.mrf.mxu0 }
 0x2b7   :  { %v6370_v61 = vpop.f32.mrf.mxu0 }
 0x2b9   :  { %v6372_v62 = vpop.f32.mrf.mxu0 }
 0x2bb   :  { %v6374_v63 = vpop.f32.mrf.mxu0 }
 0x2bd   :  { %v6376_v0 = vpop.f32.mrf.mxu0 }
 0x2bf   :  { %v6378_v2 = vpop.f32.mrf.mxu0 }
 0x2c1   :  { %v6380_v3 = vpop.f32.mrf.mxu0 }
 0x34d   :  { %v927_v6 = vpop.f32.mrf.mxu1 }
 0x34e   :  { %v933_v9 = vadd.f32 %v927_v6, %v430_v4  ;;  %v6382_v4 = vpop.f32.mrf.mxu0 }
 0x34f   :  { %v4521_v15 = vpop.f32.mrf.mxu1 }
 0x350   :  { %5803 = vtanh.f32 %v933_v9  ;;  %v6384_v6 = vpop.f32.mrf.mxu0 }
 0x351   :  { %v930_v17 = vpop.f32.mrf.mxu1 }
 0x352   :  { %v6386_v9 = vpop.f32.mrf.mxu0 }
 0x353   :  { %v4522_v18 = vpop.f32.mrf.mxu1 }
 0x354   :  { %v6388_v15 = vpop.f32.mrf.mxu0 }
 0x356   :  { %v6390_v17 = vpop.f32.mrf.mxu0 }
 0x358   :  { %v6392_v18 = vpop.f32.mrf.mxu0 }
 0x35d   :  { %v5804_v19 = vpop.eup %5803 }
 0x35e   :  { %v936_v20 = vpack.c.bf16 %v5804_v19, %v5804_v19  ;;  %v6394_v19 = vpop.f32.mrf.mxu0 }
 0x35f   :  { %7738 = vst [vmem:[#allocation3_spill] sm:$0xff] %v6394_v19 }
 0x360   :  { %4540 = vmatmul.mubr.bf16.vlgmr.msra.gmra.mxu1 %v936_v20  ;;  %v6396_v20 = vpop.f32.mrf.mxu0 }
 0x361   :  { %4564 = vmatpush3.bf16.msra.mxu1 %v6008_v5  ;;  %4579 = vmatprep.mubr.msk.bf16.mxu1 %vm5955_vm1, %v7736_v1 }
 0x362   :  { %4565 = vmatprep.subr.bf16.mxu1 %v7736_v1  ;;  %v6398_v21 = vpop.f32.mrf.mxu0 }
 0x363   :  { %7739 = vst [vmem:[#allocation4_spill] sm:$0xff] %v6398_v21 }
 0x364   :  { %v6400_v22 = vpop.f32.mrf.mxu0 }
 0x365   :  { %4566 = vmatpush3.bf16.msra.mxu1 %v6017_v7  ;;  %7740 = vst [vmem:[#allocation5_spill] sm:$0xff] %v6400_v22 }
 0x366   :  { %4567 = vmatprep.subr.bf16.mxu1 %v7736_v1  ;;  %v6402_v24 = vpop.f32.mrf.mxu0 }
 0x367   :  { %7741 = vst [vmem:[#allocation6_spill] sm:$0xff] %v6402_v24 }
 0x369   :  { %4568 = vmatpush3.bf16.msra.mxu1 %v6023_v8 }
 0x36a   :  { %4569 = vmatprep.subr.bf16.mxu1 %v7736_v1 }
 0x36d   :  { %4570 = vmatpush3.bf16.msra.mxu1 %v6043_v10 }
 0x36e   :  { %4571 = vmatprep.subr.bf16.mxu1 %v7736_v1 }
 0x371   :  { %4572 = vmatpush3.bf16.msra.mxu1 %v6052_v11 }
 0x372   :  { %4573 = vmatprep.subr.bf16.mxu1 %v7736_v1 }
 0x375   :  { %4574 = vmatpush3.bf16.msra.mxu1 %v6060_v12 }
 0x376   :  { %4575 = vmatprep.subr.bf16.mxu1 %v7736_v1 }
 0x379   :  { %4576 = vmatpush3.bf16.msra.mxu1 %v6069_v13 }
 0x37a   :  { %4577 = vmatprep.subr.bf16.mxu1 %v7736_v1 }
 0x37d   :  { %4578 = vmatpush3.bf16.msra.mxu1 %v6078_v14 }
 0x37e   :  { %4603 = vmatprep.subr.bf16.mxu1 %v7736_v1 }
 0x420   :  { %v971_v31 = vpop.f32.mrf.mxu1 }
 0x421   :  { %v977_v32 = vadd.f32 %v971_v31, %v435_v30  ;;  %v6404_v30 = vpop.f32.mrf.mxu0 }
 0x422   :  { %v4541_v34 = vpop.f32.mrf.mxu1  ;;  %7742 = vst [vmem:[#allocation7_spill] sm:$0xff] %v6404_v30 }
 0x423   :  { %5805 = vtanh.f32 %v977_v32  ;;  %v6406_v31 = vpop.f32.mrf.mxu0 }
 0x424   :  { %v974_v35 = vpop.f32.mrf.mxu1  ;;  %7743 = vst [vmem:[#allocation8_spill] sm:$0xff] %v6406_v31 }
 0x425   :  { %v6408_v32 = vpop.f32.mrf.mxu0 }
 0x426   :  { %v4542_v37 = vpop.f32.mrf.mxu1  ;;  %7744 = vst [vmem:[#allocation9_spill] sm:$0xff] %v6408_v32 }
 0x427   :  { %v6410_v34 = vpop.f32.mrf.mxu0 }
 0x428   :  { %7745 = vst [vmem:[#allocation10_spill] sm:$0xff] %v6410_v34  ;;  %v438_v34 = vadd.f32 %v6090_v16, %v6297_v26  ;;  %v443_v26 = vadd.f32 %v6293_v23, %v6090_v16  ;;  %v446_v23 = vadd.f32 %v6295_v25, %v6090_v16  ;;  %v451_v25 = vadd.f32 %v6090_v16, %v6301_v28 }
 0x429   :  { %v6412_v35 = vpop.f32.mrf.mxu0  ;;  %v454_v28 = vadd.f32 %v6090_v16, %v6306_v33 }
 0x42a   :  { %7746 = vst [vmem:[#allocation11_spill] sm:$0xff] %v6412_v35 }
 0x42b   :  { %v6414_v37 = vpop.f32.mrf.mxu0 }
 0x42c   :  { %7747 = vst [vmem:[#allocation12_spill] sm:$0xff] %v6414_v37 }
 0x430   :  { %v5806_v40 = vpop.eup %5805 }
 0x431   :  { %v980_v41 = vpack.c.bf16 %v5806_v40, %v5806_v40  ;;  %v6416_v40 = vpop.f32.mrf.mxu0 }
 0x432   :  { %7748 = vst [vmem:[#allocation13_spill] sm:$0xff] %v6416_v40 }
 0x433   :  { %4560 = vmatmul.mubr.bf16.vlgmr.msra.gmra.mxu0 %v980_v41  ;;  %v6418_v41 = vpop.f32.mrf.mxu0 }
 0x434   :  { %4584 = vmatpush3.bf16.msra.mxu0 %v6008_v5  ;;  %4599 = vmatprep.mubr.msk.bf16.mxu0 %vm5955_vm1, %v7736_v1  ;;  %7749 = vst [vmem:[#allocation14_spill] sm:$0xff] %v6418_v41 }
 0x435   :  { %4585 = vmatprep.subr.bf16.mxu0 %v7736_v1 }
 0x438   :  { %4586 = vmatpush3.bf16.msra.mxu0 %v6017_v7 }
 0x439   :  { %4587 = vmatprep.subr.bf16.mxu0 %v7736_v1 }
 0x43c   :  { %4588 = vmatpush3.bf16.msra.mxu0 %v6023_v8 }
 0x43d   :  { %4589 = vmatprep.subr.bf16.mxu0 %v7736_v1 }
 0x440   :  { %4590 = vmatpush3.bf16.msra.mxu0 %v6043_v10 }
 0x441   :  { %4591 = vmatprep.subr.bf16.mxu0 %v7736_v1 }
 0x444   :  { %4592 = vmatpush3.bf16.msra.mxu0 %v6052_v11 }
 0x445   :  { %4593 = vmatprep.subr.bf16.mxu0 %v7736_v1 }
 0x448   :  { %4594 = vmatpush3.bf16.msra.mxu0 %v6060_v12 }
 0x449   :  { %4595 = vmatprep.subr.bf16.mxu0 %v7736_v1 }
 0x44c   :  { %4596 = vmatpush3.bf16.msra.mxu0 %v6069_v13 }
 0x44d   :  { %4597 = vmatprep.subr.bf16.mxu0 %v7736_v1 }
 0x450   :  { %4598 = vmatpush3.bf16.msra.mxu0 %v6078_v14 }
 0x451   :  { %4623 = vmatprep.subr.bf16.mxu0 %v7736_v1  ;;  %v6420_v1 = vpop.f32.mrf.mxu0 }
 0x453   :  { %v6422_v21 = vpop.f32.mrf.mxu0 }
 0x454   :  { %7750 = vst [vmem:[#allocation15_spill] sm:$0xff] %v6422_v21  ;;  %v7751_v21 = vmov 0.0  }
 0x455   :  { %v6424_v24 = vpop.f32.mrf.mxu0 }
 0x457   :  { %v6426_v30 = vpop.f32.mrf.mxu0 }
 0x459   :  { %v6428_v31 = vpop.f32.mrf.mxu0 }
 0x4f3   :  { %v1015_v35 = vpop.f32.mrf.mxu0 }
 0x4f4   :  { %v1021_v32 = vadd.f32 %v1015_v35, %v438_v34 }
 0x4f5   :  { %v4561_v37 = vpop.f32.mrf.mxu0 }
 0x4f6   :  { %5807 = vtanh.f32 %v1021_v32 }
 0x4f7   :  { %v1018_v40 = vpop.f32.mrf.mxu0 }
 0x4f9   :  { %v4562_v22 = vpop.f32.mrf.mxu0 }
 0x503   :  { %v5808_v41 = vpop.eup %5807 }
 0x504   :  { %v1024_v19 = vpack.c.bf16 %v5808_v41, %v5808_v41 }
 0x506   :  { %4580 = vmatmul.mubr.bf16.vlgmr.msra.gmra.mxu1 %v1024_v19 }
 0x507   :  { %4604 = vmatpush3.bf16.msra.mxu1 %v6008_v5  ;;  %4619 = vmatprep.mubr.msk.bf16.mxu1 %vm5955_vm1, %v7751_v21 }
 0x508   :  { %4605 = vmatprep.subr.bf16.mxu1 %v7751_v21 }
 0x50b   :  { %4606 = vmatpush3.bf16.msra.mxu1 %v6017_v7 }
 0x50c   :  { %4607 = vmatprep.subr.bf16.mxu1 %v7751_v21 }
 0x50f   :  { %4608 = vmatpush3.bf16.msra.mxu1 %v6023_v8 }
 0x510   :  { %4609 = vmatprep.subr.bf16.mxu1 %v7751_v21 }
 0x513   :  { %4610 = vmatpush3.bf16.msra.mxu1 %v6043_v10 }
 0x514   :  { %4611 = vmatprep.subr.bf16.mxu1 %v7751_v21 }
 0x517   :  { %4612 = vmatpush3.bf16.msra.mxu1 %v6052_v11 }
 0x518   :  { %4613 = vmatprep.subr.bf16.mxu1 %v7751_v21 }
 0x51b   :  { %4614 = vmatpush3.bf16.msra.mxu1 %v6060_v12 }
 0x51c   :  { %4615 = vmatprep.subr.bf16.mxu1 %v7751_v21 }
 0x51f   :  { %4616 = vmatpush3.bf16.msra.mxu1 %v6069_v13 }
 0x520   :  { %4617 = vmatprep.subr.bf16.mxu1 %v7751_v21 }
 0x523   :  { %4618 = vmatpush3.bf16.msra.mxu1 %v6078_v14 }
 0x524   :  { %4643 = vmatprep.subr.bf16.mxu1 %v7751_v21 }
 0x5c6   :  { %v1059_v19 = vpop.f32.mrf.mxu1 }
 0x5c7   :  { %v1065_v22 = vadd.f32 %v1059_v19, %v443_v26 }
 0x5c8   :  { %v4581_v32 = vpop.f32.mrf.mxu1 }
 0x5c9   :  { %5809 = vtanh.f32 %v1065_v22 }
 0x5ca   :  { %v1062_v34 = vpop.f32.mrf.mxu1 }
 0x5cc   :  { %v4582_v35 = vpop.f32.mrf.mxu1 }
 0x5d6   :  { %v5810_v37 = vpop.eup %5809 }
 0x5d7   :  { %v1068_v40 = vpack.c.bf16 %v5810_v37, %v5810_v37 }
 0x5d9   :  { %4600 = vmatmul.mubr.bf16.vlgmr.msra.gmra.mxu0 %v1068_v40 }
 0x5da   :  { %4624 = vmatpush3.bf16.msra.mxu0 %v6008_v5  ;;  %4639 = vmatprep.mubr.msk.bf16.mxu0 %vm5955_vm1, %v7751_v21 }
 0x5db   :  { %4625 = vmatprep.subr.bf16.mxu0 %v7751_v21 }
 0x5de   :  { %4626 = vmatpush3.bf16.msra.mxu0 %v6017_v7 }
 0x5df   :  { %4627 = vmatprep.subr.bf16.mxu0 %v7751_v21 }
 0x5e2   :  { %4628 = vmatpush3.bf16.msra.mxu0 %v6023_v8 }
 0x5e3   :  { %4629 = vmatprep.subr.bf16.mxu0 %v7751_v21 }
 0x5e6   :  { %4630 = vmatpush3.bf16.msra.mxu0 %v6043_v10 }
 0x5e7   :  { %4631 = vmatprep.subr.bf16.mxu0 %v7751_v21 }
 0x5ea   :  { %4632 = vmatpush3.bf16.msra.mxu0 %v6052_v11 }
 0x5eb   :  { %4633 = vmatprep.subr.bf16.mxu0 %v7751_v21 }
 0x5ee   :  { %4634 = vmatpush3.bf16.msra.mxu0 %v6060_v12 }
 0x5ef   :  { %4635 = vmatprep.subr.bf16.mxu0 %v7751_v21 }
 0x5f2   :  { %4636 = vmatpush3.bf16.msra.mxu0 %v6069_v13 }
 0x5f3   :  { %4637 = vmatprep.subr.bf16.mxu0 %v7751_v21 }
 0x5f6   :  { %4638 = vmatpush3.bf16.msra.mxu0 %v6078_v14 }
 0x5f7   :  { %4663 = vmatprep.subr.bf16.mxu0 %v7751_v21 }
 0x699   :  { %v1103_v41 = vpop.f32.mrf.mxu0 }
 0x69a   :  { %v1109_v26 = vadd.f32 %v1103_v41, %v446_v23 }
 0x69b   :  { %v4601_v19 = vpop.f32.mrf.mxu0 }
 0x69c   :  { %5811 = vtanh.f32 %v1109_v26 }
 0x69d   :  { %v1106_v22 = vpop.f32.mrf.mxu0 }
 0x69f   :  { %v4602_v32 = vpop.f32.mrf.mxu0 }
 0x6a9   :  { %v5812_v34 = vpop.eup %5811 }
 0x6aa   :  { %v1112_v35 = vpack.c.bf16 %v5812_v34, %v5812_v34 }
 0x6ac   :  { %4620 = vmatmul.mubr.bf16.vlgmr.msra.gmra.mxu1 %v1112_v35 }
 0x6ad   :  { %4644 = vmatpush3.bf16.msra.mxu1 %v6008_v5  ;;  %4659 = vmatprep.mubr.msk.bf16.mxu1 %vm5955_vm1, %v7751_v21 }
 0x6ae   :  { %4645 = vmatprep.subr.bf16.mxu1 %v7751_v21 }
 0x6b1   :  { %4646 = vmatpush3.bf16.msra.mxu1 %v6017_v7 }
 0x6b2   :  { %4647 = vmatprep.subr.bf16.mxu1 %v7751_v21 }
 0x6b5   :  { %4648 = vmatpush3.bf16.msra.mxu1 %v6023_v8 }
 0x6b6   :  { %4649 = vmatprep.subr.bf16.mxu1 %v7751_v21 }
 0x6b9   :  { %4650 = vmatpush3.bf16.msra.mxu1 %v6043_v10 }
 0x6ba   :  { %4651 = vmatprep.subr.bf16.mxu1 %v7751_v21 }
 0x6bd   :  { %4652 = vmatpush3.bf16.msra.mxu1 %v6052_v11 }
 0x6be   :  { %4653 = vmatprep.subr.bf16.mxu1 %v7751_v21 }
 0x6c1   :  { %4654 = vmatpush3.bf16.msra.mxu1 %v6060_v12 }
 0x6c2   :  { %4655 = vmatprep.subr.bf16.mxu1 %v7751_v21 }
 0x6c5   :  { %4656 = vmatpush3.bf16.msra.mxu1 %v6069_v13 }
 0x6c6   :  { %4657 = vmatprep.subr.bf16.mxu1 %v7751_v21 }
 0x6c9   :  { %4658 = vmatpush3.bf16.msra.mxu1 %v6078_v14 }
 0x6ca   :  { %4683 = vmatprep.subr.bf16.mxu1 %v7751_v21 }
 0x76c   :  { %v1147_v37 = vpop.f32.mrf.mxu1 }
 0x76d   :  { %v1153_v40 = vadd.f32 %v1147_v37, %v451_v25 }
 0x76e   :  { %v4621_v23 = vpop.f32.mrf.mxu1 }
 0x76f   :  { %5813 = vtanh.f32 %v1153_v40 }
 0x770   :  { %v1150_v41 = vpop.f32.mrf.mxu1 }
 0x772   :  { %v4622_v26 = vpop.f32.mrf.mxu1 }
 0x77c   :  { %v5814_v19 = vpop.eup %5813 }
 0x77d   :  { %v1156_v22 = vpack.c.bf16 %v5814_v19, %v5814_v19 }
 0x77f   :  { %4640 = vmatmul.mubr.bf16.vlgmr.msra.gmra.mxu0 %v1156_v22 }
 0x780   :  { %4664 = vmatpush3.bf16.msra.mxu0 %v6008_v5  ;;  %4679 = vmatprep.mubr.msk.bf16.mxu0 %vm5955_vm1, %v7751_v21 }
 0x781   :  { %4665 = vmatprep.subr.bf16.mxu0 %v7751_v21 }
 0x784   :  { %4666 = vmatpush3.bf16.msra.mxu0 %v6017_v7 }
 0x785   :  { %4667 = vmatprep.subr.bf16.mxu0 %v7751_v21 }
 0x788   :  { %4668 = vmatpush3.bf16.msra.mxu0 %v6023_v8 }
 0x789   :  { %4669 = vmatprep.subr.bf16.mxu0 %v7751_v21 }
 0x78c   :  { %4670 = vmatpush3.bf16.msra.mxu0 %v6043_v10 }
 0x78d   :  { %4671 = vmatprep.subr.bf16.mxu0 %v7751_v21 }
 0x790   :  { %4672 = vmatpush3.bf16.msra.mxu0 %v6052_v11 }
 0x791   :  { %4673 = vmatprep.subr.bf16.mxu0 %v7751_v21 }
 0x794   :  { %4674 = vmatpush3.bf16.msra.mxu0 %v6060_v12 }
 0x795   :  { %4675 = vmatprep.subr.bf16.mxu0 %v7751_v21 }
 0x798   :  { %4676 = vmatpush3.bf16.msra.mxu0 %v6069_v13 }
 0x799   :  { %4677 = vmatprep.subr.bf16.mxu0 %v7751_v21 }
 0x79c   :  { %4678 = vmatpush3.bf16.msra.mxu0 %v6078_v14 }
 0x79d   :  { %4703 = vmatprep.subr.bf16.mxu0 %v7751_v21 }
 0x83f   :  { %v1191_v32 = vpop.f32.mrf.mxu0 }
 0x840   :  { %v1197_v34 = vadd.f32 %v1191_v32, %v454_v28  ;;  %v6535_v28 = vld [vmem:[%s7731_s2 + $0x38] sm:$0xff]   ;;  %v6551_v32 = vld [vmem:[%s7731_s2 + $0x28] sm:$0xff]  }
 0x841   :  { %v4641_v35 = vpop.f32.mrf.mxu0 }
 0x842   :  { %5815 = vtanh.f32 %v1197_v34  ;;  %v462_v34 = vadd.f32 %v6303_v29, %v6090_v16  ;;  %v467_v29 = vadd.f32 %v6090_v16, %v6310_v38 }
 0x843   :  { %v1194_v25 = vpop.f32.mrf.mxu0 }
 0x845   :  { %v4642_v37 = vpop.f32.mrf.mxu0 }
 0x84f   :  { %v5816_v40 = vpop.eup %5815 }
 0x850   :  { %v1200_v23 = vpack.c.bf16 %v5816_v40, %v5816_v40 }
 0x852   :  { %4660 = vmatmul.mubr.bf16.vlgmr.msra.gmra.mxu1 %v1200_v23 }
 0x853   :  { %4684 = vmatpush3.bf16.msra.mxu1 %v6008_v5  ;;  %4699 = vmatprep.mubr.msk.bf16.mxu1 %vm5955_vm1, %v7751_v21  ;;  %v459_v5 = vadd.f32 %v6299_v27, %v6090_v16  ;;  %v6544_v27 = vld [vmem:[%s7731_s2 + $0x30] sm:$0xff]  }
 0x854   :  { %4685 = vmatprep.subr.bf16.mxu1 %v7751_v21 }
 0x857   :  { %4686 = vmatpush3.bf16.msra.mxu1 %v6017_v7 }
 0x858   :  { %4687 = vmatprep.subr.bf16.mxu1 %v7751_v21 }
 0x85b   :  { %4688 = vmatpush3.bf16.msra.mxu1 %v6023_v8 }
 0x85c   :  { %4689 = vmatprep.subr.bf16.mxu1 %v7751_v21 }
 0x85f   :  { %4690 = vmatpush3.bf16.msra.mxu1 %v6043_v10 }
 0x860   :  { %4691 = vmatprep.subr.bf16.mxu1 %v7751_v21 }
 0x863   :  { %4692 = vmatpush3.bf16.msra.mxu1 %v6052_v11 }
 0x864   :  { %4693 = vmatprep.subr.bf16.mxu1 %v7751_v21 }
 0x867   :  { %4694 = vmatpush3.bf16.msra.mxu1 %v6060_v12 }
 0x868   :  { %4695 = vmatprep.subr.bf16.mxu1 %v7751_v21 }
 0x86b   :  { %4696 = vmatpush3.bf16.msra.mxu1 %v6069_v13 }
 0x86c   :  { %4697 = vmatprep.subr.bf16.mxu1 %v7751_v21 }
 0x86f   :  { %4698 = vmatpush3.bf16.msra.mxu1 %v6078_v14 }
 0x870   :  { %4723 = vmatprep.subr.bf16.mxu1 %v7751_v21 }
 0x912   :  { %v1235_v7 = vpop.f32.mrf.mxu1 }
 0x913   :  { %v1241_v8 = vadd.f32 %v1235_v7, %v459_v5 }
 0x914   :  { %v4661_v33 = vpop.f32.mrf.mxu1 }
 0x915   :  { %5817 = vtanh.f32 %v1241_v8 }
 0x916   :  { %v1238_v41 = vpop.f32.mrf.mxu1 }
 0x918   :  { %v4662_v26 = vpop.f32.mrf.mxu1 }
 0x922   :  { %v5818_v19 = vpop.eup %5817 }
 0x923   :  { %v1244_v22 = vpack.c.bf16 %v5818_v19, %v5818_v19 }
 0x925   :  { %4680 = vmatmul.mubr.bf16.vlgmr.msra.gmra.mxu0 %v1244_v22 }
 0x926   :  { %4704 = vmatpush3.bf16.msra.mxu0 %v6535_v28  ;;  %4719 = vmatprep.mubr.msk.bf16.mxu0 %vm5955_vm1, %v7751_v21 }
 0x927   :  { %4705 = vmatprep.subr.bf16.mxu0 %v7751_v21 }
 0x92a   :  { %4706 = vmatpush3.bf16.msra.mxu0 %v6544_v27 }
 0x92b   :  { %4707 = vmatprep.subr.bf16.mxu0 %v7751_v21 }
 0x92e   :  { %4708 = vmatpush3.bf16.msra.mxu0 %v6551_v32 }
 0x92f   :  { %4709 = vmatprep.subr.bf16.mxu0 %v7751_v21 }
 0x932   :  { %4710 = vmatpush3.bf16.msra.mxu0 %v6043_v10 }
 0x933   :  { %4711 = vmatprep.subr.bf16.mxu0 %v7751_v21 }
 0x936   :  { %4712 = vmatpush3.bf16.msra.mxu0 %v6052_v11 }
 0x937   :  { %4713 = vmatprep.subr.bf16.mxu0 %v7751_v21 }
 0x93a   :  { %4714 = vmatpush3.bf16.msra.mxu0 %v6060_v12 }
 0x93b   :  { %4715 = vmatprep.subr.bf16.mxu0 %v7751_v21 }
 0x93e   :  { %4716 = vmatpush3.bf16.msra.mxu0 %v6069_v13 }
 0x93f   :  { %4717 = vmatprep.subr.bf16.mxu0 %v7751_v21 }
 0x942   :  { %4718 = vmatpush3.bf16.msra.mxu0 %v6078_v14 }
 0x943   :  { %4743 = vmatprep.subr.bf16.mxu0 %v7751_v21 }
 0x9e5   :  { %v1279_v35 = vpop.f32.mrf.mxu0 }
 0x9e6   :  { %v1285_v25 = vadd.f32 %v1279_v35, %v462_v34 }
 0x9e7   :  { %v4681_v37 = vpop.f32.mrf.mxu0 }
 0x9e8   :  { %5819 = vtanh.f32 %v1285_v25 }
 0x9e9   :  { %v1282_v40 = vpop.f32.mrf.mxu0 }
 0x9eb   :  { %v4682_v23 = vpop.f32.mrf.mxu0 }
 0x9ec   :  { %v6625_v23 = vld [vmem:[%s7731_s2 + $0x18] sm:$0xff]  }
 0x9f5   :  { %v5820_v5 = vpop.eup %5819 }
 0x9f6   :  { %v1288_v7 = vpack.c.bf16 %v5820_v5, %v5820_v5  ;;  %v6632_v5 = vld [vmem:[%s7731_s2 + $0x10] sm:$0xff]  }
 0x9f8   :  { %4700 = vmatmul.mubr.bf16.vlgmr.msra.gmra.mxu1 %v1288_v7  ;;  %v475_v7 = vadd.f32 %v6308_v36, %v6090_v16 }
 0x9f9   :  { %4724 = vmatpush3.bf16.msra.mxu1 %v6535_v28  ;;  %4739 = vmatprep.mubr.msk.bf16.mxu1 %vm5955_vm1, %v7751_v21 }
 0x9fa   :  { %4725 = vmatprep.subr.bf16.mxu1 %v7751_v21 }
 0x9fd   :  { %4726 = vmatpush3.bf16.msra.mxu1 %v6544_v27 }
 0x9fe   :  { %4727 = vmatprep.subr.bf16.mxu1 %v7751_v21 }
 0xa01   :  { %4728 = vmatpush3.bf16.msra.mxu1 %v6551_v32 }
 0xa02   :  { %4729 = vmatprep.subr.bf16.mxu1 %v7751_v21 }
 0xa05   :  { %4730 = vmatpush3.bf16.msra.mxu1 %v6043_v10 }
 0xa06   :  { %4731 = vmatprep.subr.bf16.mxu1 %v7751_v21 }
 0xa09   :  { %4732 = vmatpush3.bf16.msra.mxu1 %v6052_v11 }
 0xa0a   :  { %4733 = vmatprep.subr.bf16.mxu1 %v7751_v21 }
 0xa0d   :  { %4734 = vmatpush3.bf16.msra.mxu1 %v6060_v12 }
 0xa0e   :  { %4735 = vmatprep.subr.bf16.mxu1 %v7751_v21 }
 0xa11   :  { %4736 = vmatpush3.bf16.msra.mxu1 %v6069_v13 }
 0xa12   :  { %4737 = vmatprep.subr.bf16.mxu1 %v7751_v21 }
 0xa15   :  { %4738 = vmatpush3.bf16.msra.mxu1 %v6078_v14 }
 0xa16   :  { %4763 = vmatprep.subr.bf16.mxu1 %v7751_v21 }
 0xab8   :  { %v1323_v8 = vpop.f32.mrf.mxu1 }
 0xab9   :  { %v1329_v33 = vadd.f32 %v1323_v8, %v467_v29 }
 0xaba   :  { %v4701_v41 = vpop.f32.mrf.mxu1 }
 0xabb   :  { %5821 = vtanh.f32 %v1329_v33 }
 0xabc   :  { %v1326_v26 = vpop.f32.mrf.mxu1 }
 0xabe   :  { %v4702_v19 = vpop.f32.mrf.mxu1 }
 0xac8   :  { %v5822_v22 = vpop.eup %5821 }
 0xac9   :  { %v1332_v34 = vpack.c.bf16 %v5822_v22, %v5822_v22 }
 0xacb   :  { %4720 = vmatmul.mubr.bf16.vlgmr.msra.gmra.mxu0 %v1332_v34 }
 0xacc   :  { %4744 = vmatpush3.bf16.msra.mxu0 %v6535_v28  ;;  %4759 = vmatprep.mubr.msk.bf16.mxu0 %vm5955_vm1, %v7751_v21 }
 0xacd   :  { %4745 = vmatprep.subr.bf16.mxu0 %v7751_v21 }
 0xad0   :  { %4746 = vmatpush3.bf16.msra.mxu0 %v6544_v27 }
 0xad1   :  { %4747 = vmatprep.subr.bf16.mxu0 %v7751_v21 }
 0xad4   :  { %4748 = vmatpush3.bf16.msra.mxu0 %v6551_v32 }
 0xad5   :  { %4749 = vmatprep.subr.bf16.mxu0 %v7751_v21 }
 0xad8   :  { %4750 = vmatpush3.bf16.msra.mxu0 %v6043_v10  ;;  %v470_v10 = vadd.f32 %v6090_v16, %v6314_v42  ;;  %v6618_v42 = vld [vmem:[%s7731_s2 + $0x20] sm:$0xff]  }
 0xad9   :  { %4751 = vmatprep.subr.bf16.mxu0 %v7751_v21  ;;  %v6673_v16 = vld [vmem:[%s7732_s3] ss:$0 sm:$0xff] }
 0xada   :  { %v478_v36 = vadd.f32 %v6673_v16, %v6312_v39  ;;  %v483_v39 = vadd.f32 %v6673_v16, %v6323_v44  ;;  %v486_v44 = vadd.f32 %v6673_v16, %v6331_v46  ;;  %v491_v46 = vadd.f32 %v6673_v16, %v6319_v43 }
 0xadb   :  { %v494_v43 = vadd.f32 %v6673_v16, %v6327_v45  ;;  %v499_v45 = vadd.f32 %v6673_v16, %v6339_v48  ;;  %v502_v48 = vadd.f32 %v6673_v16, %v6347_v50  ;;  %v507_v50 = vadd.f32 %v6673_v16, %v6335_v47 }
 0xadc   :  { %4752 = vmatpush3.bf16.msra.mxu0 %v6052_v11  ;;  %v510_v47 = vadd.f32 %v6673_v16, %v6343_v49  ;;  %v515_v49 = vadd.f32 %v6673_v16, %v6352_v52  ;;  %v518_v52 = vadd.f32 %v6673_v16, %v6356_v54  ;;  %v523_v54 = vadd.f32 %v6673_v16, %v6350_v51 }
 0xadd   :  { %4753 = vmatprep.subr.bf16.mxu0 %v7751_v21  ;;  %v526_v51 = vadd.f32 %v6673_v16, %v6354_v53  ;;  %v531_v53 = vadd.f32 %v6673_v16, %v6360_v56  ;;  %v534_v56 = vadd.f32 %v6673_v16, %v6364_v58  ;;  %v6969_v58 = vld [vmem:[%s7731_s2 + $0x30] sm:$0xff]  }
 0xae0   :  { %4754 = vmatpush3.bf16.msra.mxu0 %v6060_v12 }
 0xae1   :  { %4755 = vmatprep.subr.bf16.mxu0 %v7751_v21 }
 0xae4   :  { %4756 = vmatpush3.bf16.msra.mxu0 %v6069_v13 }
 0xae5   :  { %4757 = vmatprep.subr.bf16.mxu0 %v7751_v21 }
 0xae8   :  { %4758 = vmatpush3.bf16.msra.mxu0 %v6078_v14 }
 0xae9   :  { %4783 = vmatprep.subr.bf16.mxu0 %v7751_v21 }
 0xb8b   :  { %v1367_v38 = vpop.f32.mrf.mxu0 }
 0xb8c   :  { %v1373_v35 = vadd.f32 %v1367_v38, %v470_v10 }
 0xb8d   :  { %v4721_v11 = vpop.f32.mrf.mxu0 }
 0xb8e   :  { %5823 = vtanh.f32 %v1373_v35 }
 0xb8f   :  { %v1370_v25 = vpop.f32.mrf.mxu0 }
 0xb91   :  { %v4722_v37 = vpop.f32.mrf.mxu0 }
 0xb9b   :  { %v5824_v12 = vpop.eup %5823 }
 0xb9c   :  { %v1376_v40 = vpack.c.bf16 %v5824_v12, %v5824_v12 }
 0xb9e   :  { %4740 = vmatmul.mubr.bf16.vlgmr.msra.gmra.mxu1 %v1376_v40 }
 0xb9f   :  { %4764 = vmatpush3.bf16.msra.mxu1 %v6535_v28  ;;  %4779 = vmatprep.mubr.msk.bf16.mxu1 %vm5955_vm1, %v7751_v21 }
 0xba0   :  { %4765 = vmatprep.subr.bf16.mxu1 %v7751_v21 }
 0xba3   :  { %4766 = vmatpush3.bf16.msra.mxu1 %v6544_v27 }
 0xba4   :  { %4767 = vmatprep.subr.bf16.mxu1 %v7751_v21 }
 0xba7   :  { %4768 = vmatpush3.bf16.msra.mxu1 %v6551_v32 }
 0xba8   :  { %4769 = vmatprep.subr.bf16.mxu1 %v7751_v21 }
 0xbab   :  { %4770 = vmatpush3.bf16.msra.mxu1 %v6618_v42 }
 0xbac   :  { %4771 = vmatprep.subr.bf16.mxu1 %v7751_v21 }
 0xbaf   :  { %4772 = vmatpush3.bf16.msra.mxu1 %v6625_v23 }
 0xbb0   :  { %4773 = vmatprep.subr.bf16.mxu1 %v7751_v21 }
 0xbb3   :  { %4774 = vmatpush3.bf16.msra.mxu1 %v6632_v5 }
 0xbb4   :  { %4775 = vmatprep.subr.bf16.mxu1 %v7751_v21 }
 0xbb7   :  { %4776 = vmatpush3.bf16.msra.mxu1 %v6069_v13  ;;  %v6659_v13 = vld [vmem:[%s7731_s2 + $0x8] sm:$0xff]  }
 0xbb8   :  { %4777 = vmatprep.subr.bf16.mxu1 %v7751_v21 }
 0xbbb   :  { %4778 = vmatpush3.bf16.msra.mxu1 %v6078_v14  ;;  %v6666_v14 = vld [vmem:[%s7731_s2] sm:$0xff]  }
 0xbbc   :  { %4803 = vmatprep.subr.bf16.mxu1 %v7751_v21 }
 0xc5e   :  { %v1411_v29 = vpop.f32.mrf.mxu1 }
 0xc5f   :  { %v1417_v8 = vadd.f32 %v1411_v29, %v475_v7 }
 0xc60   :  { %v4741_v33 = vpop.f32.mrf.mxu1 }
 0xc61   :  { %5825 = vtanh.f32 %v1417_v8 }
 0xc62   :  { %v1414_v41 = vpop.f32.mrf.mxu1 }
 0xc64   :  { %v4742_v26 = vpop.f32.mrf.mxu1 }
 0xc6e   :  { %v5826_v19 = vpop.eup %5825 }
 0xc6f   :  { %v1420_v22 = vpack.c.bf16 %v5826_v19, %v5826_v19 }
 0xc71   :  { %4760 = vmatmul.mubr.bf16.vlgmr.msra.gmra.mxu0 %v1420_v22 }
 0xc72   :  { %4784 = vmatpush3.bf16.msra.mxu0 %v6535_v28  ;;  %4799 = vmatprep.mubr.msk.bf16.mxu0 %vm5955_vm1, %v7751_v21 }
 0xc73   :  { %4785 = vmatprep.subr.bf16.mxu0 %v7751_v21 }
 0xc76   :  { %4786 = vmatpush3.bf16.msra.mxu0 %v6544_v27 }
 0xc77   :  { %4787 = vmatprep.subr.bf16.mxu0 %v7751_v21 }
 0xc7a   :  { %4788 = vmatpush3.bf16.msra.mxu0 %v6551_v32 }
 0xc7b   :  { %4789 = vmatprep.subr.bf16.mxu0 %v7751_v21 }
 0xc7e   :  { %4790 = vmatpush3.bf16.msra.mxu0 %v6618_v42 }
 0xc7f   :  { %4791 = vmatprep.subr.bf16.mxu0 %v7751_v21 }
 0xc82   :  { %4792 = vmatpush3.bf16.msra.mxu0 %v6625_v23 }
 0xc83   :  { %4793 = vmatprep.subr.bf16.mxu0 %v7751_v21 }
 0xc86   :  { %4794 = vmatpush3.bf16.msra.mxu0 %v6632_v5 }
 0xc87   :  { %4795 = vmatprep.subr.bf16.mxu0 %v7751_v21 }
 0xc8a   :  { %4796 = vmatpush3.bf16.msra.mxu0 %v6659_v13 }
 0xc8b   :  { %4797 = vmatprep.subr.bf16.mxu0 %v7751_v21 }
 0xc8e   :  { %4798 = vmatpush3.bf16.msra.mxu0 %v6666_v14 }
 0xc8f   :  { %4823 = vmatprep.subr.bf16.mxu0 %v7751_v21 }
 0xd31   :  { %v1455_v34 = vpop.f32.mrf.mxu0 }
 0xd32   :  { %v1461_v10 = vadd.f32 %v1455_v34, %v478_v36 }
 0xd33   :  { %v4761_v38 = vpop.f32.mrf.mxu0 }
 0xd34   :  { %5827 = vtanh.f32 %v1461_v10 }
 0xd35   :  { %v1458_v35 = vpop.f32.mrf.mxu0 }
 0xd37   :  { %v4762_v11 = vpop.f32.mrf.mxu0 }
 0xd41   :  { %v5828_v25 = vpop.eup %5827 }
 0xd42   :  { %v1464_v37 = vpack.c.bf16 %v5828_v25, %v5828_v25 }
 0xd44   :  { %4780 = vmatmul.mubr.bf16.vlgmr.msra.gmra.mxu1 %v1464_v37 }
 0xd45   :  { %4804 = vmatpush3.bf16.msra.mxu1 %v6535_v28  ;;  %4819 = vmatprep.mubr.msk.bf16.mxu1 %vm5955_vm1, %v7751_v21 }
 0xd46   :  { %4805 = vmatprep.subr.bf16.mxu1 %v7751_v21 }
 0xd49   :  { %4806 = vmatpush3.bf16.msra.mxu1 %v6544_v27 }
 0xd4a   :  { %4807 = vmatprep.subr.bf16.mxu1 %v7751_v21 }
 0xd4d   :  { %4808 = vmatpush3.bf16.msra.mxu1 %v6551_v32 }
 0xd4e   :  { %4809 = vmatprep.subr.bf16.mxu1 %v7751_v21 }
 0xd51   :  { %4810 = vmatpush3.bf16.msra.mxu1 %v6618_v42 }
 0xd52   :  { %4811 = vmatprep.subr.bf16.mxu1 %v7751_v21 }
 0xd55   :  { %4812 = vmatpush3.bf16.msra.mxu1 %v6625_v23 }
 0xd56   :  { %4813 = vmatprep.subr.bf16.mxu1 %v7751_v21 }
 0xd59   :  { %4814 = vmatpush3.bf16.msra.mxu1 %v6632_v5 }
 0xd5a   :  { %4815 = vmatprep.subr.bf16.mxu1 %v7751_v21 }
 0xd5d   :  { %4816 = vmatpush3.bf16.msra.mxu1 %v6659_v13 }
 0xd5e   :  { %4817 = vmatprep.subr.bf16.mxu1 %v7751_v21 }
 0xd61   :  { %4818 = vmatpush3.bf16.msra.mxu1 %v6666_v14 }
 0xd62   :  { %4843 = vmatprep.subr.bf16.mxu1 %v7751_v21 }
 0xe04   :  { %v1499_v12 = vpop.f32.mrf.mxu1 }
 0xe05   :  { %v1505_v40 = vadd.f32 %v1499_v12, %v483_v39 }
 0xe06   :  { %v4781_v7 = vpop.f32.mrf.mxu1 }
 0xe07   :  { %5829 = vtanh.f32 %v1505_v40 }
 0xe08   :  { %v1502_v29 = vpop.f32.mrf.mxu1 }
 0xe0a   :  { %v4782_v8 = vpop.f32.mrf.mxu1 }
 0xe14   :  { %v5830_v33 = vpop.eup %5829 }
 0xe15   :  { %v1508_v41 = vpack.c.bf16 %v5830_v33, %v5830_v33 }
 0xe17   :  { %4800 = vmatmul.mubr.bf16.vlgmr.msra.gmra.mxu0 %v1508_v41 }
 0xe18   :  { %4824 = vmatpush3.bf16.msra.mxu0 %v6535_v28  ;;  %4839 = vmatprep.mubr.msk.bf16.mxu0 %vm5955_vm1, %v7751_v21 }
 0xe19   :  { %4825 = vmatprep.subr.bf16.mxu0 %v7751_v21 }
 0xe1c   :  { %4826 = vmatpush3.bf16.msra.mxu0 %v6544_v27 }
 0xe1d   :  { %4827 = vmatprep.subr.bf16.mxu0 %v7751_v21 }
 0xe20   :  { %4828 = vmatpush3.bf16.msra.mxu0 %v6551_v32 }
 0xe21   :  { %4829 = vmatprep.subr.bf16.mxu0 %v7751_v21 }
 0xe24   :  { %4830 = vmatpush3.bf16.msra.mxu0 %v6618_v42 }
 0xe25   :  { %4831 = vmatprep.subr.bf16.mxu0 %v7751_v21 }
 0xe28   :  { %4832 = vmatpush3.bf16.msra.mxu0 %v6625_v23 }
 0xe29   :  { %4833 = vmatprep.subr.bf16.mxu0 %v7751_v21 }
 0xe2c   :  { %4834 = vmatpush3.bf16.msra.mxu0 %v6632_v5 }
 0xe2d   :  { %4835 = vmatprep.subr.bf16.mxu0 %v7751_v21 }
 0xe30   :  { %4836 = vmatpush3.bf16.msra.mxu0 %v6659_v13 }
 0xe31   :  { %4837 = vmatprep.subr.bf16.mxu0 %v7751_v21 }
 0xe34   :  { %4838 = vmatpush3.bf16.msra.mxu0 %v6666_v14 }
 0xe35   :  { %4863 = vmatprep.subr.bf16.mxu0 %v7751_v21 }
 0xed7   :  { %v1543_v26 = vpop.f32.mrf.mxu0 }
 0xed8   :  { %v1549_v19 = vadd.f32 %v1543_v26, %v486_v44 }
 0xed9   :  { %v4801_v22 = vpop.f32.mrf.mxu0 }
 0xeda   :  { %5831 = vtanh.f32 %v1549_v19 }
 0xedb   :  { %v1546_v36 = vpop.f32.mrf.mxu0 }
 0xedd   :  { %v4802_v34 = vpop.f32.mrf.mxu0 }
 0xee7   :  { %v5832_v10 = vpop.eup %5831 }
 0xee8   :  { %v1552_v38 = vpack.c.bf16 %v5832_v10, %v5832_v10 }
 0xeea   :  { %4820 = vmatmul.mubr.bf16.vlgmr.msra.gmra.mxu1 %v1552_v38 }
 0xeeb   :  { %4844 = vmatpush3.bf16.msra.mxu1 %v6535_v28  ;;  %4859 = vmatprep.mubr.msk.bf16.mxu1 %vm5955_vm1, %v7751_v21 }
 0xeec   :  { %4845 = vmatprep.subr.bf16.mxu1 %v7751_v21 }
 0xeef   :  { %4846 = vmatpush3.bf16.msra.mxu1 %v6544_v27 }
 0xef0   :  { %4847 = vmatprep.subr.bf16.mxu1 %v7751_v21 }
 0xef3   :  { %4848 = vmatpush3.bf16.msra.mxu1 %v6551_v32 }
 0xef4   :  { %4849 = vmatprep.subr.bf16.mxu1 %v7751_v21 }
 0xef7   :  { %4850 = vmatpush3.bf16.msra.mxu1 %v6618_v42 }
 0xef8   :  { %4851 = vmatprep.subr.bf16.mxu1 %v7751_v21 }
 0xefb   :  { %4852 = vmatpush3.bf16.msra.mxu1 %v6625_v23 }
 0xefc   :  { %4853 = vmatprep.subr.bf16.mxu1 %v7751_v21 }
 0xeff   :  { %4854 = vmatpush3.bf16.msra.mxu1 %v6632_v5 }
 0xf00   :  { %4855 = vmatprep.subr.bf16.mxu1 %v7751_v21 }
 0xf03   :  { %4856 = vmatpush3.bf16.msra.mxu1 %v6659_v13 }
 0xf04   :  { %4857 = vmatprep.subr.bf16.mxu1 %v7751_v21 }
 0xf07   :  { %4858 = vmatpush3.bf16.msra.mxu1 %v6666_v14 }
 0xf08   :  { %4883 = vmatprep.subr.bf16.mxu1 %v7751_v21 }
 0xfaa   :  { %v1587_v35 = vpop.f32.mrf.mxu1 }
 0xfab   :  { %v1593_v11 = vadd.f32 %v1587_v35, %v491_v46 }
 0xfac   :  { %v4821_v25 = vpop.f32.mrf.mxu1 }
 0xfad   :  { %5833 = vtanh.f32 %v1593_v11 }
 0xfae   :  { %v1590_v37 = vpop.f32.mrf.mxu1 }
 0xfb0   :  { %v4822_v39 = vpop.f32.mrf.mxu1 }
 0xfba   :  { %v5834_v12 = vpop.eup %5833 }
 0xfbb   :  { %v1596_v40 = vpack.c.bf16 %v5834_v12, %v5834_v12 }
 0xfbd   :  { %4840 = vmatmul.mubr.bf16.vlgmr.msra.gmra.mxu0 %v1596_v40 }
 0xfbe   :  { %4864 = vmatpush3.bf16.msra.mxu0 %v6535_v28  ;;  %4879 = vmatprep.mubr.msk.bf16.mxu0 %vm5955_vm1, %v7751_v21 }
 0xfbf   :  { %4865 = vmatprep.subr.bf16.mxu0 %v7751_v21 }
 0xfc2   :  { %4866 = vmatpush3.bf16.msra.mxu0 %v6544_v27 }
 0xfc3   :  { %4867 = vmatprep.subr.bf16.mxu0 %v7751_v21 }
 0xfc6   :  { %4868 = vmatpush3.bf16.msra.mxu0 %v6551_v32 }
 0xfc7   :  { %4869 = vmatprep.subr.bf16.mxu0 %v7751_v21 }
 0xfca   :  { %4870 = vmatpush3.bf16.msra.mxu0 %v6618_v42 }
 0xfcb   :  { %4871 = vmatprep.subr.bf16.mxu0 %v7751_v21 }
 0xfce   :  { %4872 = vmatpush3.bf16.msra.mxu0 %v6625_v23 }
 0xfcf   :  { %4873 = vmatprep.subr.bf16.mxu0 %v7751_v21 }
 0xfd2   :  { %4874 = vmatpush3.bf16.msra.mxu0 %v6632_v5 }
 0xfd3   :  { %4875 = vmatprep.subr.bf16.mxu0 %v7751_v21 }
 0xfd6   :  { %4876 = vmatpush3.bf16.msra.mxu0 %v6659_v13 }
 0xfd7   :  { %4877 = vmatprep.subr.bf16.mxu0 %v7751_v21 }
 0xfda   :  { %4878 = vmatpush3.bf16.msra.mxu0 %v6666_v14 }
 0xfdb   :  { %4903 = vmatprep.subr.bf16.mxu0 %v7751_v21 }
0x107d   :  { %v1631_v7 = vpop.f32.mrf.mxu0 }
0x107e   :  { %v1637_v29 = vadd.f32 %v1631_v7, %v494_v43 }
0x107f   :  { %v4841_v8 = vpop.f32.mrf.mxu0 }
0x1080   :  { %5835 = vtanh.f32 %v1637_v29 }
0x1081   :  { %v1634_v33 = vpop.f32.mrf.mxu0 }
0x1083   :  { %v4842_v41 = vpop.f32.mrf.mxu0 }
0x108d   :  { %v5836_v44 = vpop.eup %5835 }
0x108e   :  { %v1640_v26 = vpack.c.bf16 %v5836_v44, %v5836_v44 }
0x1090   :  { %4860 = vmatmul.mubr.bf16.vlgmr.msra.gmra.mxu1 %v1640_v26 }
0x1091   :  { %4884 = vmatpush3.bf16.msra.mxu1 %v6535_v28  ;;  %4899 = vmatprep.mubr.msk.bf16.mxu1 %vm5955_vm1, %v7751_v21 }
0x1092   :  { %4885 = vmatprep.subr.bf16.mxu1 %v7751_v21 }
0x1095   :  { %4886 = vmatpush3.bf16.msra.mxu1 %v6544_v27 }
0x1096   :  { %4887 = vmatprep.subr.bf16.mxu1 %v7751_v21 }
0x1099   :  { %4888 = vmatpush3.bf16.msra.mxu1 %v6551_v32 }
0x109a   :  { %4889 = vmatprep.subr.bf16.mxu1 %v7751_v21 }
0x109d   :  { %4890 = vmatpush3.bf16.msra.mxu1 %v6618_v42 }
0x109e   :  { %4891 = vmatprep.subr.bf16.mxu1 %v7751_v21 }
0x10a1   :  { %4892 = vmatpush3.bf16.msra.mxu1 %v6625_v23 }
0x10a2   :  { %4893 = vmatprep.subr.bf16.mxu1 %v7751_v21 }
0x10a5   :  { %4894 = vmatpush3.bf16.msra.mxu1 %v6632_v5 }
0x10a6   :  { %4895 = vmatprep.subr.bf16.mxu1 %v7751_v21 }
0x10a9   :  { %4896 = vmatpush3.bf16.msra.mxu1 %v6659_v13 }
0x10aa   :  { %4897 = vmatprep.subr.bf16.mxu1 %v7751_v21 }
0x10ad   :  { %4898 = vmatpush3.bf16.msra.mxu1 %v6666_v14 }
0x10ae   :  { %4923 = vmatprep.subr.bf16.mxu1 %v7751_v21 }
0x1150   :  { %v1675_v19 = vpop.f32.mrf.mxu1 }
0x1151   :  { %v1681_v22 = vadd.f32 %v1675_v19, %v499_v45 }
0x1152   :  { %v4861_v36 = vpop.f32.mrf.mxu1 }
0x1153   :  { %5837 = vtanh.f32 %v1681_v22 }
0x1154   :  { %v1678_v34 = vpop.f32.mrf.mxu1 }
0x1156   :  { %v4862_v10 = vpop.f32.mrf.mxu1 }
0x1160   :  { %v5838_v38 = vpop.eup %5837 }
0x1161   :  { %v1684_v46 = vpack.c.bf16 %v5838_v38, %v5838_v38 }
0x1163   :  { %4880 = vmatmul.mubr.bf16.vlgmr.msra.gmra.mxu0 %v1684_v46 }
0x1164   :  { %4904 = vmatpush3.bf16.msra.mxu0 %v6535_v28  ;;  %4919 = vmatprep.mubr.msk.bf16.mxu0 %vm5955_vm1, %v7751_v21 }
0x1165   :  { %4905 = vmatprep.subr.bf16.mxu0 %v7751_v21 }
0x1168   :  { %4906 = vmatpush3.bf16.msra.mxu0 %v6544_v27 }
0x1169   :  { %4907 = vmatprep.subr.bf16.mxu0 %v7751_v21 }
0x116c   :  { %4908 = vmatpush3.bf16.msra.mxu0 %v6551_v32 }
0x116d   :  { %4909 = vmatprep.subr.bf16.mxu0 %v7751_v21 }
0x1170   :  { %4910 = vmatpush3.bf16.msra.mxu0 %v6618_v42 }
0x1171   :  { %4911 = vmatprep.subr.bf16.mxu0 %v7751_v21 }
0x1174   :  { %4912 = vmatpush3.bf16.msra.mxu0 %v6625_v23 }
0x1175   :  { %4913 = vmatprep.subr.bf16.mxu0 %v7751_v21 }
0x1178   :  { %4914 = vmatpush3.bf16.msra.mxu0 %v6632_v5 }
0x1179   :  { %4915 = vmatprep.subr.bf16.mxu0 %v7751_v21 }
0x117c   :  { %4916 = vmatpush3.bf16.msra.mxu0 %v6659_v13 }
0x117d   :  { %4917 = vmatprep.subr.bf16.mxu0 %v7751_v21 }
0x1180   :  { %4918 = vmatpush3.bf16.msra.mxu0 %v6666_v14 }
0x1181   :  { %4943 = vmatprep.subr.bf16.mxu0 %v7751_v21 }
0x1223   :  { %v1719_v35 = vpop.f32.mrf.mxu0 }
0x1224   :  { %v1725_v11 = vadd.f32 %v1719_v35, %v502_v48 }
0x1225   :  { %v4881_v25 = vpop.f32.mrf.mxu0 }
0x1226   :  { %5839 = vtanh.f32 %v1725_v11 }
0x1227   :  { %v1722_v37 = vpop.f32.mrf.mxu0 }
0x1229   :  { %v4882_v39 = vpop.f32.mrf.mxu0 }
0x1233   :  { %v5840_v12 = vpop.eup %5839 }
0x1234   :  { %v1728_v40 = vpack.c.bf16 %v5840_v12, %v5840_v12 }
0x1236   :  { %4900 = vmatmul.mubr.bf16.vlgmr.msra.gmra.mxu1 %v1728_v40 }
0x1237   :  { %4924 = vmatpush3.bf16.msra.mxu1 %v6535_v28  ;;  %4939 = vmatprep.mubr.msk.bf16.mxu1 %vm5955_vm1, %v7751_v21 }
0x1238   :  { %4925 = vmatprep.subr.bf16.mxu1 %v7751_v21 }
0x123b   :  { %4926 = vmatpush3.bf16.msra.mxu1 %v6544_v27 }
0x123c   :  { %4927 = vmatprep.subr.bf16.mxu1 %v7751_v21 }
0x123f   :  { %4928 = vmatpush3.bf16.msra.mxu1 %v6551_v32 }
0x1240   :  { %4929 = vmatprep.subr.bf16.mxu1 %v7751_v21 }
0x1243   :  { %4930 = vmatpush3.bf16.msra.mxu1 %v6618_v42 }
0x1244   :  { %4931 = vmatprep.subr.bf16.mxu1 %v7751_v21 }
0x1247   :  { %4932 = vmatpush3.bf16.msra.mxu1 %v6625_v23 }
0x1248   :  { %4933 = vmatprep.subr.bf16.mxu1 %v7751_v21 }
0x124b   :  { %4934 = vmatpush3.bf16.msra.mxu1 %v6632_v5 }
0x124c   :  { %4935 = vmatprep.subr.bf16.mxu1 %v7751_v21 }
0x124f   :  { %4936 = vmatpush3.bf16.msra.mxu1 %v6659_v13 }
0x1250   :  { %4937 = vmatprep.subr.bf16.mxu1 %v7751_v21 }
0x1253   :  { %4938 = vmatpush3.bf16.msra.mxu1 %v6666_v14 }
0x1254   :  { %4963 = vmatprep.subr.bf16.mxu1 %v7751_v21 }
0x12f6   :  { %v1763_v43 = vpop.f32.mrf.mxu1 }
0x12f7   :  { %v1769_v7 = vadd.f32 %v1763_v43, %v507_v50 }
0x12f8   :  { %v4901_v29 = vpop.f32.mrf.mxu1 }
0x12f9   :  { %5841 = vtanh.f32 %v1769_v7 }
0x12fa   :  { %v1766_v8 = vpop.f32.mrf.mxu1 }
0x12fc   :  { %v4902_v33 = vpop.f32.mrf.mxu1 }
0x1306   :  { %v5842_v41 = vpop.eup %5841 }
0x1307   :  { %v1772_v44 = vpack.c.bf16 %v5842_v41, %v5842_v41 }
0x1309   :  { %4920 = vmatmul.mubr.bf16.vlgmr.msra.gmra.mxu0 %v1772_v44 }
0x130a   :  { %4944 = vmatpush3.bf16.msra.mxu0 %v6535_v28  ;;  %4959 = vmatprep.mubr.msk.bf16.mxu0 %vm5955_vm1, %v7751_v21 }
0x130b   :  { %4945 = vmatprep.subr.bf16.mxu0 %v7751_v21 }
0x130e   :  { %4946 = vmatpush3.bf16.msra.mxu0 %v6544_v27 }
0x130f   :  { %4947 = vmatprep.subr.bf16.mxu0 %v7751_v21 }
0x1312   :  { %4948 = vmatpush3.bf16.msra.mxu0 %v6551_v32 }
0x1313   :  { %4949 = vmatprep.subr.bf16.mxu0 %v7751_v21 }
0x1316   :  { %4950 = vmatpush3.bf16.msra.mxu0 %v6618_v42 }
0x1317   :  { %4951 = vmatprep.subr.bf16.mxu0 %v7751_v21 }
0x131a   :  { %4952 = vmatpush3.bf16.msra.mxu0 %v6625_v23 }
0x131b   :  { %4953 = vmatprep.subr.bf16.mxu0 %v7751_v21 }
0x131e   :  { %4954 = vmatpush3.bf16.msra.mxu0 %v6632_v5 }
0x131f   :  { %4955 = vmatprep.subr.bf16.mxu0 %v7751_v21 }
0x1322   :  { %4956 = vmatpush3.bf16.msra.mxu0 %v6659_v13 }
0x1323   :  { %4957 = vmatprep.subr.bf16.mxu0 %v7751_v21 }
0x1326   :  { %4958 = vmatpush3.bf16.msra.mxu0 %v6666_v14 }
0x1327   :  { %4983 = vmatprep.subr.bf16.mxu0 %v7751_v21 }
0x13c9   :  { %v1807_v26 = vpop.f32.mrf.mxu0 }
0x13ca   :  { %v1813_v45 = vadd.f32 %v1807_v26, %v510_v47 }
0x13cb   :  { %v4921_v19 = vpop.f32.mrf.mxu0 }
0x13cc   :  { %5843 = vtanh.f32 %v1813_v45 }
0x13cd   :  { %v1810_v22 = vpop.f32.mrf.mxu0 }
0x13cf   :  { %v4922_v36 = vpop.f32.mrf.mxu0 }
0x13d9   :  { %v5844_v34 = vpop.eup %5843 }
0x13da   :  { %v1816_v10 = vpack.c.bf16 %v5844_v34, %v5844_v34 }
0x13dc   :  { %4940 = vmatmul.mubr.bf16.vlgmr.msra.gmra.mxu1 %v1816_v10 }
0x13dd   :  { %4964 = vmatpush3.bf16.msra.mxu1 %v6535_v28  ;;  %4979 = vmatprep.mubr.msk.bf16.mxu1 %vm5955_vm1, %v7751_v21 }
0x13de   :  { %4965 = vmatprep.subr.bf16.mxu1 %v7751_v21 }
0x13e1   :  { %4966 = vmatpush3.bf16.msra.mxu1 %v6544_v27 }
0x13e2   :  { %4967 = vmatprep.subr.bf16.mxu1 %v7751_v21 }
0x13e5   :  { %4968 = vmatpush3.bf16.msra.mxu1 %v6551_v32 }
0x13e6   :  { %4969 = vmatprep.subr.bf16.mxu1 %v7751_v21 }
0x13e9   :  { %4970 = vmatpush3.bf16.msra.mxu1 %v6618_v42 }
0x13ea   :  { %4971 = vmatprep.subr.bf16.mxu1 %v7751_v21 }
0x13ed   :  { %4972 = vmatpush3.bf16.msra.mxu1 %v6625_v23 }
0x13ee   :  { %4973 = vmatprep.subr.bf16.mxu1 %v7751_v21 }
0x13f1   :  { %4974 = vmatpush3.bf16.msra.mxu1 %v6632_v5 }
0x13f2   :  { %4975 = vmatprep.subr.bf16.mxu1 %v7751_v21 }
0x13f5   :  { %4976 = vmatpush3.bf16.msra.mxu1 %v6659_v13 }
0x13f6   :  { %4977 = vmatprep.subr.bf16.mxu1 %v7751_v21 }
0x13f9   :  { %4978 = vmatpush3.bf16.msra.mxu1 %v6666_v14 }
0x13fa   :  { %5003 = vmatprep.subr.bf16.mxu1 %v7751_v21 }
0x149c   :  { %v1851_v38 = vpop.f32.mrf.mxu1 }
0x149d   :  { %v1857_v46 = vadd.f32 %v1851_v38, %v515_v49 }
0x149e   :  { %v4941_v48 = vpop.f32.mrf.mxu1 }
0x149f   :  { %5845 = vtanh.f32 %v1857_v46 }
0x14a0   :  { %v1854_v35 = vpop.f32.mrf.mxu1 }
0x14a2   :  { %v4942_v11 = vpop.f32.mrf.mxu1 }
0x14ac   :  { %v5846_v25 = vpop.eup %5845 }
0x14ad   :  { %v1860_v37 = vpack.c.bf16 %v5846_v25, %v5846_v25 }
0x14af   :  { %4960 = vmatmul.mubr.bf16.vlgmr.msra.gmra.mxu0 %v1860_v37 }
0x14b0   :  { %4984 = vmatpush3.bf16.msra.mxu0 %v6535_v28  ;;  %4999 = vmatprep.mubr.msk.bf16.mxu0 %vm5955_vm1, %v7751_v21 }
0x14b1   :  { %4985 = vmatprep.subr.bf16.mxu0 %v7751_v21 }
0x14b4   :  { %4986 = vmatpush3.bf16.msra.mxu0 %v6544_v27 }
0x14b5   :  { %4987 = vmatprep.subr.bf16.mxu0 %v7751_v21 }
0x14b8   :  { %4988 = vmatpush3.bf16.msra.mxu0 %v6551_v32 }
0x14b9   :  { %4989 = vmatprep.subr.bf16.mxu0 %v7751_v21 }
0x14bc   :  { %4990 = vmatpush3.bf16.msra.mxu0 %v6618_v42 }
0x14bd   :  { %4991 = vmatprep.subr.bf16.mxu0 %v7751_v21 }
0x14c0   :  { %4992 = vmatpush3.bf16.msra.mxu0 %v6625_v23 }
0x14c1   :  { %4993 = vmatprep.subr.bf16.mxu0 %v7751_v21 }
0x14c4   :  { %4994 = vmatpush3.bf16.msra.mxu0 %v6632_v5 }
0x14c5   :  { %4995 = vmatprep.subr.bf16.mxu0 %v7751_v21 }
0x14c8   :  { %4996 = vmatpush3.bf16.msra.mxu0 %v6659_v13 }
0x14c9   :  { %4997 = vmatprep.subr.bf16.mxu0 %v7751_v21 }
0x14cc   :  { %4998 = vmatpush3.bf16.msra.mxu0 %v6666_v14 }
0x14cd   :  { %5023 = vmatprep.subr.bf16.mxu0 %v7751_v21 }
0x156f   :  { %v1895_v39 = vpop.f32.mrf.mxu0 }
0x1570   :  { %v1901_v12 = vadd.f32 %v1895_v39, %v518_v52 }
0x1571   :  { %v4961_v40 = vpop.f32.mrf.mxu0 }
0x1572   :  { %5847 = vtanh.f32 %v1901_v12 }
0x1573   :  { %v1898_v50 = vpop.f32.mrf.mxu0 }
0x1575   :  { %v4962_v43 = vpop.f32.mrf.mxu0 }
0x1576   :  { %v6960_v43 = vld [vmem:[%s7731_s2 + $0x38] sm:$0xff]  }
0x157f   :  { %v5848_v7 = vpop.eup %5847 }
0x1580   :  { %v1904_v29 = vpack.c.bf16 %v5848_v7, %v5848_v7  ;;  %v6976_v7 = vld [vmem:[%s7731_s2 + $0x28] sm:$0xff]  }
0x1582   :  { %4980 = vmatmul.mubr.bf16.vlgmr.msra.gmra.mxu1 %v1904_v29  ;;  %v539_v29 = vadd.f32 %v6673_v16, %v6358_v55  ;;  %v542_v55 = vadd.f32 %v6673_v16, %v6362_v57  ;;  %v547_v57 = vadd.f32 %v6673_v16, %v6368_v60  ;;  %v7043_v60 = vld [vmem:[%s7731_s2 + $0x20] sm:$0xff]  }
0x1583   :  { %5004 = vmatpush3.bf16.msra.mxu1 %v6535_v28  ;;  %5019 = vmatprep.mubr.msk.bf16.mxu1 %vm5955_vm1, %v7751_v21 }
0x1584   :  { %5005 = vmatprep.subr.bf16.mxu1 %v7751_v21 }
0x1587   :  { %5006 = vmatpush3.bf16.msra.mxu1 %v6544_v27 }
0x1588   :  { %5007 = vmatprep.subr.bf16.mxu1 %v7751_v21 }
0x158b   :  { %5008 = vmatpush3.bf16.msra.mxu1 %v6551_v32 }
0x158c   :  { %5009 = vmatprep.subr.bf16.mxu1 %v7751_v21 }
0x158f   :  { %5010 = vmatpush3.bf16.msra.mxu1 %v6618_v42 }
0x1590   :  { %5011 = vmatprep.subr.bf16.mxu1 %v7751_v21 }
0x1593   :  { %5012 = vmatpush3.bf16.msra.mxu1 %v6625_v23 }
0x1594   :  { %5013 = vmatprep.subr.bf16.mxu1 %v7751_v21 }
0x1597   :  { %5014 = vmatpush3.bf16.msra.mxu1 %v6632_v5 }
0x1598   :  { %5015 = vmatprep.subr.bf16.mxu1 %v7751_v21 }
0x159b   :  { %5016 = vmatpush3.bf16.msra.mxu1 %v6659_v13 }
0x159c   :  { %5017 = vmatprep.subr.bf16.mxu1 %v7751_v21 }
0x159f   :  { %5018 = vmatpush3.bf16.msra.mxu1 %v6666_v14 }
0x15a0   :  { %5043 = vmatprep.subr.bf16.mxu1 %v7751_v21 }
0x1642   :  { %v1939_v8 = vpop.f32.mrf.mxu1 }
0x1643   :  { %v1945_v33 = vadd.f32 %v1939_v8, %v523_v54 }
0x1644   :  { %v4981_v41 = vpop.f32.mrf.mxu1 }
0x1645   :  { %5849 = vtanh.f32 %v1945_v33 }
0x1646   :  { %v1942_v44 = vpop.f32.mrf.mxu1 }
0x1648   :  { %v4982_v47 = vpop.f32.mrf.mxu1 }
0x1652   :  { %v5850_v26 = vpop.eup %5849 }
0x1653   :  { %v1948_v45 = vpack.c.bf16 %v5850_v26, %v5850_v26 }
0x1655   :  { %5000 = vmatmul.mubr.bf16.vlgmr.msra.gmra.mxu0 %v1948_v45 }
0x1656   :  { %5024 = vmatpush3.bf16.msra.mxu0 %v6535_v28  ;;  %5039 = vmatprep.mubr.msk.bf16.mxu0 %vm5955_vm1, %v7751_v21 }
0x1657   :  { %5025 = vmatprep.subr.bf16.mxu0 %v7751_v21 }
0x165a   :  { %5026 = vmatpush3.bf16.msra.mxu0 %v6544_v27 }
0x165b   :  { %5027 = vmatprep.subr.bf16.mxu0 %v7751_v21 }
0x165e   :  { %5028 = vmatpush3.bf16.msra.mxu0 %v6551_v32 }
0x165f   :  { %5029 = vmatprep.subr.bf16.mxu0 %v7751_v21 }
0x1662   :  { %5030 = vmatpush3.bf16.msra.mxu0 %v6618_v42 }
0x1663   :  { %5031 = vmatprep.subr.bf16.mxu0 %v7751_v21 }
0x1666   :  { %5032 = vmatpush3.bf16.msra.mxu0 %v6625_v23 }
0x1667   :  { %5033 = vmatprep.subr.bf16.mxu0 %v7751_v21 }
0x166a   :  { %5034 = vmatpush3.bf16.msra.mxu0 %v6632_v5 }
0x166b   :  { %5035 = vmatprep.subr.bf16.mxu0 %v7751_v21 }
0x166e   :  { %5036 = vmatpush3.bf16.msra.mxu0 %v6659_v13 }
0x166f   :  { %5037 = vmatprep.subr.bf16.mxu0 %v7751_v21 }
0x1672   :  { %5038 = vmatpush3.bf16.msra.mxu0 %v6666_v14 }
0x1673   :  { %5063 = vmatprep.subr.bf16.mxu0 %v7751_v21 }
0x1715   :  { %v1983_v19 = vpop.f32.mrf.mxu0 }
0x1716   :  { %v1989_v22 = vadd.f32 %v1983_v19, %v526_v51 }
0x1717   :  { %v5001_v36 = vpop.f32.mrf.mxu0 }
0x1718   :  { %5851 = vtanh.f32 %v1989_v22 }
0x1719   :  { %v1986_v34 = vpop.f32.mrf.mxu0 }
0x171b   :  { %v5002_v10 = vpop.f32.mrf.mxu0 }
0x1725   :  { %v5852_v49 = vpop.eup %5851 }
0x1726   :  { %v1992_v38 = vpack.c.bf16 %v5852_v49, %v5852_v49 }
0x1728   :  { %5020 = vmatmul.mubr.bf16.vlgmr.msra.gmra.mxu1 %v1992_v38 }
0x1729   :  { %5044 = vmatpush3.bf16.msra.mxu1 %v6535_v28  ;;  %5059 = vmatprep.mubr.msk.bf16.mxu1 %vm5955_vm1, %v7751_v21 }
0x172a   :  { %5045 = vmatprep.subr.bf16.mxu1 %v7751_v21 }
0x172d   :  { %5046 = vmatpush3.bf16.msra.mxu1 %v6544_v27 }
0x172e   :  { %5047 = vmatprep.subr.bf16.mxu1 %v7751_v21 }
0x1731   :  { %5048 = vmatpush3.bf16.msra.mxu1 %v6551_v32 }
0x1732   :  { %5049 = vmatprep.subr.bf16.mxu1 %v7751_v21 }
0x1735   :  { %5050 = vmatpush3.bf16.msra.mxu1 %v6618_v42 }
0x1736   :  { %5051 = vmatprep.subr.bf16.mxu1 %v7751_v21 }
0x1739   :  { %5052 = vmatpush3.bf16.msra.mxu1 %v6625_v23 }
0x173a   :  { %5053 = vmatprep.subr.bf16.mxu1 %v7751_v21 }
0x173d   :  { %5054 = vmatpush3.bf16.msra.mxu1 %v6632_v5 }
0x173e   :  { %5055 = vmatprep.subr.bf16.mxu1 %v7751_v21 }
0x1741   :  { %5056 = vmatpush3.bf16.msra.mxu1 %v6659_v13 }
0x1742   :  { %5057 = vmatprep.subr.bf16.mxu1 %v7751_v21 }
0x1745   :  { %5058 = vmatpush3.bf16.msra.mxu1 %v6666_v14 }
0x1746   :  { %5083 = vmatprep.subr.bf16.mxu1 %v7751_v21 }
0x17e8   :  { %v2027_v46 = vpop.f32.mrf.mxu1 }
0x17e9   :  { %v2033_v48 = vadd.f32 %v2027_v46, %v531_v53 }
0x17ea   :  { %v5021_v35 = vpop.f32.mrf.mxu1 }
0x17eb   :  { %5853 = vtanh.f32 %v2033_v48  ;;  %v7050_v48 = vld [vmem:[%s7731_s2 + $0x18] sm:$0xff]   ;;  %v7057_v35 = vld [vmem:[%s7731_s2 + $0x10] sm:$0xff]  }
0x17ec   :  { %v2030_v11 = vpop.f32.mrf.mxu1 }
0x17ed   :  { %v550_v11 = vadd.f32 %v6673_v16, %v6372_v62  ;;  %v7084_v62 = vld [vmem:[%s7731_s2 + $0x8] sm:$0xff]  }
0x17ee   :  { %v5022_v25 = vpop.f32.mrf.mxu1 }
0x17f8   :  { %v5854_v37 = vpop.eup %5853 }
0x17f9   :  { %v2036_v52 = vpack.c.bf16 %v5854_v37, %v5854_v37 }
0x17fb   :  { %5040 = vmatmul.mubr.bf16.vlgmr.msra.gmra.mxu0 %v2036_v52 }
0x17fc   :  { %5064 = vmatpush3.bf16.msra.mxu0 %v6535_v28  ;;  %5079 = vmatprep.mubr.msk.bf16.mxu0 %vm5955_vm1, %v7751_v21 }
0x17fd   :  { %5065 = vmatprep.subr.bf16.mxu0 %v7751_v21 }
0x1800   :  { %5066 = vmatpush3.bf16.msra.mxu0 %v6544_v27 }
0x1801   :  { %5067 = vmatprep.subr.bf16.mxu0 %v7751_v21 }
0x1804   :  { %5068 = vmatpush3.bf16.msra.mxu0 %v6551_v32 }
0x1805   :  { %5069 = vmatprep.subr.bf16.mxu0 %v7751_v21 }
0x1808   :  { %5070 = vmatpush3.bf16.msra.mxu0 %v6618_v42 }
0x1809   :  { %5071 = vmatprep.subr.bf16.mxu0 %v7751_v21 }
0x180c   :  { %5072 = vmatpush3.bf16.msra.mxu0 %v6625_v23 }
0x180d   :  { %5073 = vmatprep.subr.bf16.mxu0 %v7751_v21 }
0x1810   :  { %5074 = vmatpush3.bf16.msra.mxu0 %v6632_v5 }
0x1811   :  { %5075 = vmatprep.subr.bf16.mxu0 %v7751_v21 }
0x1814   :  { %5076 = vmatpush3.bf16.msra.mxu0 %v6659_v13 }
0x1815   :  { %5077 = vmatprep.subr.bf16.mxu0 %v7751_v21 }
0x1818   :  { %5078 = vmatpush3.bf16.msra.mxu0 %v6666_v14 }
0x1819   :  { %5103 = vmatprep.subr.bf16.mxu0 %v7751_v21 }
0x18bb   :  { %v2071_v28 = vpop.f32.mrf.mxu0 }
0x18bc   :  { %v2077_v27 = vadd.f32 %v2071_v28, %v534_v56 }
0x18bd   :  { %v5041_v32 = vpop.f32.mrf.mxu0 }
0x18be   :  { %5855 = vtanh.f32 %v2077_v27 }
0x18bf   :  { %v2074_v39 = vpop.f32.mrf.mxu0 }
0x18c1   :  { %v5042_v12 = vpop.f32.mrf.mxu0 }
0x18cb   :  { %v5856_v40 = vpop.eup %5855 }
0x18cc   :  { %v2080_v50 = vpack.c.bf16 %v5856_v40, %v5856_v40 }
0x18ce   :  { %5060 = vmatmul.mubr.bf16.vlgmr.msra.gmra.mxu1 %v2080_v50 }
0x18cf   :  { %5084 = vmatpush3.bf16.msra.mxu1 %v6960_v43  ;;  %5099 = vmatprep.mubr.msk.bf16.mxu1 %vm5955_vm1, %v7751_v21 }
0x18d0   :  { %5085 = vmatprep.subr.bf16.mxu1 %v7751_v21 }
0x18d3   :  { %5086 = vmatpush3.bf16.msra.mxu1 %v6969_v58 }
0x18d4   :  { %5087 = vmatprep.subr.bf16.mxu1 %v7751_v21 }
0x18d7   :  { %5088 = vmatpush3.bf16.msra.mxu1 %v6976_v7 }
0x18d8   :  { %5089 = vmatprep.subr.bf16.mxu1 %v7751_v21 }
0x18db   :  { %5090 = vmatpush3.bf16.msra.mxu1 %v6618_v42 }
0x18dc   :  { %5091 = vmatprep.subr.bf16.mxu1 %v7751_v21 }
0x18df   :  { %5092 = vmatpush3.bf16.msra.mxu1 %v6625_v23 }
0x18e0   :  { %5093 = vmatprep.subr.bf16.mxu1 %v7751_v21 }
0x18e3   :  { %5094 = vmatpush3.bf16.msra.mxu1 %v6632_v5 }
0x18e4   :  { %5095 = vmatprep.subr.bf16.mxu1 %v7751_v21 }
0x18e7   :  { %5096 = vmatpush3.bf16.msra.mxu1 %v6659_v13 }
0x18e8   :  { %5097 = vmatprep.subr.bf16.mxu1 %v7751_v21 }
0x18eb   :  { %5098 = vmatpush3.bf16.msra.mxu1 %v6666_v14 }
0x18ec   :  { %5123 = vmatprep.subr.bf16.mxu1 %v7751_v21 }
0x198e   :  { %v2115_v54 = vpop.f32.mrf.mxu1 }
0x198f   :  { %v2121_v8 = vadd.f32 %v2115_v54, %v539_v29 }
0x1990   :  { %v5061_v33 = vpop.f32.mrf.mxu1 }
0x1991   :  { %5857 = vtanh.f32 %v2121_v8 }
0x1992   :  { %v2118_v41 = vpop.f32.mrf.mxu1 }
0x1994   :  { %v5062_v44 = vpop.f32.mrf.mxu1 }
0x199e   :  { %v5858_v47 = vpop.eup %5857 }
0x199f   :  { %v2124_v26 = vpack.c.bf16 %v5858_v47, %v5858_v47 }
0x19a1   :  { %5080 = vmatmul.mubr.bf16.vlgmr.msra.gmra.mxu0 %v2124_v26 }
0x19a2   :  { %5104 = vmatpush3.bf16.msra.mxu0 %v6960_v43  ;;  %5119 = vmatprep.mubr.msk.bf16.mxu0 %vm5955_vm1, %v7751_v21 }
0x19a3   :  { %5105 = vmatprep.subr.bf16.mxu0 %v7751_v21 }
0x19a6   :  { %5106 = vmatpush3.bf16.msra.mxu0 %v6969_v58 }
0x19a7   :  { %5107 = vmatprep.subr.bf16.mxu0 %v7751_v21 }
0x19aa   :  { %5108 = vmatpush3.bf16.msra.mxu0 %v6976_v7 }
0x19ab   :  { %5109 = vmatprep.subr.bf16.mxu0 %v7751_v21 }
0x19ae   :  { %5110 = vmatpush3.bf16.msra.mxu0 %v6618_v42 }
0x19af   :  { %5111 = vmatprep.subr.bf16.mxu0 %v7751_v21 }
0x19b2   :  { %5112 = vmatpush3.bf16.msra.mxu0 %v6625_v23 }
0x19b3   :  { %5113 = vmatprep.subr.bf16.mxu0 %v7751_v21 }
0x19b6   :  { %5114 = vmatpush3.bf16.msra.mxu0 %v6632_v5 }
0x19b7   :  { %5115 = vmatprep.subr.bf16.mxu0 %v7751_v21 }
0x19ba   :  { %5116 = vmatpush3.bf16.msra.mxu0 %v6659_v13 }
0x19bb   :  { %5117 = vmatprep.subr.bf16.mxu0 %v7751_v21 }
0x19be   :  { %5118 = vmatpush3.bf16.msra.mxu0 %v6666_v14 }
0x19bf   :  { %5143 = vmatprep.subr.bf16.mxu0 %v7751_v21 }
0x1a61   :  { %v2159_v45 = vpop.f32.mrf.mxu0 }
0x1a62   :  { %v2165_v51 = vadd.f32 %v2159_v45, %v542_v55 }
0x1a63   :  { %v5081_v19 = vpop.f32.mrf.mxu0 }
0x1a64   :  { %5859 = vtanh.f32 %v2165_v51 }
0x1a65   :  { %v2162_v22 = vpop.f32.mrf.mxu0 }
0x1a67   :  { %v5082_v36 = vpop.f32.mrf.mxu0 }
0x1a71   :  { %v5860_v34 = vpop.eup %5859 }
0x1a72   :  { %v2168_v10 = vpack.c.bf16 %v5860_v34, %v5860_v34 }
0x1a74   :  { %5100 = vmatmul.mubr.bf16.vlgmr.msra.gmra.mxu1 %v2168_v10 }
0x1a75   :  { %5124 = vmatpush3.bf16.msra.mxu1 %v6960_v43  ;;  %5139 = vmatprep.mubr.msk.bf16.mxu1 %vm5955_vm1, %v7751_v21 }
0x1a76   :  { %5125 = vmatprep.subr.bf16.mxu1 %v7751_v21 }
0x1a79   :  { %5126 = vmatpush3.bf16.msra.mxu1 %v6969_v58 }
0x1a7a   :  { %5127 = vmatprep.subr.bf16.mxu1 %v7751_v21 }
0x1a7d   :  { %5128 = vmatpush3.bf16.msra.mxu1 %v6976_v7 }
0x1a7e   :  { %5129 = vmatprep.subr.bf16.mxu1 %v7751_v21 }
0x1a81   :  { %5130 = vmatpush3.bf16.msra.mxu1 %v6618_v42 }
0x1a82   :  { %5131 = vmatprep.subr.bf16.mxu1 %v7751_v21 }
0x1a85   :  { %5132 = vmatpush3.bf16.msra.mxu1 %v6625_v23 }
0x1a86   :  { %5133 = vmatprep.subr.bf16.mxu1 %v7751_v21 }
0x1a89   :  { %5134 = vmatpush3.bf16.msra.mxu1 %v6632_v5 }
0x1a8a   :  { %5135 = vmatprep.subr.bf16.mxu1 %v7751_v21 }
0x1a8d   :  { %5136 = vmatpush3.bf16.msra.mxu1 %v6659_v13 }
0x1a8e   :  { %5137 = vmatprep.subr.bf16.mxu1 %v7751_v21 }
0x1a91   :  { %5138 = vmatpush3.bf16.msra.mxu1 %v6666_v14 }
0x1a92   :  { %5163 = vmatprep.subr.bf16.mxu1 %v7751_v21 }
0x1b34   :  { %v2203_v42 = vpop.f32.mrf.mxu1 }
0x1b35   :  { %v2209_v49 = vadd.f32 %v2203_v42, %v547_v57 }
0x1b36   :  { %v5101_v23 = vpop.f32.mrf.mxu1 }
0x1b37   :  { %5861 = vtanh.f32 %v2209_v49 }
0x1b38   :  { %v2206_v38 = vpop.f32.mrf.mxu1 }
0x1b3a   :  { %v5102_v53 = vpop.f32.mrf.mxu1 }
0x1b44   :  { %v5862_v5 = vpop.eup %5861 }
0x1b45   :  { %v2212_v46 = vpack.c.bf16 %v5862_v5, %v5862_v5 }
0x1b47   :  { %5120 = vmatmul.mubr.bf16.vlgmr.msra.gmra.mxu0 %v2212_v46 }
0x1b48   :  { %5144 = vmatpush3.bf16.msra.mxu0 %v6960_v43  ;;  %5159 = vmatprep.mubr.msk.bf16.mxu0 %vm5955_vm1, %v7751_v21 }
0x1b49   :  { %5145 = vmatprep.subr.bf16.mxu0 %v7751_v21 }
0x1b4c   :  { %5146 = vmatpush3.bf16.msra.mxu0 %v6969_v58 }
0x1b4d   :  { %5147 = vmatprep.subr.bf16.mxu0 %v7751_v21 }
0x1b50   :  { %5148 = vmatpush3.bf16.msra.mxu0 %v6976_v7 }
0x1b51   :  { %5149 = vmatprep.subr.bf16.mxu0 %v7751_v21 }
0x1b54   :  { %5150 = vmatpush3.bf16.msra.mxu0 %v7043_v60 }
0x1b55   :  { %5151 = vmatprep.subr.bf16.mxu0 %v7751_v21 }
0x1b58   :  { %5152 = vmatpush3.bf16.msra.mxu0 %v7050_v48 }
0x1b59   :  { %5153 = vmatprep.subr.bf16.mxu0 %v7751_v21 }
0x1b5c   :  { %5154 = vmatpush3.bf16.msra.mxu0 %v7057_v35 }
0x1b5d   :  { %5155 = vmatprep.subr.bf16.mxu0 %v7751_v21 }
0x1b60   :  { %5156 = vmatpush3.bf16.msra.mxu0 %v6659_v13  ;;  %v7091_v13 = vld [vmem:[%s7731_s2] sm:$0xff]  }
0x1b61   :  { %5157 = vmatprep.subr.bf16.mxu0 %v7751_v21 }
0x1b64   :  { %5158 = vmatpush3.bf16.msra.mxu0 %v6666_v14  ;;  %v7098_v14 = vld [vmem:[%s7732_s3] ss:$0 sm:$0xff] }
0x1b65   :  { %5183 = vmatprep.subr.bf16.mxu0 %v7751_v21  ;;  %v555_v16 = vadd.f32 %v7098_v14, %v6366_v59  ;;  %v558_v59 = vadd.f32 %v7098_v14, %v6370_v61  ;;  %v563_v61 = vadd.f32 %v7098_v14, %v6376_v0  ;;  %v566_v0 = vadd.f32 %v7098_v14, %v6380_v3 }
0x1b66   :  { %v571_v3 = vadd.f32 %v7098_v14, %v6374_v63  ;;  %v574_v63 = vadd.f32 %v7098_v14, %v6378_v2  ;;  %v579_v2 = vadd.f32 %v7098_v14, %v6384_v6  ;;  %v582_v6 = vadd.f32 %v7098_v14, %v6388_v15 }
0x1b67   :  { %v587_v15 = vadd.f32 %v7098_v14, %v6382_v4  ;;  %v590_v4 = vadd.f32 %v7098_v14, %v6386_v9  ;;  %v595_v9 = vadd.f32 %v7098_v14, %v6392_v18  ;;  %v598_v18 = vadd.f32 %v7098_v14, %v6396_v20 }
0x1b68   :  { %v603_v20 = vadd.f32 %v7098_v14, %v6390_v17  ;;  %v7752_v17 = vld [vmem:[#allocation3_spill] sm:$0xff] }
0x1c07   :  { %v2247_v25 = vpop.f32.mrf.mxu0 }
0x1c08   :  { %v2253_v37 = vadd.f32 %v2247_v25, %v550_v11 }
0x1c09   :  { %v5121_v52 = vpop.f32.mrf.mxu0 }
0x1c0a   :  { %5863 = vtanh.f32 %v2253_v37 }
0x1c0b   :  { %v2250_v56 = vpop.f32.mrf.mxu0 }
0x1c0d   :  { %v5122_v28 = vpop.f32.mrf.mxu0 }
0x1c17   :  { %v5864_v27 = vpop.eup %5863 }
0x1c18   :  { %v2256_v32 = vpack.c.bf16 %v5864_v27, %v5864_v27 }
0x1c1a   :  { %5140 = vmatmul.mubr.bf16.vlgmr.msra.gmra.mxu1 %v2256_v32 }
0x1c1b   :  { %5164 = vmatpush3.bf16.msra.mxu1 %v6960_v43  ;;  %5179 = vmatprep.mubr.msk.bf16.mxu1 %vm5955_vm1, %v7751_v21 }
0x1c1c   :  { %5165 = vmatprep.subr.bf16.mxu1 %v7751_v21 }
0x1c1f   :  { %5166 = vmatpush3.bf16.msra.mxu1 %v6969_v58 }
0x1c20   :  { %5167 = vmatprep.subr.bf16.mxu1 %v7751_v21 }
0x1c23   :  { %5168 = vmatpush3.bf16.msra.mxu1 %v6976_v7 }
0x1c24   :  { %5169 = vmatprep.subr.bf16.mxu1 %v7751_v21 }
0x1c27   :  { %5170 = vmatpush3.bf16.msra.mxu1 %v7043_v60 }
0x1c28   :  { %5171 = vmatprep.subr.bf16.mxu1 %v7751_v21 }
0x1c2b   :  { %5172 = vmatpush3.bf16.msra.mxu1 %v7050_v48 }
0x1c2c   :  { %5173 = vmatprep.subr.bf16.mxu1 %v7751_v21 }
0x1c2f   :  { %5174 = vmatpush3.bf16.msra.mxu1 %v7057_v35 }
0x1c30   :  { %5175 = vmatprep.subr.bf16.mxu1 %v7751_v21 }
0x1c33   :  { %5176 = vmatpush3.bf16.msra.mxu1 %v7084_v62 }
0x1c34   :  { %5177 = vmatprep.subr.bf16.mxu1 %v7751_v21 }
0x1c37   :  { %5178 = vmatpush3.bf16.msra.mxu1 %v7091_v13 }
0x1c38   :  { %5203 = vmatprep.subr.bf16.mxu1 %v7751_v21 }
0x1cda   :  { %v2291_v39 = vpop.f32.mrf.mxu1 }
0x1cdb   :  { %v2297_v12 = vadd.f32 %v2291_v39, %v555_v16 }
0x1cdc   :  { %v5141_v40 = vpop.f32.mrf.mxu1 }
0x1cdd   :  { %5865 = vtanh.f32 %v2297_v12 }
0x1cde   :  { %v2294_v50 = vpop.f32.mrf.mxu1 }
0x1ce0   :  { %v5142_v29 = vpop.f32.mrf.mxu1 }
0x1cea   :  { %v5866_v54 = vpop.eup %5865 }
0x1ceb   :  { %v2300_v8 = vpack.c.bf16 %v5866_v54, %v5866_v54 }
0x1ced   :  { %5160 = vmatmul.mubr.bf16.vlgmr.msra.gmra.mxu0 %v2300_v8 }
0x1cee   :  { %5184 = vmatpush3.bf16.msra.mxu0 %v6960_v43  ;;  %5199 = vmatprep.mubr.msk.bf16.mxu0 %vm5955_vm1, %v7751_v21 }
0x1cef   :  { %5185 = vmatprep.subr.bf16.mxu0 %v7751_v21 }
0x1cf2   :  { %5186 = vmatpush3.bf16.msra.mxu0 %v6969_v58 }
0x1cf3   :  { %5187 = vmatprep.subr.bf16.mxu0 %v7751_v21 }
0x1cf6   :  { %5188 = vmatpush3.bf16.msra.mxu0 %v6976_v7 }
0x1cf7   :  { %5189 = vmatprep.subr.bf16.mxu0 %v7751_v21 }
0x1cfa   :  { %5190 = vmatpush3.bf16.msra.mxu0 %v7043_v60 }
0x1cfb   :  { %5191 = vmatprep.subr.bf16.mxu0 %v7751_v21 }
0x1cfe   :  { %5192 = vmatpush3.bf16.msra.mxu0 %v7050_v48 }
0x1cff   :  { %5193 = vmatprep.subr.bf16.mxu0 %v7751_v21 }
0x1d02   :  { %5194 = vmatpush3.bf16.msra.mxu0 %v7057_v35 }
0x1d03   :  { %5195 = vmatprep.subr.bf16.mxu0 %v7751_v21 }
0x1d06   :  { %5196 = vmatpush3.bf16.msra.mxu0 %v7084_v62 }
0x1d07   :  { %5197 = vmatprep.subr.bf16.mxu0 %v7751_v21 }
0x1d0a   :  { %5198 = vmatpush3.bf16.msra.mxu0 %v7091_v13 }
0x1d0b   :  { %5223 = vmatprep.subr.bf16.mxu0 %v7751_v21 }
0x1dad   :  { %v2335_v33 = vpop.f32.mrf.mxu0 }
0x1dae   :  { %v2341_v41 = vadd.f32 %v2335_v33, %v558_v59 }
0x1daf   :  { %v5161_v44 = vpop.f32.mrf.mxu0 }
0x1db0   :  { %5867 = vtanh.f32 %v2341_v41 }
0x1db1   :  { %v2338_v47 = vpop.f32.mrf.mxu0 }
0x1db3   :  { %v5162_v26 = vpop.f32.mrf.mxu0 }
0x1dbd   :  { %v5868_v55 = vpop.eup %5867 }
0x1dbe   :  { %v2344_v45 = vpack.c.bf16 %v5868_v55, %v5868_v55 }
0x1dc0   :  { %5180 = vmatmul.mubr.bf16.vlgmr.msra.gmra.mxu1 %v2344_v45 }
0x1dc1   :  { %5204 = vmatpush3.bf16.msra.mxu1 %v6960_v43  ;;  %5219 = vmatprep.mubr.msk.bf16.mxu1 %vm5955_vm1, %v7751_v21 }
0x1dc2   :  { %5205 = vmatprep.subr.bf16.mxu1 %v7751_v21 }
0x1dc5   :  { %5206 = vmatpush3.bf16.msra.mxu1 %v6969_v58 }
0x1dc6   :  { %5207 = vmatprep.subr.bf16.mxu1 %v7751_v21 }
0x1dc9   :  { %5208 = vmatpush3.bf16.msra.mxu1 %v6976_v7 }
0x1dca   :  { %5209 = vmatprep.subr.bf16.mxu1 %v7751_v21 }
0x1dcd   :  { %5210 = vmatpush3.bf16.msra.mxu1 %v7043_v60 }
0x1dce   :  { %5211 = vmatprep.subr.bf16.mxu1 %v7751_v21 }
0x1dd1   :  { %5212 = vmatpush3.bf16.msra.mxu1 %v7050_v48 }
0x1dd2   :  { %5213 = vmatprep.subr.bf16.mxu1 %v7751_v21 }
0x1dd5   :  { %5214 = vmatpush3.bf16.msra.mxu1 %v7057_v35 }
0x1dd6   :  { %5215 = vmatprep.subr.bf16.mxu1 %v7751_v21 }
0x1dd9   :  { %5216 = vmatpush3.bf16.msra.mxu1 %v7084_v62 }
0x1dda   :  { %5217 = vmatprep.subr.bf16.mxu1 %v7751_v21 }
0x1ddd   :  { %5218 = vmatpush3.bf16.msra.mxu1 %v7091_v13 }
0x1dde   :  { %5243 = vmatprep.subr.bf16.mxu1 %v7751_v21 }
0x1e80   :  { %v2379_v51 = vpop.f32.mrf.mxu1 }
0x1e81   :  { %v2385_v19 = vadd.f32 %v2379_v51, %v563_v61 }
0x1e82   :  { %v5181_v22 = vpop.f32.mrf.mxu1 }
0x1e83   :  { %5869 = vtanh.f32 %v2385_v19 }
0x1e84   :  { %v2382_v36 = vpop.f32.mrf.mxu1 }
0x1e86   :  { %v5182_v34 = vpop.f32.mrf.mxu1 }
0x1e90   :  { %v5870_v10 = vpop.eup %5869 }
0x1e91   :  { %v2388_v57 = vpack.c.bf16 %v5870_v10, %v5870_v10 }
0x1e93   :  { %5200 = vmatmul.mubr.bf16.vlgmr.msra.gmra.mxu0 %v2388_v57 }
0x1e94   :  { %5224 = vmatpush3.bf16.msra.mxu0 %v6960_v43  ;;  %5239 = vmatprep.mubr.msk.bf16.mxu0 %vm5955_vm1, %v7751_v21 }
0x1e95   :  { %5225 = vmatprep.subr.bf16.mxu0 %v7751_v21 }
0x1e98   :  { %5226 = vmatpush3.bf16.msra.mxu0 %v6969_v58 }
0x1e99   :  { %5227 = vmatprep.subr.bf16.mxu0 %v7751_v21 }
0x1e9c   :  { %5228 = vmatpush3.bf16.msra.mxu0 %v6976_v7 }
0x1e9d   :  { %5229 = vmatprep.subr.bf16.mxu0 %v7751_v21 }
0x1ea0   :  { %5230 = vmatpush3.bf16.msra.mxu0 %v7043_v60 }
0x1ea1   :  { %5231 = vmatprep.subr.bf16.mxu0 %v7751_v21 }
0x1ea4   :  { %5232 = vmatpush3.bf16.msra.mxu0 %v7050_v48 }
0x1ea5   :  { %5233 = vmatprep.subr.bf16.mxu0 %v7751_v21 }
0x1ea8   :  { %5234 = vmatpush3.bf16.msra.mxu0 %v7057_v35 }
0x1ea9   :  { %5235 = vmatprep.subr.bf16.mxu0 %v7751_v21 }
0x1eac   :  { %5236 = vmatpush3.bf16.msra.mxu0 %v7084_v62 }
0x1ead   :  { %5237 = vmatprep.subr.bf16.mxu0 %v7751_v21 }
0x1eb0   :  { %5238 = vmatpush3.bf16.msra.mxu0 %v7091_v13 }
0x1eb1   :  { %5263 = vmatprep.subr.bf16.mxu0 %v7751_v21 }
0x1f53   :  { %v2423_v42 = vpop.f32.mrf.mxu0 }
0x1f54   :  { %v2429_v49 = vadd.f32 %v2423_v42, %v566_v0 }
0x1f55   :  { %v5201_v23 = vpop.f32.mrf.mxu0 }
0x1f56   :  { %5871 = vtanh.f32 %v2429_v49 }
0x1f57   :  { %v2426_v38 = vpop.f32.mrf.mxu0 }
0x1f59   :  { %v5202_v53 = vpop.f32.mrf.mxu0 }
0x1f63   :  { %v5872_v5 = vpop.eup %5871 }
0x1f64   :  { %v2432_v46 = vpack.c.bf16 %v5872_v5, %v5872_v5 }
0x1f66   :  { %5220 = vmatmul.mubr.bf16.vlgmr.msra.gmra.mxu1 %v2432_v46 }
0x1f67   :  { %5244 = vmatpush3.bf16.msra.mxu1 %v6960_v43  ;;  %5259 = vmatprep.mubr.msk.bf16.mxu1 %vm5955_vm1, %v7751_v21 }
0x1f68   :  { %5245 = vmatprep.subr.bf16.mxu1 %v7751_v21 }
0x1f6b   :  { %5246 = vmatpush3.bf16.msra.mxu1 %v6969_v58 }
0x1f6c   :  { %5247 = vmatprep.subr.bf16.mxu1 %v7751_v21 }
0x1f6f   :  { %5248 = vmatpush3.bf16.msra.mxu1 %v6976_v7 }
0x1f70   :  { %5249 = vmatprep.subr.bf16.mxu1 %v7751_v21 }
0x1f73   :  { %5250 = vmatpush3.bf16.msra.mxu1 %v7043_v60 }
0x1f74   :  { %5251 = vmatprep.subr.bf16.mxu1 %v7751_v21 }
0x1f77   :  { %5252 = vmatpush3.bf16.msra.mxu1 %v7050_v48 }
0x1f78   :  { %5253 = vmatprep.subr.bf16.mxu1 %v7751_v21 }
0x1f7b   :  { %5254 = vmatpush3.bf16.msra.mxu1 %v7057_v35 }
0x1f7c   :  { %5255 = vmatprep.subr.bf16.mxu1 %v7751_v21 }
0x1f7f   :  { %5256 = vmatpush3.bf16.msra.mxu1 %v7084_v62 }
0x1f80   :  { %5257 = vmatprep.subr.bf16.mxu1 %v7751_v21 }
0x1f83   :  { %5258 = vmatpush3.bf16.msra.mxu1 %v7091_v13 }
0x1f84   :  { %5283 = vmatprep.subr.bf16.mxu1 %v7751_v21 }
0x2026   :  { %v2467_v11 = vpop.f32.mrf.mxu1 }
0x2027   :  { %v2473_v25 = vadd.f32 %v2467_v11, %v571_v3 }
0x2028   :  { %v5221_v37 = vpop.f32.mrf.mxu1 }
0x2029   :  { %5873 = vtanh.f32 %v2473_v25 }
0x202a   :  { %v2470_v52 = vpop.f32.mrf.mxu1 }
0x202c   :  { %v5222_v56 = vpop.f32.mrf.mxu1 }
0x2036   :  { %v5874_v28 = vpop.eup %5873 }
0x2037   :  { %v2476_v27 = vpack.c.bf16 %v5874_v28, %v5874_v28 }
0x2039   :  { %5240 = vmatmul.mubr.bf16.vlgmr.msra.gmra.mxu0 %v2476_v27 }
0x203a   :  { %5264 = vmatpush3.bf16.msra.mxu0 %v6960_v43  ;;  %5279 = vmatprep.mubr.msk.bf16.mxu0 %vm5955_vm1, %v7751_v21 }
0x203b   :  { %5265 = vmatprep.subr.bf16.mxu0 %v7751_v21 }
0x203e   :  { %5266 = vmatpush3.bf16.msra.mxu0 %v6969_v58 }
0x203f   :  { %5267 = vmatprep.subr.bf16.mxu0 %v7751_v21 }
0x2042   :  { %5268 = vmatpush3.bf16.msra.mxu0 %v6976_v7 }
0x2043   :  { %5269 = vmatprep.subr.bf16.mxu0 %v7751_v21 }
0x2046   :  { %5270 = vmatpush3.bf16.msra.mxu0 %v7043_v60 }
0x2047   :  { %5271 = vmatprep.subr.bf16.mxu0 %v7751_v21 }
0x204a   :  { %5272 = vmatpush3.bf16.msra.mxu0 %v7050_v48 }
0x204b   :  { %5273 = vmatprep.subr.bf16.mxu0 %v7751_v21 }
0x204e   :  { %5274 = vmatpush3.bf16.msra.mxu0 %v7057_v35 }
0x204f   :  { %5275 = vmatprep.subr.bf16.mxu0 %v7751_v21 }
0x2052   :  { %5276 = vmatpush3.bf16.msra.mxu0 %v7084_v62 }
0x2053   :  { %5277 = vmatprep.subr.bf16.mxu0 %v7751_v21 }
0x2056   :  { %5278 = vmatpush3.bf16.msra.mxu0 %v7091_v13 }
0x2057   :  { %5303 = vmatprep.subr.bf16.mxu0 %v7751_v21 }
0x20f9   :  { %v2511_v32 = vpop.f32.mrf.mxu0 }
0x20fa   :  { %v2517_v16 = vadd.f32 %v2511_v32, %v574_v63 }
0x20fb   :  { %v5241_v39 = vpop.f32.mrf.mxu0 }
0x20fc   :  { %5875 = vtanh.f32 %v2517_v16 }
0x20fd   :  { %v2514_v12 = vpop.f32.mrf.mxu0 }
0x20ff   :  { %v5242_v40 = vpop.f32.mrf.mxu0 }
0x2109   :  { %v5876_v50 = vpop.eup %5875 }
0x210a   :  { %v2520_v29 = vpack.c.bf16 %v5876_v50, %v5876_v50 }
0x210c   :  { %5260 = vmatmul.mubr.bf16.vlgmr.msra.gmra.mxu1 %v2520_v29 }
0x210d   :  { %5284 = vmatpush3.bf16.msra.mxu1 %v6960_v43  ;;  %5299 = vmatprep.mubr.msk.bf16.mxu1 %vm5955_vm1, %v7751_v21 }
0x210e   :  { %5285 = vmatprep.subr.bf16.mxu1 %v7751_v21 }
0x2111   :  { %5286 = vmatpush3.bf16.msra.mxu1 %v6969_v58 }
0x2112   :  { %5287 = vmatprep.subr.bf16.mxu1 %v7751_v21 }
0x2115   :  { %5288 = vmatpush3.bf16.msra.mxu1 %v6976_v7 }
0x2116   :  { %5289 = vmatprep.subr.bf16.mxu1 %v7751_v21 }
0x2119   :  { %5290 = vmatpush3.bf16.msra.mxu1 %v7043_v60 }
0x211a   :  { %5291 = vmatprep.subr.bf16.mxu1 %v7751_v21 }
0x211d   :  { %5292 = vmatpush3.bf16.msra.mxu1 %v7050_v48 }
0x211e   :  { %5293 = vmatprep.subr.bf16.mxu1 %v7751_v21 }
0x2121   :  { %5294 = vmatpush3.bf16.msra.mxu1 %v7057_v35 }
0x2122   :  { %5295 = vmatprep.subr.bf16.mxu1 %v7751_v21 }
0x2125   :  { %5296 = vmatpush3.bf16.msra.mxu1 %v7084_v62 }
0x2126   :  { %5297 = vmatprep.subr.bf16.mxu1 %v7751_v21 }
0x2129   :  { %5298 = vmatpush3.bf16.msra.mxu1 %v7091_v13 }
0x212a   :  { %5323 = vmatprep.subr.bf16.mxu1 %v7751_v21 }
0x21cc   :  { %v2555_v54 = vpop.f32.mrf.mxu1 }
0x21cd   :  { %v2561_v8 = vadd.f32 %v2555_v54, %v579_v2 }
0x21ce   :  { %v5261_v59 = vpop.f32.mrf.mxu1 }
0x21cf   :  { %5877 = vtanh.f32 %v2561_v8 }
0x21d0   :  { %v2558_v33 = vpop.f32.mrf.mxu1 }
0x21d2   :  { %v5262_v41 = vpop.f32.mrf.mxu1 }
0x21dc   :  { %v5878_v44 = vpop.eup %5877 }
0x21dd   :  { %v2564_v47 = vpack.c.bf16 %v5878_v44, %v5878_v44 }
0x21df   :  { %5280 = vmatmul.mubr.bf16.vlgmr.msra.gmra.mxu0 %v2564_v47  ;;  %v606_v47 = vadd.f32 %v7098_v14, %v7752_v17 }
0x21e0   :  { %5304 = vmatpush3.bf16.msra.mxu0 %v6960_v43  ;;  %5319 = vmatprep.mubr.msk.bf16.mxu0 %vm5955_vm1, %v7751_v21 }
0x21e1   :  { %5305 = vmatprep.subr.bf16.mxu0 %v7751_v21 }
0x21e4   :  { %5306 = vmatpush3.bf16.msra.mxu0 %v6969_v58 }
0x21e5   :  { %5307 = vmatprep.subr.bf16.mxu0 %v7751_v21 }
0x21e8   :  { %5308 = vmatpush3.bf16.msra.mxu0 %v6976_v7 }
0x21e9   :  { %5309 = vmatprep.subr.bf16.mxu0 %v7751_v21 }
0x21ec   :  { %5310 = vmatpush3.bf16.msra.mxu0 %v7043_v60 }
0x21ed   :  { %5311 = vmatprep.subr.bf16.mxu0 %v7751_v21 }
0x21f0   :  { %5312 = vmatpush3.bf16.msra.mxu0 %v7050_v48 }
0x21f1   :  { %5313 = vmatprep.subr.bf16.mxu0 %v7751_v21 }
0x21f4   :  { %5314 = vmatpush3.bf16.msra.mxu0 %v7057_v35 }
0x21f5   :  { %5315 = vmatprep.subr.bf16.mxu0 %v7751_v21 }
0x21f8   :  { %5316 = vmatpush3.bf16.msra.mxu0 %v7084_v62 }
0x21f9   :  { %5317 = vmatprep.subr.bf16.mxu0 %v7751_v21 }
0x21fc   :  { %5318 = vmatpush3.bf16.msra.mxu0 %v7091_v13 }
0x21fd   :  { %5343 = vmatprep.subr.bf16.mxu0 %v7751_v21 }
0x229f   :  { %v2599_v26 = vpop.f32.mrf.mxu0 }
0x22a0   :  { %v2605_v55 = vadd.f32 %v2599_v26, %v582_v6 }
0x22a1   :  { %v5281_v45 = vpop.f32.mrf.mxu0 }
0x22a2   :  { %5879 = vtanh.f32 %v2605_v55 }
0x22a3   :  { %v2602_v61 = vpop.f32.mrf.mxu0 }
0x22a5   :  { %v5282_v51 = vpop.f32.mrf.mxu0 }
0x22af   :  { %v5880_v19 = vpop.eup %5879 }
0x22b0   :  { %v2608_v22 = vpack.c.bf16 %v5880_v19, %v5880_v19 }
0x22b2   :  { %5300 = vmatmul.mubr.bf16.vlgmr.msra.gmra.mxu1 %v2608_v22 }
0x22b3   :  { %5324 = vmatpush3.bf16.msra.mxu1 %v6960_v43  ;;  %5339 = vmatprep.mubr.msk.bf16.mxu1 %vm5955_vm1, %v7751_v21 }
0x22b4   :  { %5325 = vmatprep.subr.bf16.mxu1 %v7751_v21 }
0x22b7   :  { %5326 = vmatpush3.bf16.msra.mxu1 %v6969_v58 }
0x22b8   :  { %5327 = vmatprep.subr.bf16.mxu1 %v7751_v21 }
0x22bb   :  { %5328 = vmatpush3.bf16.msra.mxu1 %v6976_v7 }
0x22bc   :  { %5329 = vmatprep.subr.bf16.mxu1 %v7751_v21 }
0x22bf   :  { %5330 = vmatpush3.bf16.msra.mxu1 %v7043_v60 }
0x22c0   :  { %5331 = vmatprep.subr.bf16.mxu1 %v7751_v21 }
0x22c3   :  { %5332 = vmatpush3.bf16.msra.mxu1 %v7050_v48 }
0x22c4   :  { %5333 = vmatprep.subr.bf16.mxu1 %v7751_v21 }
0x22c7   :  { %5334 = vmatpush3.bf16.msra.mxu1 %v7057_v35 }
0x22c8   :  { %5335 = vmatprep.subr.bf16.mxu1 %v7751_v21 }
0x22cb   :  { %5336 = vmatpush3.bf16.msra.mxu1 %v7084_v62 }
0x22cc   :  { %5337 = vmatprep.subr.bf16.mxu1 %v7751_v21 }
0x22cf   :  { %5338 = vmatpush3.bf16.msra.mxu1 %v7091_v13 }
0x22d0   :  { %5363 = vmatprep.subr.bf16.mxu1 %v7751_v21 }
0x2372   :  { %v2643_v36 = vpop.f32.mrf.mxu1 }
0x2373   :  { %v2649_v34 = vadd.f32 %v2643_v36, %v587_v15 }
0x2374   :  { %v5301_v10 = vpop.f32.mrf.mxu1 }
0x2375   :  { %5881 = vtanh.f32 %v2649_v34 }
0x2376   :  { %v2646_v57 = vpop.f32.mrf.mxu1 }
0x2378   :  { %v5302_v0 = vpop.f32.mrf.mxu1 }
0x2379   :  { %v7385_v0 = vld [vmem:[%s7731_s2 + $0x38] sm:$0xff]  }
0x2382   :  { %v5882_v42 = vpop.eup %5881 }
0x2383   :  { %v2652_v49 = vpack.c.bf16 %v5882_v42, %v5882_v42  ;;  %v7394_v42 = vld [vmem:[%s7731_s2 + $0x30] sm:$0xff]  }
0x2385   :  { %5320 = vmatmul.mubr.bf16.vlgmr.msra.gmra.mxu0 %v2652_v49  ;;  %v7401_v49 = vld [vmem:[%s7731_s2 + $0x28] sm:$0xff]  }
0x2386   :  { %5344 = vmatpush3.bf16.msra.mxu0 %v6960_v43  ;;  %5359 = vmatprep.mubr.msk.bf16.mxu0 %vm5955_vm1, %v7751_v21 }
0x2387   :  { %5345 = vmatprep.subr.bf16.mxu0 %v7751_v21 }
0x238a   :  { %5346 = vmatpush3.bf16.msra.mxu0 %v6969_v58 }
0x238b   :  { %5347 = vmatprep.subr.bf16.mxu0 %v7751_v21 }
0x238e   :  { %5348 = vmatpush3.bf16.msra.mxu0 %v6976_v7 }
0x238f   :  { %5349 = vmatprep.subr.bf16.mxu0 %v7751_v21 }
0x2392   :  { %5350 = vmatpush3.bf16.msra.mxu0 %v7043_v60 }
0x2393   :  { %5351 = vmatprep.subr.bf16.mxu0 %v7751_v21 }
0x2396   :  { %5352 = vmatpush3.bf16.msra.mxu0 %v7050_v48 }
0x2397   :  { %5353 = vmatprep.subr.bf16.mxu0 %v7751_v21 }
0x239a   :  { %5354 = vmatpush3.bf16.msra.mxu0 %v7057_v35 }
0x239b   :  { %5355 = vmatprep.subr.bf16.mxu0 %v7751_v21 }
0x239e   :  { %5356 = vmatpush3.bf16.msra.mxu0 %v7084_v62 }
0x239f   :  { %5357 = vmatprep.subr.bf16.mxu0 %v7751_v21 }
0x23a2   :  { %5358 = vmatpush3.bf16.msra.mxu0 %v7091_v13 }
0x23a3   :  { %5383 = vmatprep.subr.bf16.mxu0 %v7751_v21 }
0x2445   :  { %v2687_v23 = vpop.f32.mrf.mxu0 }
0x2446   :  { %v2693_v38 = vadd.f32 %v2687_v23, %v590_v4  ;;  %v7754_v4 = vld [vmem:[#allocation7_spill] sm:$0xff] }
0x2447   :  { %v5321_v53 = vpop.f32.mrf.mxu0  ;;  %v614_v23 = vadd.f32 %v7098_v14, %v7754_v4 }
0x2448   :  { %5883 = vtanh.f32 %v2693_v38 }
0x2449   :  { %v2690_v5 = vpop.f32.mrf.mxu0 }
0x244b   :  { %v5322_v46 = vpop.f32.mrf.mxu0 }
0x2455   :  { %v5884_v3 = vpop.eup %5883 }
0x2456   :  { %v2696_v11 = vpack.c.bf16 %v5884_v3, %v5884_v3 }
0x2458   :  { %5340 = vmatmul.mubr.bf16.vlgmr.msra.gmra.mxu1 %v2696_v11 }
0x2459   :  { %5364 = vmatpush3.bf16.msra.mxu1 %v6960_v43  ;;  %5379 = vmatprep.mubr.msk.bf16.mxu1 %vm5955_vm1, %v7751_v21 }
0x245a   :  { %5365 = vmatprep.subr.bf16.mxu1 %v7751_v21 }
0x245d   :  { %5366 = vmatpush3.bf16.msra.mxu1 %v6969_v58 }
0x245e   :  { %5367 = vmatprep.subr.bf16.mxu1 %v7751_v21 }
0x2461   :  { %5368 = vmatpush3.bf16.msra.mxu1 %v6976_v7 }
0x2462   :  { %5369 = vmatprep.subr.bf16.mxu1 %v7751_v21 }
0x2465   :  { %5370 = vmatpush3.bf16.msra.mxu1 %v7043_v60 }
0x2466   :  { %5371 = vmatprep.subr.bf16.mxu1 %v7751_v21 }
0x2469   :  { %5372 = vmatpush3.bf16.msra.mxu1 %v7050_v48 }
0x246a   :  { %5373 = vmatprep.subr.bf16.mxu1 %v7751_v21 }
0x246d   :  { %5374 = vmatpush3.bf16.msra.mxu1 %v7057_v35 }
0x246e   :  { %5375 = vmatprep.subr.bf16.mxu1 %v7751_v21 }
0x2471   :  { %5376 = vmatpush3.bf16.msra.mxu1 %v7084_v62 }
0x2472   :  { %5377 = vmatprep.subr.bf16.mxu1 %v7751_v21 }
0x2475   :  { %5378 = vmatpush3.bf16.msra.mxu1 %v7091_v13 }
0x2476   :  { %5403 = vmatprep.subr.bf16.mxu1 %v7751_v21 }
0x2518   :  { %v2731_v25 = vpop.f32.mrf.mxu1 }
0x2519   :  { %v2737_v37 = vadd.f32 %v2731_v25, %v595_v9  ;;  %v7755_v25 = vld [vmem:[#allocation4_spill] sm:$0xff] }
0x251a   :  { %v5341_v52 = vpop.f32.mrf.mxu1 }
0x251b   :  { %5885 = vtanh.f32 %v2737_v37  ;;  %v619_v37 = vadd.f32 %v7098_v14, %v7755_v25 }
0x251c   :  { %v2734_v56 = vpop.f32.mrf.mxu1 }
0x251e   :  { %v5342_v28 = vpop.f32.mrf.mxu1 }
0x2528   :  { %v5886_v27 = vpop.eup %5885 }
0x2529   :  { %v2740_v63 = vpack.c.bf16 %v5886_v27, %v5886_v27 }
0x252b   :  { %5360 = vmatmul.mubr.bf16.vlgmr.msra.gmra.mxu0 %v2740_v63 }
0x252c   :  { %5384 = vmatpush3.bf16.msra.mxu0 %v6960_v43  ;;  %5399 = vmatprep.mubr.msk.bf16.mxu0 %vm5955_vm1, %v7751_v21 }
0x252d   :  { %5385 = vmatprep.subr.bf16.mxu0 %v7751_v21 }
0x2530   :  { %5386 = vmatpush3.bf16.msra.mxu0 %v6969_v58 }
0x2531   :  { %5387 = vmatprep.subr.bf16.mxu0 %v7751_v21 }
0x2534   :  { %5388 = vmatpush3.bf16.msra.mxu0 %v6976_v7 }
0x2535   :  { %5389 = vmatprep.subr.bf16.mxu0 %v7751_v21 }
0x2538   :  { %5390 = vmatpush3.bf16.msra.mxu0 %v7043_v60 }
0x2539   :  { %5391 = vmatprep.subr.bf16.mxu0 %v7751_v21 }
0x253c   :  { %5392 = vmatpush3.bf16.msra.mxu0 %v7050_v48 }
0x253d   :  { %5393 = vmatprep.subr.bf16.mxu0 %v7751_v21 }
0x2540   :  { %5394 = vmatpush3.bf16.msra.mxu0 %v7057_v35 }
0x2541   :  { %5395 = vmatprep.subr.bf16.mxu0 %v7751_v21 }
0x2544   :  { %5396 = vmatpush3.bf16.msra.mxu0 %v7084_v62 }
0x2545   :  { %5397 = vmatprep.subr.bf16.mxu0 %v7751_v21 }
0x2548   :  { %5398 = vmatpush3.bf16.msra.mxu0 %v7091_v13 }
0x2549   :  { %5423 = vmatprep.subr.bf16.mxu0 %v7751_v21 }
0x25eb   :  { %v2775_v32 = vpop.f32.mrf.mxu0 }
0x25ec   :  { %v2781_v16 = vadd.f32 %v2775_v32, %v598_v18 }
0x25ed   :  { %v5361_v39 = vpop.f32.mrf.mxu0 }
0x25ee   :  { %5887 = vtanh.f32 %v2781_v16  ;;  %v7756_v16 = vld [vmem:[#allocation6_spill] sm:$0xff] }
0x25ef   :  { %v2778_v12 = vpop.f32.mrf.mxu0 }
0x25f1   :  { %v5362_v40 = vpop.f32.mrf.mxu0 }
0x25fb   :  { %v5888_v50 = vpop.eup %5887 }
0x25fc   :  { %v2784_v29 = vpack.c.bf16 %v5888_v50, %v5888_v50 }
0x25fe   :  { %5380 = vmatmul.mubr.bf16.vlgmr.msra.gmra.mxu1 %v2784_v29 }
0x25ff   :  { %5404 = vmatpush3.bf16.msra.mxu1 %v6960_v43  ;;  %5419 = vmatprep.mubr.msk.bf16.mxu1 %vm5955_vm1, %v7751_v21 }
0x2600   :  { %5405 = vmatprep.subr.bf16.mxu1 %v7751_v21 }
0x2603   :  { %5406 = vmatpush3.bf16.msra.mxu1 %v6969_v58 }
0x2604   :  { %5407 = vmatprep.subr.bf16.mxu1 %v7751_v21 }
0x2607   :  { %5408 = vmatpush3.bf16.msra.mxu1 %v6976_v7 }
0x2608   :  { %5409 = vmatprep.subr.bf16.mxu1 %v7751_v21 }
0x260b   :  { %5410 = vmatpush3.bf16.msra.mxu1 %v7043_v60 }
0x260c   :  { %5411 = vmatprep.subr.bf16.mxu1 %v7751_v21 }
0x260f   :  { %5412 = vmatpush3.bf16.msra.mxu1 %v7050_v48 }
0x2610   :  { %5413 = vmatprep.subr.bf16.mxu1 %v7751_v21 }
0x2613   :  { %5414 = vmatpush3.bf16.msra.mxu1 %v7057_v35 }
0x2614   :  { %5415 = vmatprep.subr.bf16.mxu1 %v7751_v21 }
0x2617   :  { %5416 = vmatpush3.bf16.msra.mxu1 %v7084_v62 }
0x2618   :  { %5417 = vmatprep.subr.bf16.mxu1 %v7751_v21 }
0x261b   :  { %5418 = vmatpush3.bf16.msra.mxu1 %v7091_v13 }
0x261c   :  { %5443 = vmatprep.subr.bf16.mxu1 %v7751_v21 }
0x26be   :  { %v2819_v2 = vpop.f32.mrf.mxu1 }
0x26bf   :  { %v2825_v54 = vadd.f32 %v2819_v2, %v603_v20  ;;  %v7468_v20 = vld [vmem:[%s7731_s2 + $0x20] sm:$0xff]   ;;  %v7475_v2 = vld [vmem:[%s7731_s2 + $0x18] sm:$0xff]  }
0x26c0   :  { %v5381_v8 = vpop.f32.mrf.mxu1 }
0x26c1   :  { %5889 = vtanh.f32 %v2825_v54  ;;  %v7482_v54 = vld [vmem:[%s7731_s2 + $0x10] sm:$0xff]  }
0x26c2   :  { %v2822_v59 = vpop.f32.mrf.mxu1  ;;  %v7757_v8 = vld [vmem:[#allocation9_spill] sm:$0xff] }
0x26c3   :  { %v627_v59 = vadd.f32 %v7098_v14, %v7757_v8 }
0x26c4   :  { %v5382_v33 = vpop.f32.mrf.mxu1 }
0x26ce   :  { %v5890_v41 = vpop.eup %5889 }
0x26cf   :  { %v2828_v44 = vpack.c.bf16 %v5890_v41, %v5890_v41 }
0x26d1   :  { %5400 = vmatmul.mubr.bf16.vlgmr.msra.gmra.mxu0 %v2828_v44 }
0x26d2   :  { %5424 = vmatpush3.bf16.msra.mxu0 %v6960_v43  ;;  %5439 = vmatprep.mubr.msk.bf16.mxu0 %vm5955_vm1, %v7751_v21 }
0x26d3   :  { %5425 = vmatprep.subr.bf16.mxu0 %v7751_v21 }
0x26d6   :  { %5426 = vmatpush3.bf16.msra.mxu0 %v6969_v58 }
0x26d7   :  { %5427 = vmatprep.subr.bf16.mxu0 %v7751_v21 }
0x26da   :  { %5428 = vmatpush3.bf16.msra.mxu0 %v6976_v7 }
0x26db   :  { %5429 = vmatprep.subr.bf16.mxu0 %v7751_v21 }
0x26de   :  { %5430 = vmatpush3.bf16.msra.mxu0 %v7043_v60 }
0x26df   :  { %5431 = vmatprep.subr.bf16.mxu0 %v7751_v21 }
0x26e2   :  { %5432 = vmatpush3.bf16.msra.mxu0 %v7050_v48 }
0x26e3   :  { %5433 = vmatprep.subr.bf16.mxu0 %v7751_v21 }
0x26e6   :  { %5434 = vmatpush3.bf16.msra.mxu0 %v7057_v35 }
0x26e7   :  { %5435 = vmatprep.subr.bf16.mxu0 %v7751_v21 }
0x26ea   :  { %5436 = vmatpush3.bf16.msra.mxu0 %v7084_v62 }
0x26eb   :  { %5437 = vmatprep.subr.bf16.mxu0 %v7751_v21 }
0x26ee   :  { %5438 = vmatpush3.bf16.msra.mxu0 %v7091_v13 }
0x26ef   :  { %5463 = vmatprep.subr.bf16.mxu0 %v7751_v21 }
0x2791   :  { %v2863_v6 = vpop.f32.mrf.mxu0 }
0x2792   :  { %v2869_v26 = vadd.f32 %v2863_v6, %v606_v47 }
0x2793   :  { %v5401_v55 = vpop.f32.mrf.mxu0 }
0x2794   :  { %5891 = vtanh.f32 %v2869_v26  ;;  %v7758_v55 = vld [vmem:[#allocation11_spill] sm:$0xff] }
0x2795   :  { %v2866_v45 = vpop.f32.mrf.mxu0 }
0x2797   :  { %v5402_v61 = vpop.f32.mrf.mxu0 }
0x27a1   :  { %v5892_v51 = vpop.eup %5891 }
0x27a2   :  { %v2872_v19 = vpack.c.bf16 %v5892_v51, %v5892_v51 }
0x27a4   :  { %5420 = vmatmul.mubr.bf16.vlgmr.msra.gmra.mxu1 %v2872_v19 }
0x27a5   :  { %5444 = vmatpush3.bf16.msra.mxu1 %v6960_v43  ;;  %5459 = vmatprep.mubr.msk.bf16.mxu1 %vm5955_vm1, %v7751_v21  ;;  %v7753_v43 = vld [vmem:[#allocation5_spill] sm:$0xff] }
0x27a6   :  { %5445 = vmatprep.subr.bf16.mxu1 %v7751_v21 }
0x27a9   :  { %5446 = vmatpush3.bf16.msra.mxu1 %v6969_v58  ;;  %v611_v58 = vadd.f32 %v7098_v14, %v7753_v43 }
0x27aa   :  { %5447 = vmatprep.subr.bf16.mxu1 %v7751_v21 }
0x27ad   :  { %5448 = vmatpush3.bf16.msra.mxu1 %v6976_v7 }
0x27ae   :  { %5449 = vmatprep.subr.bf16.mxu1 %v7751_v21 }
0x27b1   :  { %5450 = vmatpush3.bf16.msra.mxu1 %v7043_v60 }
0x27b2   :  { %5451 = vmatprep.subr.bf16.mxu1 %v7751_v21 }
0x27b5   :  { %5452 = vmatpush3.bf16.msra.mxu1 %v7050_v48 }
0x27b6   :  { %5453 = vmatprep.subr.bf16.mxu1 %v7751_v21 }
0x27b9   :  { %5454 = vmatpush3.bf16.msra.mxu1 %v7057_v35 }
0x27ba   :  { %5455 = vmatprep.subr.bf16.mxu1 %v7751_v21 }
0x27bd   :  { %5456 = vmatpush3.bf16.msra.mxu1 %v7084_v62 }
0x27be   :  { %5457 = vmatprep.subr.bf16.mxu1 %v7751_v21 }
0x27c1   :  { %5458 = vmatpush3.bf16.msra.mxu1 %v7091_v13 }
0x27c2   :  { %5483 = vmatprep.subr.bf16.mxu1 %v7751_v21 }
0x2864   :  { %v2907_v7 = vpop.f32.mrf.mxu1 }
0x2865   :  { %v2913_v22 = vadd.f32 %v2907_v7, %v611_v58 }
0x2866   :  { %v5421_v15 = vpop.f32.mrf.mxu1 }
0x2867   :  { %5893 = vtanh.f32 %v2913_v22  ;;  %v7759_v15 = vld [vmem:[#allocation8_spill] sm:$0xff] }
0x2868   :  { %v2910_v36 = vpop.f32.mrf.mxu1 }
0x286a   :  { %v5422_v34 = vpop.f32.mrf.mxu1 }
0x2874   :  { %v5894_v10 = vpop.eup %5893 }
0x2875   :  { %v2916_v57 = vpack.c.bf16 %v5894_v10, %v5894_v10 }
0x2877   :  { %5440 = vmatmul.mubr.bf16.vlgmr.msra.gmra.mxu0 %v2916_v57 }
0x2878   :  { %5464 = vmatpush3.bf16.msra.mxu0 %v7385_v0  ;;  %5479 = vmatprep.mubr.msk.bf16.mxu0 %vm5955_vm1, %v7751_v21 }
0x2879   :  { %5465 = vmatprep.subr.bf16.mxu0 %v7751_v21 }
0x287c   :  { %5466 = vmatpush3.bf16.msra.mxu0 %v7394_v42 }
0x287d   :  { %5467 = vmatprep.subr.bf16.mxu0 %v7751_v21 }
0x2880   :  { %5468 = vmatpush3.bf16.msra.mxu0 %v7401_v49 }
0x2881   :  { %5469 = vmatprep.subr.bf16.mxu0 %v7751_v21 }
0x2884   :  { %5470 = vmatpush3.bf16.msra.mxu0 %v7043_v60 }
0x2885   :  { %5471 = vmatprep.subr.bf16.mxu0 %v7751_v21 }
0x2888   :  { %5472 = vmatpush3.bf16.msra.mxu0 %v7050_v48 }
0x2889   :  { %5473 = vmatprep.subr.bf16.mxu0 %v7751_v21 }
0x288c   :  { %5474 = vmatpush3.bf16.msra.mxu0 %v7057_v35 }
0x288d   :  { %5475 = vmatprep.subr.bf16.mxu0 %v7751_v21 }
0x2890   :  { %5476 = vmatpush3.bf16.msra.mxu0 %v7084_v62 }
0x2891   :  { %5477 = vmatprep.subr.bf16.mxu0 %v7751_v21 }
0x2894   :  { %5478 = vmatpush3.bf16.msra.mxu0 %v7091_v13 }
0x2895   :  { %5503 = vmatprep.subr.bf16.mxu0 %v7751_v21 }
0x2937   :  { %v2951_v38 = vpop.f32.mrf.mxu0 }
0x2938   :  { %v2957_v53 = vadd.f32 %v2951_v38, %v614_v23 }
0x2939   :  { %v5441_v5 = vpop.f32.mrf.mxu0 }
0x293a   :  { %5895 = vtanh.f32 %v2957_v53  ;;  %v7760_v5 = vld [vmem:[#allocation10_spill] sm:$0xff] }
0x293b   :  { %v2954_v46 = vpop.f32.mrf.mxu0 }
0x293d   :  { %v5442_v3 = vpop.f32.mrf.mxu0 }
0x2947   :  { %v5896_v11 = vpop.eup %5895 }
0x2948   :  { %v2960_v9 = vpack.c.bf16 %v5896_v11, %v5896_v11 }
0x294a   :  { %5460 = vmatmul.mubr.bf16.vlgmr.msra.gmra.mxu1 %v2960_v9 }
0x294b   :  { %5484 = vmatpush3.bf16.msra.mxu1 %v7385_v0  ;;  %5499 = vmatprep.mubr.msk.bf16.mxu1 %vm5955_vm1, %v7751_v21 }
0x294c   :  { %5485 = vmatprep.subr.bf16.mxu1 %v7751_v21 }
0x294f   :  { %5486 = vmatpush3.bf16.msra.mxu1 %v7394_v42 }
0x2950   :  { %5487 = vmatprep.subr.bf16.mxu1 %v7751_v21 }
0x2953   :  { %5488 = vmatpush3.bf16.msra.mxu1 %v7401_v49 }
0x2954   :  { %5489 = vmatprep.subr.bf16.mxu1 %v7751_v21 }
0x2957   :  { %5490 = vmatpush3.bf16.msra.mxu1 %v7043_v60 }
0x2958   :  { %5491 = vmatprep.subr.bf16.mxu1 %v7751_v21 }
0x295b   :  { %5492 = vmatpush3.bf16.msra.mxu1 %v7050_v48 }
0x295c   :  { %5493 = vmatprep.subr.bf16.mxu1 %v7751_v21 }
0x295f   :  { %5494 = vmatpush3.bf16.msra.mxu1 %v7057_v35 }
0x2960   :  { %5495 = vmatprep.subr.bf16.mxu1 %v7751_v21 }
0x2963   :  { %5496 = vmatpush3.bf16.msra.mxu1 %v7084_v62 }
0x2964   :  { %5497 = vmatprep.subr.bf16.mxu1 %v7751_v21 }
0x2967   :  { %5498 = vmatpush3.bf16.msra.mxu1 %v7091_v13 }
0x2968   :  { %5523 = vmatprep.subr.bf16.mxu1 %v7751_v21 }
0x2a0a   :  { %v2995_v52 = vpop.f32.mrf.mxu1 }
0x2a0b   :  { %v3001_v56 = vadd.f32 %v2995_v52, %v619_v37 }
0x2a0c   :  { %v5461_v28 = vpop.f32.mrf.mxu1 }
0x2a0d   :  { %5897 = vtanh.f32 %v3001_v56  ;;  %v7761_v28 = vld [vmem:[#allocation13_spill] sm:$0xff] }
0x2a0e   :  { %v2998_v27 = vpop.f32.mrf.mxu1 }
0x2a10   :  { %v5462_v63 = vpop.f32.mrf.mxu1 }
0x2a1a   :  { %v5898_v18 = vpop.eup %5897 }
0x2a1b   :  { %v3004_v32 = vpack.c.bf16 %v5898_v18, %v5898_v18 }
0x2a1d   :  { %5480 = vmatmul.mubr.bf16.vlgmr.msra.gmra.mxu0 %v3004_v32 }
0x2a1e   :  { %5504 = vmatpush3.bf16.msra.mxu0 %v7385_v0  ;;  %5519 = vmatprep.mubr.msk.bf16.mxu0 %vm5955_vm1, %v7751_v21 }
0x2a1f   :  { %5505 = vmatprep.subr.bf16.mxu0 %v7751_v21 }
0x2a22   :  { %5506 = vmatpush3.bf16.msra.mxu0 %v7394_v42 }
0x2a23   :  { %5507 = vmatprep.subr.bf16.mxu0 %v7751_v21 }
0x2a26   :  { %5508 = vmatpush3.bf16.msra.mxu0 %v7401_v49 }
0x2a27   :  { %5509 = vmatprep.subr.bf16.mxu0 %v7751_v21 }
0x2a2a   :  { %5510 = vmatpush3.bf16.msra.mxu0 %v7043_v60  ;;  %v622_v60 = vadd.f32 %v7098_v14, %v7756_v16  ;;  %v7523_v14 = vld [vmem:[%s7732_s3] ss:$0 sm:$0xff] }
0x2a2b   :  { %5511 = vmatprep.subr.bf16.mxu0 %v7751_v21  ;;  %v630_v45 = vadd.f32 %v7523_v14, %v7758_v55  ;;  %v635_v36 = vadd.f32 %v7523_v14, %v7759_v15  ;;  %v638_v46 = vadd.f32 %v7523_v14, %v7760_v5  ;;  %v643_v27 = vadd.f32 %v7523_v14, %v7761_v28  ;;  %v5790_v28 = vld [vmem:[%s7733_s4 + $0x30] sm:$0xff]  }
0x2a2e   :  { %5512 = vmatpush3.bf16.msra.mxu0 %v7050_v48 }
0x2a2f   :  { %5513 = vmatprep.subr.bf16.mxu0 %v7751_v21 }
0x2a32   :  { %5514 = vmatpush3.bf16.msra.mxu0 %v7057_v35 }
0x2a33   :  { %5515 = vmatprep.subr.bf16.mxu0 %v7751_v21 }
0x2a36   :  { %5516 = vmatpush3.bf16.msra.mxu0 %v7084_v62 }
0x2a37   :  { %5517 = vmatprep.subr.bf16.mxu0 %v7751_v21 }
0x2a3a   :  { %5518 = vmatpush3.bf16.msra.mxu0 %v7091_v13 }
0x2a3b   :  { %5543 = vmatprep.subr.bf16.mxu0 %v7751_v21 }
0x2add   :  { %v3039_v39 = vpop.f32.mrf.mxu0 }
0x2ade   :  { %v3045_v12 = vadd.f32 %v3039_v39, %v622_v60 }
0x2adf   :  { %v5481_v48 = vpop.f32.mrf.mxu0 }
0x2ae0   :  { %5899 = vtanh.f32 %v3045_v12  ;;  %v646_v48 = vadd.f32 %v7523_v14, %v6420_v1  ;;  %v7762_v1 = vld [vmem:[#allocation12_spill] sm:$0xff] }
0x2ae1   :  { %v3042_v40 = vpop.f32.mrf.mxu0 }
0x2ae3   :  { %v5482_v50 = vpop.f32.mrf.mxu0 }
0x2aed   :  { %v5900_v35 = vpop.eup %5899 }
0x2aee   :  { %v3048_v29 = vpack.c.bf16 %v5900_v35, %v5900_v35 }
0x2af0   :  { %5500 = vmatmul.mubr.bf16.vlgmr.msra.gmra.mxu1 %v3048_v29 }
0x2af1   :  { %5524 = vmatpush3.bf16.msra.mxu1 %v7385_v0  ;;  %5539 = vmatprep.mubr.msk.bf16.mxu1 %vm5955_vm1, %v7751_v21 }
0x2af2   :  { %5525 = vmatprep.subr.bf16.mxu1 %v7751_v21 }
0x2af5   :  { %5526 = vmatpush3.bf16.msra.mxu1 %v7394_v42 }
0x2af6   :  { %5527 = vmatprep.subr.bf16.mxu1 %v7751_v21 }
0x2af9   :  { %5528 = vmatpush3.bf16.msra.mxu1 %v7401_v49 }
0x2afa   :  { %5529 = vmatprep.subr.bf16.mxu1 %v7751_v21 }
0x2afd   :  { %5530 = vmatpush3.bf16.msra.mxu1 %v7468_v20 }
0x2afe   :  { %5531 = vmatprep.subr.bf16.mxu1 %v7751_v21 }
0x2b01   :  { %5532 = vmatpush3.bf16.msra.mxu1 %v7475_v2 }
0x2b02   :  { %5533 = vmatprep.subr.bf16.mxu1 %v7751_v21 }
0x2b05   :  { %5534 = vmatpush3.bf16.msra.mxu1 %v7482_v54 }
0x2b06   :  { %5535 = vmatprep.subr.bf16.mxu1 %v7751_v21 }
0x2b09   :  { %5536 = vmatpush3.bf16.msra.mxu1 %v7084_v62  ;;  %v7509_v62 = vld [vmem:[%s7731_s2 + $0x8] sm:$0xff]  }
0x2b0a   :  { %5537 = vmatprep.subr.bf16.mxu1 %v7751_v21 }
0x2b0d   :  { %5538 = vmatpush3.bf16.msra.mxu1 %v7091_v13  ;;  %v7516_v13 = vld [vmem:[%s7731_s2] sm:$0xff]  }
0x2b0e   :  { %5563 = vmatprep.subr.bf16.mxu1 %v7751_v21 }
0x2bb0   :  { %v3083_v33 = vpop.f32.mrf.mxu1 }
0x2bb1   :  { %v3089_v41 = vadd.f32 %v3083_v33, %v627_v59 }
0x2bb2   :  { %v5501_v44 = vpop.f32.mrf.mxu1 }
0x2bb3   :  { %5901 = vtanh.f32 %v3089_v41  ;;  %v651_v41 = vadd.f32 %v7523_v14, %v7762_v1 }
0x2bb4   :  { %v3086_v17 = vpop.f32.mrf.mxu1 }
0x2bb6   :  { %v5502_v47 = vpop.f32.mrf.mxu1 }
0x2bc0   :  { %v5902_v6 = vpop.eup %5901 }
0x2bc1   :  { %v3092_v26 = vpack.c.bf16 %v5902_v6, %v5902_v6 }
0x2bc3   :  { %5520 = vmatmul.mubr.bf16.vlgmr.msra.gmra.mxu0 %v3092_v26 }
0x2bc4   :  { %5544 = vmatpush3.bf16.msra.mxu0 %v7385_v0  ;;  %5559 = vmatprep.mubr.msk.bf16.mxu0 %vm5955_vm1, %v7751_v21 }
0x2bc5   :  { %5545 = vmatprep.subr.bf16.mxu0 %v7751_v21 }
0x2bc8   :  { %5546 = vmatpush3.bf16.msra.mxu0 %v7394_v42 }
0x2bc9   :  { %5547 = vmatprep.subr.bf16.mxu0 %v7751_v21 }
0x2bcc   :  { %5548 = vmatpush3.bf16.msra.mxu0 %v7401_v49 }
0x2bcd   :  { %5549 = vmatprep.subr.bf16.mxu0 %v7751_v21 }
0x2bd0   :  { %5550 = vmatpush3.bf16.msra.mxu0 %v7468_v20 }
0x2bd1   :  { %5551 = vmatprep.subr.bf16.mxu0 %v7751_v21 }
0x2bd4   :  { %5552 = vmatpush3.bf16.msra.mxu0 %v7475_v2 }
0x2bd5   :  { %5553 = vmatprep.subr.bf16.mxu0 %v7751_v21 }
0x2bd8   :  { %5554 = vmatpush3.bf16.msra.mxu0 %v7482_v54 }
0x2bd9   :  { %5555 = vmatprep.subr.bf16.mxu0 %v7751_v21 }
0x2bdc   :  { %5556 = vmatpush3.bf16.msra.mxu0 %v7509_v62 }
0x2bdd   :  { %5557 = vmatprep.subr.bf16.mxu0 %v7751_v21 }
0x2be0   :  { %5558 = vmatpush3.bf16.msra.mxu0 %v7516_v13 }
0x2be1   :  { %5583 = vmatprep.subr.bf16.mxu0 %v7751_v21 }
0x2c83   :  { %v3127_v61 = vpop.f32.mrf.mxu0 }
0x2c84   :  { %v3133_v51 = vadd.f32 %v3127_v61, %v630_v45  ;;  %v7763_v61 = vld [vmem:[#allocation14_spill] sm:$0xff] }
0x2c85   :  { %v5521_v19 = vpop.f32.mrf.mxu0 }
0x2c86   :  { %5903 = vtanh.f32 %v3133_v51  ;;  %v654_v51 = vadd.f32 %v7523_v14, %v7763_v61 }
0x2c87   :  { %v3130_v43 = vpop.f32.mrf.mxu0 }
0x2c89   :  { %v5522_v58 = vpop.f32.mrf.mxu0 }
0x2c93   :  { %v5904_v7 = vpop.eup %5903 }
0x2c94   :  { %v3136_v22 = vpack.c.bf16 %v5904_v7, %v5904_v7 }
0x2c96   :  { %5540 = vmatmul.mubr.bf16.vlgmr.msra.gmra.mxu1 %v3136_v22 }
0x2c97   :  { %5564 = vmatpush3.bf16.msra.mxu1 %v7385_v0  ;;  %5579 = vmatprep.mubr.msk.bf16.mxu1 %vm5955_vm1, %v7751_v21 }
0x2c98   :  { %5565 = vmatprep.subr.bf16.mxu1 %v7751_v21 }
0x2c9b   :  { %5566 = vmatpush3.bf16.msra.mxu1 %v7394_v42 }
0x2c9c   :  { %5567 = vmatprep.subr.bf16.mxu1 %v7751_v21 }
0x2c9f   :  { %5568 = vmatpush3.bf16.msra.mxu1 %v7401_v49 }
0x2ca0   :  { %5569 = vmatprep.subr.bf16.mxu1 %v7751_v21 }
0x2ca3   :  { %5570 = vmatpush3.bf16.msra.mxu1 %v7468_v20 }
0x2ca4   :  { %5571 = vmatprep.subr.bf16.mxu1 %v7751_v21 }
0x2ca7   :  { %5572 = vmatpush3.bf16.msra.mxu1 %v7475_v2 }
0x2ca8   :  { %5573 = vmatprep.subr.bf16.mxu1 %v7751_v21 }
0x2cab   :  { %5574 = vmatpush3.bf16.msra.mxu1 %v7482_v54 }
0x2cac   :  { %5575 = vmatprep.subr.bf16.mxu1 %v7751_v21 }
0x2caf   :  { %5576 = vmatpush3.bf16.msra.mxu1 %v7509_v62 }
0x2cb0   :  { %5577 = vmatprep.subr.bf16.mxu1 %v7751_v21 }
0x2cb3   :  { %5578 = vmatpush3.bf16.msra.mxu1 %v7516_v13 }
0x2cb4   :  { %5603 = vmatprep.subr.bf16.mxu1 %v7751_v21 }
0x2d56   :  { %v3171_v34 = vpop.f32.mrf.mxu1 }
0x2d57   :  { %v3177_v10 = vadd.f32 %v3171_v34, %v635_v36  ;;  %v659_v34 = vadd.f32 %v7523_v14, %v6424_v24  ;;  %v662_v24 = vadd.f32 %v7523_v14, %v6428_v31 }
0x2d58   :  { %v5541_v57 = vpop.f32.mrf.mxu1 }
0x2d59   :  { %5905 = vtanh.f32 %v3177_v10 }
0x2d5a   :  { %v3174_v4 = vpop.f32.mrf.mxu1 }
0x2d5c   :  { %v5542_v23 = vpop.f32.mrf.mxu1 }
0x2d66   :  { %v5906_v38 = vpop.eup %5905 }
0x2d67   :  { %v3180_v53 = vpack.c.bf16 %v5906_v38, %v5906_v38 }
0x2d69   :  { %5560 = vmatmul.mubr.bf16.vlgmr.msra.gmra.mxu0 %v3180_v53 }
0x2d6a   :  { %5584 = vmatpush3.bf16.msra.mxu0 %v7385_v0  ;;  %5599 = vmatprep.mubr.msk.bf16.mxu0 %vm5955_vm1, %v7751_v21 }
0x2d6b   :  { %5585 = vmatprep.subr.bf16.mxu0 %v7751_v21 }
0x2d6e   :  { %5586 = vmatpush3.bf16.msra.mxu0 %v7394_v42 }
0x2d6f   :  { %5587 = vmatprep.subr.bf16.mxu0 %v7751_v21 }
0x2d72   :  { %5588 = vmatpush3.bf16.msra.mxu0 %v7401_v49 }
0x2d73   :  { %5589 = vmatprep.subr.bf16.mxu0 %v7751_v21 }
0x2d76   :  { %5590 = vmatpush3.bf16.msra.mxu0 %v7468_v20 }
0x2d77   :  { %5591 = vmatprep.subr.bf16.mxu0 %v7751_v21 }
0x2d7a   :  { %5592 = vmatpush3.bf16.msra.mxu0 %v7475_v2 }
0x2d7b   :  { %5593 = vmatprep.subr.bf16.mxu0 %v7751_v21 }
0x2d7e   :  { %5594 = vmatpush3.bf16.msra.mxu0 %v7482_v54 }
0x2d7f   :  { %5595 = vmatprep.subr.bf16.mxu0 %v7751_v21 }
0x2d82   :  { %5596 = vmatpush3.bf16.msra.mxu0 %v7509_v62 }
0x2d83   :  { %5597 = vmatprep.subr.bf16.mxu0 %v7751_v21 }
0x2d86   :  { %5598 = vmatpush3.bf16.msra.mxu0 %v7516_v13 }
0x2d87   :  { %5623 = vmatprep.subr.bf16.mxu0 %v7751_v21 }
0x2e29   :  { %v3215_v3 = vpop.f32.mrf.mxu0 }
0x2e2a   :  { %v3221_v11 = vadd.f32 %v3215_v3, %v638_v46 }
0x2e2b   :  { %v5561_v9 = vpop.f32.mrf.mxu0 }
0x2e2c   :  { %5907 = vtanh.f32 %v3221_v11 }
0x2e2d   :  { %v3218_v25 = vpop.f32.mrf.mxu0 }
0x2e2f   :  { %v5562_v37 = vpop.f32.mrf.mxu0 }
0x2e39   :  { %v5908_v52 = vpop.eup %5907 }
0x2e3a   :  { %v3224_v56 = vpack.c.bf16 %v5908_v52, %v5908_v52 }
0x2e3c   :  { %5580 = vmatmul.mubr.bf16.vlgmr.msra.gmra.mxu1 %v3224_v56  ;;  %v5789_v56 = vld [vmem:[%s7733_s4 + $0x38] sm:$0xff]  }
0x2e3d   :  { %5604 = vmatpush3.bf16.msra.mxu1 %v7385_v0  ;;  %5619 = vmatprep.mubr.msk.bf16.mxu1 %vm5955_vm1, %v7751_v21 }
0x2e3e   :  { %5605 = vmatprep.subr.bf16.mxu1 %v7751_v21 }
0x2e41   :  { %5606 = vmatpush3.bf16.msra.mxu1 %v7394_v42 }
0x2e42   :  { %5607 = vmatprep.subr.bf16.mxu1 %v7751_v21 }
0x2e45   :  { %5608 = vmatpush3.bf16.msra.mxu1 %v7401_v49 }
0x2e46   :  { %5609 = vmatprep.subr.bf16.mxu1 %v7751_v21 }
0x2e49   :  { %5610 = vmatpush3.bf16.msra.mxu1 %v7468_v20 }
0x2e4a   :  { %5611 = vmatprep.subr.bf16.mxu1 %v7751_v21 }
0x2e4d   :  { %5612 = vmatpush3.bf16.msra.mxu1 %v7475_v2 }
0x2e4e   :  { %5613 = vmatprep.subr.bf16.mxu1 %v7751_v21 }
0x2e51   :  { %5614 = vmatpush3.bf16.msra.mxu1 %v7482_v54 }
0x2e52   :  { %5615 = vmatprep.subr.bf16.mxu1 %v7751_v21 }
0x2e55   :  { %5616 = vmatpush3.bf16.msra.mxu1 %v7509_v62 }
0x2e56   :  { %5617 = vmatprep.subr.bf16.mxu1 %v7751_v21 }
0x2e59   :  { %5618 = vmatpush3.bf16.msra.mxu1 %v7516_v13 }
0x2e5a   :  { %5643 = vmatprep.subr.bf16.mxu1 %v7751_v21 }
0x2efc   :  { %v3259_v63 = vpop.f32.mrf.mxu1 }
0x2efd   :  { %v3265_v18 = vadd.f32 %v3259_v63, %v643_v27  ;;  %v5791_v27 = vld [vmem:[%s7733_s4 + $0x28] sm:$0xff]   ;;  %v5792_v63 = vld [vmem:[%s7733_s4 + $0x20] sm:$0xff]  }
0x2efe   :  { %v5581_v32 = vpop.f32.mrf.mxu1 }
0x2eff   :  { %5909 = vtanh.f32 %v3265_v18  ;;  %v5793_v18 = vld [vmem:[%s7733_s4 + $0x18] sm:$0xff]   ;;  %v5794_v32 = vld [vmem:[%s7733_s4 + $0x10] sm:$0xff]  }
0x2f00   :  { %v3262_v16 = vpop.f32.mrf.mxu1 }
0x2f01   :  { %v5795_v16 = vld [vmem:[%s7733_s4 + $0x8] sm:$0xff]  }
0x2f02   :  { %v5582_v60 = vpop.f32.mrf.mxu1 }
0x2f03   :  { %v5796_v60 = vld [vmem:[%s7733_s4] sm:$0xff]  }
0x2f0c   :  { %v5910_v39 = vpop.eup %5909 }
0x2f0d   :  { %v3268_v12 = vpack.c.bf16 %v5910_v39, %v5910_v39  ;;  %v670_v39 = vadd.f32 %v7523_v14, %v6426_v30 }
0x2f0f   :  { %5600 = vmatmul.mubr.bf16.vlgmr.msra.gmra.mxu0 %v3268_v12 }
0x2f10   :  { %5624 = vmatpush3.bf16.msra.mxu0 %v7385_v0  ;;  %5639 = vmatprep.mubr.msk.bf16.mxu0 %vm5955_vm1, %v7751_v21 }
0x2f11   :  { %5625 = vmatprep.subr.bf16.mxu0 %v7751_v21 }
0x2f14   :  { %5626 = vmatpush3.bf16.msra.mxu0 %v7394_v42 }
0x2f15   :  { %5627 = vmatprep.subr.bf16.mxu0 %v7751_v21 }
0x2f18   :  { %5628 = vmatpush3.bf16.msra.mxu0 %v7401_v49 }
0x2f19   :  { %5629 = vmatprep.subr.bf16.mxu0 %v7751_v21 }
0x2f1c   :  { %5630 = vmatpush3.bf16.msra.mxu0 %v7468_v20 }
0x2f1d   :  { %5631 = vmatprep.subr.bf16.mxu0 %v7751_v21 }
0x2f20   :  { %5632 = vmatpush3.bf16.msra.mxu0 %v7475_v2 }
0x2f21   :  { %5633 = vmatprep.subr.bf16.mxu0 %v7751_v21 }
0x2f24   :  { %5634 = vmatpush3.bf16.msra.mxu0 %v7482_v54 }
0x2f25   :  { %5635 = vmatprep.subr.bf16.mxu0 %v7751_v21 }
0x2f28   :  { %5636 = vmatpush3.bf16.msra.mxu0 %v7509_v62 }
0x2f29   :  { %5637 = vmatprep.subr.bf16.mxu0 %v7751_v21 }
0x2f2c   :  { %5638 = vmatpush3.bf16.msra.mxu0 %v7516_v13 }
0x2f2d   :  { %5663 = vmatprep.subr.bf16.mxu0 %v7751_v21 }
0x2fcf   :  { %v3303_v40 = vpop.f32.mrf.mxu0 }
0x2fd0   :  { %v3309_v50 = vadd.f32 %v3303_v40, %v646_v48 }
0x2fd1   :  { %v5601_v35 = vpop.f32.mrf.mxu0 }
0x2fd2   :  { %5911 = vtanh.f32 %v3309_v50 }
0x2fd3   :  { %v3306_v29 = vpop.f32.mrf.mxu0 }
0x2fd5   :  { %v5602_v8 = vpop.f32.mrf.mxu0 }
0x2fdf   :  { %v5912_v59 = vpop.eup %5911 }
0x2fe0   :  { %v3312_v33 = vpack.c.bf16 %v5912_v59, %v5912_v59 }
0x2fe2   :  { %5620 = vmatmul.mubr.bf16.vlgmr.msra.gmra.mxu1 %v3312_v33 }
0x2fe3   :  { %5644 = vmatpush3.bf16.msra.mxu1 %v7385_v0  ;;  %5659 = vmatprep.mubr.msk.bf16.mxu1 %vm5955_vm1, %v7751_v21 }
0x2fe4   :  { %5645 = vmatprep.subr.bf16.mxu1 %v7751_v21 }
0x2fe7   :  { %5646 = vmatpush3.bf16.msra.mxu1 %v7394_v42 }
0x2fe8   :  { %5647 = vmatprep.subr.bf16.mxu1 %v7751_v21 }
0x2feb   :  { %5648 = vmatpush3.bf16.msra.mxu1 %v7401_v49 }
0x2fec   :  { %5649 = vmatprep.subr.bf16.mxu1 %v7751_v21 }
0x2fef   :  { %5650 = vmatpush3.bf16.msra.mxu1 %v7468_v20 }
0x2ff0   :  { %5651 = vmatprep.subr.bf16.mxu1 %v7751_v21 }
0x2ff3   :  { %5652 = vmatpush3.bf16.msra.mxu1 %v7475_v2 }
0x2ff4   :  { %5653 = vmatprep.subr.bf16.mxu1 %v7751_v21 }
0x2ff7   :  { %5654 = vmatpush3.bf16.msra.mxu1 %v7482_v54 }
0x2ff8   :  { %5655 = vmatprep.subr.bf16.mxu1 %v7751_v21 }
0x2ffb   :  { %5656 = vmatpush3.bf16.msra.mxu1 %v7509_v62 }
0x2ffc   :  { %5657 = vmatprep.subr.bf16.mxu1 %v7751_v21 }
0x2fff   :  { %5658 = vmatpush3.bf16.msra.mxu1 %v7516_v13 }
0x3000   :  { %5683 = vmatprep.subr.bf16.mxu1 %v7751_v21 }
0x30a2   :  { %v3347_v44 = vpop.f32.mrf.mxu1 }
0x30a3   :  { %v3353_v17 = vadd.f32 %v3347_v44, %v651_v41 }
0x30a4   :  { %v5621_v47 = vpop.f32.mrf.mxu1 }
0x30a5   :  { %5913 = vtanh.f32 %v3353_v17 }
0x30a6   :  { %v3350_v6 = vpop.f32.mrf.mxu1 }
0x30a8   :  { %v5622_v26 = vpop.f32.mrf.mxu1 }
0x30b2   :  { %v5914_v55 = vpop.eup %5913 }
0x30b3   :  { %v3356_v45 = vpack.c.bf16 %v5914_v55, %v5914_v55 }
0x30b5   :  { %5640 = vmatmul.mubr.bf16.vlgmr.msra.gmra.mxu0 %v3356_v45 }
0x30b6   :  { %5664 = vmatpush3.bf16.msra.mxu0 %v7385_v0  ;;  %5679 = vmatprep.mubr.msk.bf16.mxu0 %vm5955_vm1, %v7751_v21 }
0x30b7   :  { %5665 = vmatprep.subr.bf16.mxu0 %v7751_v21 }
0x30ba   :  { %5666 = vmatpush3.bf16.msra.mxu0 %v7394_v42 }
0x30bb   :  { %5667 = vmatprep.subr.bf16.mxu0 %v7751_v21 }
0x30be   :  { %5668 = vmatpush3.bf16.msra.mxu0 %v7401_v49 }
0x30bf   :  { %5669 = vmatprep.subr.bf16.mxu0 %v7751_v21 }
0x30c2   :  { %5670 = vmatpush3.bf16.msra.mxu0 %v7468_v20 }
0x30c3   :  { %5671 = vmatprep.subr.bf16.mxu0 %v7751_v21 }
0x30c6   :  { %5672 = vmatpush3.bf16.msra.mxu0 %v7475_v2 }
0x30c7   :  { %5673 = vmatprep.subr.bf16.mxu0 %v7751_v21 }
0x30ca   :  { %5674 = vmatpush3.bf16.msra.mxu0 %v7482_v54 }
0x30cb   :  { %5675 = vmatprep.subr.bf16.mxu0 %v7751_v21 }
0x30ce   :  { %5676 = vmatpush3.bf16.msra.mxu0 %v7509_v62 }
0x30cf   :  { %5677 = vmatprep.subr.bf16.mxu0 %v7751_v21 }
0x30d2   :  { %5678 = vmatpush3.bf16.msra.mxu0 %v7516_v13 }
0x30d3   :  { %5703 = vmatprep.subr.bf16.mxu0 %v7751_v21 }
0x3175   :  { %v3391_v19 = vpop.f32.mrf.mxu0 }
0x3176   :  { %v3397_v43 = vadd.f32 %v3391_v19, %v654_v51 }
0x3177   :  { %v5641_v58 = vpop.f32.mrf.mxu0 }
0x3178   :  { %5915 = vtanh.f32 %v3397_v43 }
0x3179   :  { %v3394_v7 = vpop.f32.mrf.mxu0 }
0x317b   :  { %v5642_v22 = vpop.f32.mrf.mxu0 }
0x3185   :  { %v5916_v15 = vpop.eup %5915 }
0x3186   :  { %v3400_v36 = vpack.c.bf16 %v5916_v15, %v5916_v15 }
0x3188   :  { %5660 = vmatmul.mubr.bf16.vlgmr.msra.gmra.mxu1 %v3400_v36 }
0x3189   :  { %5684 = vmatpush3.bf16.msra.mxu1 %v7385_v0  ;;  %5699 = vmatprep.mubr.msk.bf16.mxu1 %vm5955_vm1, %v7751_v21 }
0x318a   :  { %5685 = vmatprep.subr.bf16.mxu1 %v7751_v21 }
0x318d   :  { %5686 = vmatpush3.bf16.msra.mxu1 %v7394_v42 }
0x318e   :  { %5687 = vmatprep.subr.bf16.mxu1 %v7751_v21 }
0x3191   :  { %5688 = vmatpush3.bf16.msra.mxu1 %v7401_v49 }
0x3192   :  { %5689 = vmatprep.subr.bf16.mxu1 %v7751_v21 }
0x3195   :  { %5690 = vmatpush3.bf16.msra.mxu1 %v7468_v20 }
0x3196   :  { %5691 = vmatprep.subr.bf16.mxu1 %v7751_v21 }
0x3199   :  { %5692 = vmatpush3.bf16.msra.mxu1 %v7475_v2 }
0x319a   :  { %5693 = vmatprep.subr.bf16.mxu1 %v7751_v21 }
0x319d   :  { %5694 = vmatpush3.bf16.msra.mxu1 %v7482_v54 }
0x319e   :  { %5695 = vmatprep.subr.bf16.mxu1 %v7751_v21 }
0x31a1   :  { %5696 = vmatpush3.bf16.msra.mxu1 %v7509_v62 }
0x31a2   :  { %5697 = vmatprep.subr.bf16.mxu1 %v7751_v21 }
0x31a5   :  { %5698 = vmatpush3.bf16.msra.mxu1 %v7516_v13 }
0x31a6   :  { %5723 = vmatprep.subr.bf16.mxu1 %v7751_v21 }
0x3248   :  { %v3435_v10 = vpop.f32.mrf.mxu1 }
0x3249   :  { %v3441_v57 = vadd.f32 %v3435_v10, %v659_v34 }
0x324a   :  { %v5661_v4 = vpop.f32.mrf.mxu1 }
0x324b   :  { %5917 = vtanh.f32 %v3441_v57 }
0x324c   :  { %v3438_v23 = vpop.f32.mrf.mxu1 }
0x324e   :  { %v5662_v38 = vpop.f32.mrf.mxu1 }
0x3258   :  { %v5918_v53 = vpop.eup %5917 }
0x3259   :  { %v3444_v5 = vpack.c.bf16 %v5918_v53, %v5918_v53 }
0x325b   :  { %5680 = vmatmul.mubr.bf16.vlgmr.msra.gmra.mxu0 %v3444_v5 }
0x325c   :  { %5704 = vmatpush3.bf16.msra.mxu0 %v7385_v0  ;;  %5719 = vmatprep.mubr.msk.bf16.mxu0 %vm5955_vm1, %v7751_v21 }
0x325d   :  { %5705 = vmatprep.subr.bf16.mxu0 %v7751_v21 }
0x3260   :  { %5706 = vmatpush3.bf16.msra.mxu0 %v7394_v42 }
0x3261   :  { %5707 = vmatprep.subr.bf16.mxu0 %v7751_v21 }
0x3264   :  { %5708 = vmatpush3.bf16.msra.mxu0 %v7401_v49 }
0x3265   :  { %5709 = vmatprep.subr.bf16.mxu0 %v7751_v21 }
0x3268   :  { %5710 = vmatpush3.bf16.msra.mxu0 %v7468_v20 }
0x3269   :  { %5711 = vmatprep.subr.bf16.mxu0 %v7751_v21 }
0x326c   :  { %5712 = vmatpush3.bf16.msra.mxu0 %v7475_v2 }
0x326d   :  { %5713 = vmatprep.subr.bf16.mxu0 %v7751_v21 }
0x3270   :  { %5714 = vmatpush3.bf16.msra.mxu0 %v7482_v54  ;;  %v7764_v54 = vld [vmem:[#allocation15_spill] sm:$0xff] }
0x3271   :  { %5715 = vmatprep.subr.bf16.mxu0 %v7751_v21 }
0x3274   :  { %5716 = vmatpush3.bf16.msra.mxu0 %v7509_v62  ;;  %v667_v62 = vadd.f32 %v7523_v14, %v7764_v54 }
0x3275   :  { %5717 = vmatprep.subr.bf16.mxu0 %v7751_v21 }
0x3278   :  { %5718 = vmatpush3.bf16.msra.mxu0 %v7516_v13 }
0x331b   :  { %v3479_v0 = vpop.f32.mrf.mxu0 }
0x331c   :  { %v3485_v42 = vadd.f32 %v3479_v0, %v662_v24 }
0x331d   :  { %v5681_v49 = vpop.f32.mrf.mxu0 }
0x331e   :  { %5919 = vtanh.f32 %v3485_v42 }
0x331f   :  { %v3482_v20 = vpop.f32.mrf.mxu0 }
0x3321   :  { %v5682_v2 = vpop.f32.mrf.mxu0 }
0x332b   :  { %v5920_v46 = vpop.eup %5919 }
0x332c   :  { %v3488_v3 = vpack.c.bf16 %v5920_v46, %v5920_v46 }
0x332e   :  { %5700 = vmatmul.mubr.bf16.vlgmr.msra.gmra.mxu1 %v3488_v3 }
0x332f   :  { %5739 = vmatprep.mubr.msk.bf16.mxu1 %vm5955_vm1, %v7751_v21  ;;  %5724 = vmatpush3.bf16.msra.mxu1 %v5789_v56 }
0x3330   :  { %5725 = vmatprep.subr.bf16.mxu1 %v7751_v21 }
0x3333   :  { %5726 = vmatpush3.bf16.msra.mxu1 %v5790_v28 }
0x3334   :  { %5727 = vmatprep.subr.bf16.mxu1 %v7751_v21 }
0x3337   :  { %5728 = vmatpush3.bf16.msra.mxu1 %v5791_v27 }
0x3338   :  { %5729 = vmatprep.subr.bf16.mxu1 %v7751_v21 }
0x333b   :  { %5730 = vmatpush3.bf16.msra.mxu1 %v5792_v63 }
0x333c   :  { %5731 = vmatprep.subr.bf16.mxu1 %v7751_v21 }
0x333f   :  { %5732 = vmatpush3.bf16.msra.mxu1 %v5793_v18 }
0x3340   :  { %5733 = vmatprep.subr.bf16.mxu1 %v7751_v21 }
0x3343   :  { %5734 = vmatpush3.bf16.msra.mxu1 %v5794_v32 }
0x3344   :  { %5735 = vmatprep.subr.bf16.mxu1 %v7751_v21 }
0x3347   :  { %5736 = vmatpush3.bf16.msra.mxu1 %v5795_v16 }
0x3348   :  { %5737 = vmatprep.subr.bf16.mxu1 %v7751_v21  ;;  %v3770_v21 = vld [vmem:[%s7734_s5] ss:$0 sm:$0xff] }
0x334b   :  { %5738 = vmatpush3.bf16.msra.mxu1 %v5796_v60 }
0x33ee   :  { %v3523_v11 = vpop.f32.mrf.mxu1 }
0x33ef   :  { %v3529_v13 = vadd.f32 %v3523_v11, %v667_v62 }
0x33f0   :  { %v5701_v9 = vpop.f32.mrf.mxu1 }
0x33f1   :  { %5921 = vtanh.f32 %v3529_v13 }
0x33f2   :  { %v3526_v31 = vpop.f32.mrf.mxu1 }
0x33f4   :  { %v5702_v25 = vpop.f32.mrf.mxu1 }
0x33fe   :  { %v5922_v37 = vpop.eup %5921 }
0x33ff   :  { %v3532_v52 = vpack.c.bf16 %v5922_v37, %v5922_v37 }
0x3401   :  { %5720 = vmatmul.mubr.bf16.vlgmr.msra.gmra.mxu0 %v3532_v52 }
0x34c1   :  { %v3567_v12 = vpop.f32.mrf.mxu0 }
0x34c2   :  { %v3573_v48 = vadd.f32 %v3567_v12, %v670_v39 }
0x34c3   :  { %v5721_v40 = vpop.f32.mrf.mxu0 }
0x34c4   :  { %5923 = vtanh.f32 %v3573_v48 }
0x34c5   :  { %v3570_v50 = vpop.f32.mrf.mxu0 }
0x34c7   :  { %v5722_v35 = vpop.f32.mrf.mxu0 }
0x34d1   :  { %v5924_v29 = vpop.eup %5923 }
0x34d2   :  { %5925 = vtanh.f32 %v5924_v29 }
0x34df   :  { %v5926_v8 = vpop.eup %5925 }
0x34e0   :  { %v3576_v59 = vpack.c.bf16 %v5926_v8, %v5926_v8 }
0x34e2   :  { %5740 = vmatmul.mubr.bf16.vlgmr.msra.gmra.mxu1 %v3576_v59 }
0x35a2   :  { %v3682_v33 = vpop.f32.mrf.mxu1 }
0x35a3   :  { %v3683_v1 = vadd.f32 %v3770_v21, %v3682_v33 }
0x35a4   :  { %v5741_v41 = vpop.f32.mrf.mxu1 }
0x35a5   :  { %3688 = vst [vmem:[%s7735_s6] sm:$0xff] %v3683_v1 }
0x35a6   :  { %v3685_v30 = vpop.f32.mrf.mxu1 }
0x35a8   :  { %v5742_v14 = vpop.f32.mrf.mxu1 }

</bundles_post_ra>
